<compile_context>
chip_gen: v7x
topology: tpu7x:2x2x1
jax: 0.10.0
libtpu: 0.0.40
codegen_flags: <defaults>
</compile_context>

<pallas_src>
import functools

import jax
import jax.numpy as jnp
from jax import lax
from jax.experimental import pallas as pl
from jax.experimental.pallas import tpu as pltpu

EPS = 1e-5
LANE = 128
VMEM_LIMIT = 32 * 1024 * 1024


def _round_up(x, m):
    return (x + m - 1) // m * m


def _pad_to(a, shape):
    pads = [(0, t - s) for s, t in zip(a.shape, shape)]
    return jnp.pad(a, pads)


def _compiler_params():
    return pltpu.CompilerParams(
        dimension_semantics=("parallel",),
        vmem_limit_bytes=VMEM_LIMIT)


# ---------------------------------------------------------------------------
# Kernels (all tiled over the batch dim: one image per grid step).
# ---------------------------------------------------------------------------
def _dot_and_stats(rows_bf16, w_ref, y_ref, st_ref):
    """rows_bf16: (H*W, Cin) bf16. Writes y (1,H,W,Cout) f32 plus per-image
    BatchNorm partials [row 0 = sum, row 1 = sum of squares] into (1,8,Cout)."""
    y = jnp.dot(rows_bf16, w_ref[...], preferred_element_type=jnp.float32)
    y_ref[...] = y.reshape(y_ref.shape)
    s1 = jnp.sum(y, axis=0, keepdims=True)
    s2 = jnp.sum(y * y, axis=0, keepdims=True)
    st_ref[...] = jnp.concatenate(
        [s1, s2, jnp.zeros((6, y.shape[1]), jnp.float32)], axis=0)[None]


def _conv1x1_stats_kernel(x_ref, w_ref, y_ref, st_ref):
    _, H, W, Cin = x_ref.shape
    x = x_ref[...].reshape(H * W, Cin).astype(jnp.bfloat16)
    _dot_and_stats(x, w_ref, y_ref, st_ref)


def _bn_relu_conv1x1_stats_kernel(x_ref, aff_ref, w_ref, y_ref, st_ref):
    _, H, W, Cin = x_ref.shape
    scale = aff_ref[0:1, :]
    shift = aff_ref[1:2, :]
    z = jnp.maximum(x_ref[...].reshape(H * W, Cin) * scale + shift, 0.0)
    _dot_and_stats(z.astype(jnp.bfloat16), w_ref, y_ref, st_ref)


def _bn_relu_conv3x3_stats_kernel(x_ref, aff_ref, w_ref, y_ref, st_ref,
                                  pad_ref):
    _, H, W, C = x_ref.shape
    scale = aff_ref[0:1, :]
    shift = aff_ref[1:2, :]
    z = jnp.maximum(x_ref[...].reshape(H * W, C) * scale + shift, 0.0)

    # Zero only the 1-pixel halo of the padded scratch, then write the body.
    pad_ref[0:1, :, :] = jnp.zeros((1, W + 2, C), jnp.float32)
    pad_ref[H + 1:H + 2, :, :] = jnp.zeros((1, W + 2, C), jnp.float32)
    pad_ref[1:H + 1, 0:1, :] = jnp.zeros((H, 1, C), jnp.float32)
    pad_ref[1:H + 1, W + 1:W + 2, :] = jnp.zeros((H, 1, C), jnp.float32)
    pad_ref[1:H + 1, 1:W + 1, :] = z.reshape(H, W, C)

    # im2col: 9 shifted views -> one lane-dense (H*W, 9*C) operand and a
    # single MXU matmul instead of nine small K=C dots.
    taps = [pad_ref[ky:ky + H, kx:kx + W, :].reshape(H * W, C)
            for ky in range(3) for kx in range(3)]
    col = jnp.concatenate(taps, axis=1).astype(jnp.bfloat16)
    _dot_and_stats(col, w_ref, y_ref, st_ref)


def _bn_residual_relu_kernel(y_ref, aff_ref, res_ref, o_ref):
    _, H, W, C = y_ref.shape
    scale = aff_ref[0:1, :]
    shift = aff_ref[1:2, :]
    y = y_ref[...].reshape(H * W, C) * scale + shift
    o = jnp.maximum(y + res_ref[...].reshape(H * W, C), 0.0)
    o_ref[...] = o.reshape(o_ref.shape)


# ---------------------------------------------------------------------------
# pallas_call wrappers (grid over N, "parallel" -> megacore on v7x).
# ---------------------------------------------------------------------------
def _conv1x1_stats(x, w):
    N, H, W, Cin = x.shape
    Cout = w.shape[1]
    return pl.pallas_call(
        _conv1x1_stats_kernel,
        out_shape=(jax.ShapeDtypeStruct((N, H, W, Cout), jnp.float32),
                   jax.ShapeDtypeStruct((N, 8, Cout), jnp.float32)),
        grid_spec=pltpu.PrefetchScalarGridSpec(
            num_scalar_prefetch=0,
            grid=(N,),
            in_specs=[
                pl.BlockSpec((1, H, W, Cin), lambda n: (n, 0, 0, 0)),
                pl.BlockSpec((Cin, Cout), lambda n: (0, 0)),
            ],
            out_specs=(
                pl.BlockSpec((1, H, W, Cout), lambda n: (n, 0, 0, 0)),
                pl.BlockSpec((1, 8, Cout), lambda n: (n, 0, 0)),
            ),
        ),
        compiler_params=_compiler_params(),
    )(x, w)


def _bn_relu_conv1x1_stats(x, aff, w):
    N, H, W, Cin = x.shape
    Cout = w.shape[1]
    return pl.pallas_call(
        _bn_relu_conv1x1_stats_kernel,
        out_shape=(jax.ShapeDtypeStruct((N, H, W, Cout), jnp.float32),
                   jax.ShapeDtypeStruct((N, 8, Cout), jnp.float32)),
        grid_spec=pltpu.PrefetchScalarGridSpec(
            num_scalar_prefetch=0,
            grid=(N,),
            in_specs=[
                pl.BlockSpec((1, H, W, Cin), lambda n: (n, 0, 0, 0)),
                pl.BlockSpec((8, Cin), lambda n: (0, 0)),
                pl.BlockSpec((Cin, Cout), lambda n: (0, 0)),
            ],
            out_specs=(
                pl.BlockSpec((1, H, W, Cout), lambda n: (n, 0, 0, 0)),
                pl.BlockSpec((1, 8, Cout), lambda n: (n, 0, 0)),
            ),
        ),
        compiler_params=_compiler_params(),
    )(x, aff, w)


def _bn_relu_conv3x3_stats(x, aff, w):
    N, H, W, C = x.shape
    return pl.pallas_call(
        _bn_relu_conv3x3_stats_kernel,
        out_shape=(jax.ShapeDtypeStruct((N, H, W, C), jnp.float32),
                   jax.ShapeDtypeStruct((N, 8, C), jnp.float32)),
        grid_spec=pltpu.PrefetchScalarGridSpec(
            num_scalar_prefetch=0,
            grid=(N,),
            in_specs=[
                pl.BlockSpec((1, H, W, C), lambda n: (n, 0, 0, 0)),
                pl.BlockSpec((8, C), lambda n: (0, 0)),
                pl.BlockSpec((9 * C, C), lambda n: (0, 0)),
            ],
            out_specs=(
                pl.BlockSpec((1, H, W, C), lambda n: (n, 0, 0, 0)),
                pl.BlockSpec((1, 8, C), lambda n: (n, 0, 0)),
            ),
            scratch_shapes=[pltpu.VMEM((H + 2, W + 2, C), jnp.float32)],
        ),
        compiler_params=_compiler_params(),
    )(x, aff, w)


def _bn_residual_relu(y, aff, res):
    N, H, W, C = y.shape
    return pl.pallas_call(
        _bn_residual_relu_kernel,
        out_shape=jax.ShapeDtypeStruct((N, H, W, C), jnp.float32),
        grid_spec=pltpu.PrefetchScalarGridSpec(
            num_scalar_prefetch=0,
            grid=(N,),
            in_specs=[
                pl.BlockSpec((1, H, W, C), lambda n: (n, 0, 0, 0)),
                pl.BlockSpec((8, C), lambda n: (0, 0)),
                pl.BlockSpec((1, H, W, C), lambda n: (n, 0, 0, 0)),
            ],
            out_specs=pl.BlockSpec((1, H, W, C), lambda n: (n, 0, 0, 0)),
        ),
        compiler_params=_compiler_params(),
    )(y, aff, res)


# ---------------------------------------------------------------------------
# Full bottleneck forward.
# ---------------------------------------------------------------------------
def _bn_affine(stats, gamma, beta, count):
    """Fold per-image sum/sumsq partials into BN scale/shift rows (8, C)."""
    s = jnp.sum(stats, axis=0)                 # (8, C)
    mean = s[0] / count
    var = s[1] / count - mean * mean           # biased batch variance
    scale = gamma * lax.rsqrt(var + EPS)
    shift = beta - mean * scale
    return jnp.concatenate(
        [scale[None], shift[None],
         jnp.zeros((6,) + gamma.shape, jnp.float32)], axis=0)


@jax.jit
def bottleneck_pallas(x_nchw, tw1, g1, b1, tw2, g2, b2, tw3, g3, b3):
    N, Cin, H, W = x_nchw.shape
    P = tw1.shape[0]
    Cout = tw3.shape[0]
    C1 = _round_up(Cin, LANE)
    C2 = _round_up(P, LANE)
    C3 = _round_up(Cout, LANE)
    assert C1 == C3  # identity path (downsample=None) requires Cin == Cout

    # NCHW -> NHWC, channels zero-padded to a lane multiple (lane-dense).
    # TODO(synk): keep the surrounding model NHWC end-to-end so these two
    # transposes don't add an HBM round trip per block.
    x = _pad_to(jnp.transpose(x_nchw, (0, 2, 3, 1)).astype(jnp.float32),
                (N, H, W, C1))

    # Pack conv weights as lane-padded bf16 matmul operands.
    w1 = _pad_to(jnp.transpose(tw1[:, :, 0, 0], (1, 0)),
                 (C1, C2)).astype(jnp.bfloat16)
    w2 = _pad_to(jnp.transpose(tw2, (2, 3, 1, 0)).reshape(9, P, P),
                 (9, C2, C2)).reshape(9 * C2, C2).astype(jnp.bfloat16)
    w3 = _pad_to(jnp.transpose(tw3[:, :, 0, 0], (1, 0)),
                 (C2, C3)).astype(jnp.bfloat16)
    g1p, b1p = _pad_to(g1, (C2,)), _pad_to(b1, (C2,))
    g2p, b2p = _pad_to(g2, (C2,)), _pad_to(b2, (C2,))
    g3p, b3p = _pad_to(g3, (C3,)), _pad_to(b3, (C3,))

    cnt = float(N * H * W)

    # conv1 (1x1) + BN1 partial stats
    y1, st1 = _conv1x1_stats(x, w1)
    aff1 = _bn_affine(st1, g1p, b1p, cnt)
    # BN1 + ReLU + conv2 (3x3, im2col) + BN2 partial stats
    y2, st2 = _bn_relu_conv3x3_stats(y1, aff1, w2)
    aff2 = _bn_affine(st2, g2p, b2p, cnt)
    # BN2 + ReLU + conv3 (1x1, expansion) + BN3 partial stats
    y3, st3 = _bn_relu_conv1x1_stats(y2, aff2, w3)
    aff3 = _bn_affine(st3, g3p, b3p, cnt)
    # BN3 + residual + ReLU
    out = _bn_residual_relu(y3, aff3, x)

    out = out[:, :, :, :Cout]
    return jnp.transpose(out, (0, 3, 1, 2))   # NHWC -> NCHW


# ------------------------ pure-JAX reference (NCHW) ------------------------
# Uses the same precision policy as the kernel (bf16 conv operands, f32
# accumulation, f32 BN) so the tolerance can stay tight.
def _bn_ref(y, gamma, beta):
    mean = jnp.mean(y, axis=(0, 2, 3), keepdims=True)
    var = jnp.mean((y - mean) ** 2, axis=(0, 2, 3), keepdims=True)
    return ((y - mean) * lax.rsqrt(var + EPS) * gamma[None, :, None, None]
            + beta[None, :, None, None])


def bottleneck_ref(x, tw1, g1, b1, tw2, g2, b2, tw3, g3, b3):
    dn = ("NCHW", "OIHW", "NCHW")

    def conv(inp, w, pad):
        return lax.conv_general_dilated(
            inp.astype(jnp.bfloat16), w.astype(jnp.bfloat16), (1, 1),
            ((pad, pad), (pad, pad)), dimension_numbers=dn,
            preferred_element_type=jnp.float32)

    out = jnp.maximum(_bn_ref(conv(x, tw1, 0), g1, b1), 0.0)
    out = jnp.maximum(_bn_ref(conv(out, tw2, 1), g2, b2), 0.0)
    out = _bn_ref(conv(out, tw3, 0), g3, b3)
    return jnp.maximum(out + x, 0.0)


if __name__ == "__main__":
    # downsample=None with stride=1 requires inplanes == planes * expansion.
    N, H, W = 2, 16, 16
    planes = 8
    inplanes = planes * 4          # 32
    cout = planes * 4              # 32

    key = jax.random.PRNGKey(0)
    ks = jax.random.split(key, 10)

    x = jax.random.normal(ks[0], (N, inplanes, H, W), jnp.float32)
    tw1 = 0.1 * jax.random.normal(ks[1], (planes, inplanes, 1, 1), jnp.float32)
    tw2 = 0.1 * jax.random.normal(ks[2], (planes, planes, 3, 3), jnp.float32)
    tw3 = 0.1 * jax.random.normal(ks[3], (cout, planes, 1, 1), jnp.float32)
    g1 = 0.5 + jax.random.uniform(ks[4], (planes,), jnp.float32)
    b1 = 0.1 * jax.random.normal(ks[5], (planes,), jnp.float32)
    g2 = 0.5 + jax.random.uniform(ks[6], (planes,), jnp.float32)
    b2 = 0.1 * jax.random.normal(ks[7], (planes,), jnp.float32)
    g3 = 0.5 + jax.random.uniform(ks[8], (cout,), jnp.float32)
    b3 = 0.1 * jax.random.normal(ks[9], (cout,), jnp.float32)

    out = bottleneck_pallas(x, tw1, g1, b1, tw2, g2, b2, tw3, g3, b3)
    out = jax.block_until_ready(out)

    ref = bottleneck_ref(x, tw1, g1, b1, tw2, g2, b2, tw3, g3, b3)
    ref = jax.block_until_ready(ref)

    assert out.shape == (N, cout, H, W), out.shape
    max_err = float(jnp.max(jnp.abs(out - ref)))
    assert jnp.allclose(out, ref, rtol=2e-2, atol=2e-2), max_err

    print("KERNEL_OK")
</pallas_src>

<mosaic_0001>
module attributes {stable_mosaic.version = 11 : i64} {
  func.func @_conv1x1_stats_kernel(%arg0: i32, %arg1: memref<1x16x16x128xf32, #tpu.memory_space<vmem>>, %arg2: memref<128x128xbf16, #tpu.memory_space<vmem>>, %arg3: memref<1x16x16x128xf32, #tpu.memory_space<vmem>>, %arg4: memref<1x8x128xf32, #tpu.memory_space<vmem>>) attributes {dimension_semantics = [#tpu.dimension_semantics<parallel>], iteration_bounds = array<i64: 2>, scalar_prefetch = 0 : i64, scratch_operands = 0 : i64, tpu.core_type = #tpu.core_type<tc>, window_params = [{transform_indices = @transform_0, window_bounds = array<i64: 1, 16, 16, 128>}, {pipeline_mode = #tpu.pipeline_mode<synchronous>, transform_indices = @transform_1, window_bounds = array<i64: 128, 128>}, {transform_indices = @transform_2, window_bounds = array<i64: 1, 16, 16, 128>}, {transform_indices = @transform_3, window_bounds = array<i64: 1, 8, 128>}]} {
    %c0 = arith.constant 0 : index
    %c0_0 = arith.constant 0 : index
    %c0_1 = arith.constant 0 : index
    %c0_2 = arith.constant 0 : index
    %0 = vector.load %arg1[%c0, %c0_0, %c0_1, %c0_2] : memref<1x16x16x128xf32, #tpu.memory_space<vmem>>, vector<1x16x16x128xf32>
    %1 = vector.shape_cast %0 : vector<1x16x16x128xf32> to vector<256x128xf32>
    %2 = arith.truncf %1 : vector<256x128xf32> to vector<256x128xbf16>
    %c0_3 = arith.constant 0 : index
    %c0_4 = arith.constant 0 : index
    %3 = vector.load %arg2[%c0_3, %c0_4] : memref<128x128xbf16, #tpu.memory_space<vmem>>, vector<128x128xbf16>
    %cst = arith.constant dense<0.000000e+00> : vector<256x128xf32>
    %4 = tpu.matmul %2, %3, %cst {dimension_numbers = #tpu.dot_dimension_numbers<[1], [0], [0], [1], [0, 0, 1, 1], [], []>} : vector<256x128xbf16>, vector<128x128xbf16>, vector<256x128xf32> -> vector<256x128xf32>
    %5 = vector.shape_cast %4 : vector<256x128xf32> to vector<1x16x16x128xf32>
    %c0_5 = arith.constant 0 : index
    %c0_6 = arith.constant 0 : index
    %c0_7 = arith.constant 0 : index
    %c0_8 = arith.constant 0 : index
    %6 = vector.load %arg3[%c0_5, %c0_6, %c0_7, %c0_8] : memref<1x16x16x128xf32, #tpu.memory_space<vmem>>, vector<1x16x16x128xf32>
    tpu.vector_store %arg3[%c0_5, %c0_6, %c0_7, %c0_8], %5 {strides = array<i32>} : memref<1x16x16x128xf32, #tpu.memory_space<vmem>>, vector<1x16x16x128xf32>,
    %cst_9 = arith.constant dense<0.000000e+00> : vector<128xf32>
    %7 = vector.multi_reduction <add>, %4, %cst_9 [0] : vector<256x128xf32> to vector<128xf32>
    %8 = vector.shape_cast %7 : vector<128xf32> to vector<1x128xf32>
    %9 = arith.mulf %4, %4 : vector<256x128xf32>
    %cst_10 = arith.constant dense<0.000000e+00> : vector<128xf32>
    %10 = vector.multi_reduction <add>, %9, %cst_10 [0] : vector<256x128xf32> to vector<128xf32>
    %11 = vector.shape_cast %10 : vector<128xf32> to vector<1x128xf32>
    %cst_11 = arith.constant 0.000000e+00 : f32
    %12 = vector.broadcast %cst_11 : f32 to vector<6x128xf32>
    %13 = tpu.concatenate %8, %11, %12 in 0 : vector<1x128xf32>, vector<1x128xf32>, vector<6x128xf32> -> vector<8x128xf32>
    %14 = vector.shape_cast %13 : vector<8x128xf32> to vector<1x8x128xf32>
    %c0_12 = arith.constant 0 : index
    %c0_13 = arith.constant 0 : index
    %c0_14 = arith.constant 0 : index
    %15 = vector.load %arg4[%c0_12, %c0_13, %c0_14] : memref<1x8x128xf32, #tpu.memory_space<vmem>>, vector<1x8x128xf32>
    tpu.vector_store %arg4[%c0_12, %c0_13, %c0_14], %14 {strides = array<i32>} : memref<1x8x128xf32, #tpu.memory_space<vmem>>, vector<1x8x128xf32>,
    return
  }
  func.func @transform_0(%arg0: i32) -> (i32, i32, i32, i32) {
    %c0_i32 = arith.constant 0 : i32
    %c0_i32_0 = arith.constant 0 : i32
    %c0_i32_1 = arith.constant 0 : i32
    %c0_i32_2 = arith.constant 0 : i32
    return %arg0, %c0_i32, %c0_i32_0, %c0_i32_1 : i32, i32, i32, i32
  }
  func.func @transform_1(%arg0: i32) -> (i32, i32) {
    %c0_i32 = arith.constant 0 : i32
    %c0_i32_0 = arith.constant 0 : i32
    %c0_i32_1 = arith.constant 0 : i32
    return %c0_i32, %c0_i32_0 : i32, i32
  }
  func.func @transform_2(%arg0: i32) -> (i32, i32, i32, i32) {
    %c0_i32 = arith.constant 0 : i32
    %c0_i32_0 = arith.constant 0 : i32
    %c0_i32_1 = arith.constant 0 : i32
    %c0_i32_2 = arith.constant 0 : i32
    return %arg0, %c0_i32, %c0_i32_0, %c0_i32_1 : i32, i32, i32, i32
  }
  func.func @transform_3(%arg0: i32) -> (i32, i32, i32) {
    %c0_i32 = arith.constant 0 : i32
    %c0_i32_0 = arith.constant 0 : i32
    %c0_i32_1 = arith.constant 0 : i32
    return %arg0, %c0_i32, %c0_i32_0 : i32, i32, i32
  }
}

module attributes {stable_mosaic.version = 11 : i64} {
  func.func @_bn_relu_conv3x3_stats_kernel(%arg0: i32, %arg1: memref<1x16x16x128xf32, #tpu.memory_space<vmem>>, %arg2: memref<8x128xf32, #tpu.memory_space<vmem>>, %arg3: memref<1152x128xbf16, #tpu.memory_space<vmem>>, %arg4: memref<1x16x16x128xf32, #tpu.memory_space<vmem>>, %arg5: memref<1x8x128xf32, #tpu.memory_space<vmem>>, %arg6: memref<18x18x128xf32, #tpu.memory_space<vmem>>) attributes {dimension_semantics = [#tpu.dimension_semantics<parallel>], iteration_bounds = array<i64: 2>, scalar_prefetch = 0 : i64, scratch_operands = 1 : i64, tpu.core_type = #tpu.core_type<tc>, window_params = [{transform_indices = @transform_0, window_bounds = array<i64: 1, 16, 16, 128>}, {pipeline_mode = #tpu.pipeline_mode<synchronous>, transform_indices = @transform_1, window_bounds = array<i64: 8, 128>}, {pipeline_mode = #tpu.pipeline_mode<synchronous>, transform_indices = @transform_2, window_bounds = array<i64: 1152, 128>}, {transform_indices = @transform_3, window_bounds = array<i64: 1, 16, 16, 128>}, {transform_indices = @transform_4, window_bounds = array<i64: 1, 8, 128>}]} {
    %c0 = arith.constant 0 : index
    %c0_0 = arith.constant 0 : index
    %0 = vector.load %arg2[%c0, %c0_0] : memref<8x128xf32, #tpu.memory_space<vmem>>, vector<1x128xf32>
    %c1 = arith.constant 1 : index
    %c0_1 = arith.constant 0 : index
    %1 = vector.load %arg2[%c1, %c0_1] : memref<8x128xf32, #tpu.memory_space<vmem>>, vector<1x128xf32>
    %c0_2 = arith.constant 0 : index
    %c0_3 = arith.constant 0 : index
    %c0_4 = arith.constant 0 : index
    %c0_5 = arith.constant 0 : index
    %2 = vector.load %arg1[%c0_2, %c0_3, %c0_4, %c0_5] : memref<1x16x16x128xf32, #tpu.memory_space<vmem>>, vector<1x16x16x128xf32>
    %3 = vector.shape_cast %2 : vector<1x16x16x128xf32> to vector<256x128xf32>
    %4 = vector.broadcast %0 : vector<1x128xf32> to vector<256x128xf32>
    %5 = arith.mulf %3, %4 : vector<256x128xf32>
    %6 = vector.broadcast %1 : vector<1x128xf32> to vector<256x128xf32>
    %7 = arith.addf %5, %6 : vector<256x128xf32>
    %cst = arith.constant 0.000000e+00 : f32
    %8 = vector.broadcast %cst : f32 to vector<256x128xf32>
    %9 = arith.maximumf %7, %8 : vector<256x128xf32>
    %cst_6 = arith.constant 0.000000e+00 : f32
    %10 = vector.broadcast %cst_6 : f32 to vector<1x18x128xf32>
    %c0_7 = arith.constant 0 : index
    %c0_8 = arith.constant 0 : index
    %c0_9 = arith.constant 0 : index
    %11 = vector.load %arg6[%c0_7, %c0_8, %c0_9] : memref<18x18x128xf32, #tpu.memory_space<vmem>>, vector<1x18x128xf32>
    tpu.vector_store %arg6[%c0_7, %c0_8, %c0_9], %10 {strides = array<i32>} : memref<18x18x128xf32, #tpu.memory_space<vmem>>, vector<1x18x128xf32>,
    %cst_10 = arith.constant 0.000000e+00 : f32
    %12 = vector.broadcast %cst_10 : f32 to vector<1x18x128xf32>
    %c17 = arith.constant 17 : index
    %c0_11 = arith.constant 0 : index
    %c0_12 = arith.constant 0 : index
    %13 = vector.load %arg6[%c17, %c0_11, %c0_12] : memref<18x18x128xf32, #tpu.memory_space<vmem>>, vector<1x18x128xf32>
    tpu.vector_store %arg6[%c17, %c0_11, %c0_12], %12 {strides = array<i32>} : memref<18x18x128xf32, #tpu.memory_space<vmem>>, vector<1x18x128xf32>,
    %cst_13 = arith.constant 0.000000e+00 : f32
    %14 = vector.broadcast %cst_13 : f32 to vector<16x1x128xf32>
    %c1_14 = arith.constant 1 : index
    %c0_15 = arith.constant 0 : index
    %c0_16 = arith.constant 0 : index
    %15 = vector.load %arg6[%c1_14, %c0_15, %c0_16] : memref<18x18x128xf32, #tpu.memory_space<vmem>>, vector<16x1x128xf32>
    tpu.vector_store %arg6[%c1_14, %c0_15, %c0_16], %14 {strides = array<i32>} : memref<18x18x128xf32, #tpu.memory_space<vmem>>, vector<16x1x128xf32>,
    %cst_17 = arith.constant 0.000000e+00 : f32
    %16 = vector.broadcast %cst_17 : f32 to vector<16x1x128xf32>
    %c1_18 = arith.constant 1 : index
    %c17_19 = arith.constant 17 : index
    %c0_20 = arith.constant 0 : index
    %17 = vector.load %arg6[%c1_18, %c17_19, %c0_20] : memref<18x18x128xf32, #tpu.memory_space<vmem>>, vector<16x1x128xf32>
    tpu.vector_store %arg6[%c1_18, %c17_19, %c0_20], %16 {strides = array<i32>} : memref<18x18x128xf32, #tpu.memory_space<vmem>>, vector<16x1x128xf32>,
    %18 = vector.shape_cast %9 : vector<256x128xf32> to vector<16x16x128xf32>
    %c1_21 = arith.constant 1 : index
    %c1_22 = arith.constant 1 : index
    %c0_23 = arith.constant 0 : index
    %19 = vector.load %arg6[%c1_21, %c1_22, %c0_23] : memref<18x18x128xf32, #tpu.memory_space<vmem>>, vector<16x16x128xf32>
    tpu.vector_store %arg6[%c1_21, %c1_22, %c0_23], %18 {strides = array<i32>} : memref<18x18x128xf32, #tpu.memory_space<vmem>>, vector<16x16x128xf32>,
    %c0_24 = arith.constant 0 : index
    %c0_25 = arith.constant 0 : index
    %c0_26 = arith.constant 0 : index
    %20 = vector.load %arg6[%c0_24, %c0_25, %c0_26] : memref<18x18x128xf32, #tpu.memory_space<vmem>>, vector<16x16x128xf32>
    %21 = vector.shape_cast %20 : vector<16x16x128xf32> to vector<256x128xf32>
    %c0_27 = arith.constant 0 : index
    %c1_28 = arith.constant 1 : index
    %c0_29 = arith.constant 0 : index
    %22 = vector.load %arg6[%c0_27, %c1_28, %c0_29] : memref<18x18x128xf32, #tpu.memory_space<vmem>>, vector<16x16x128xf32>
    %23 = vector.shape_cast %22 : vector<16x16x128xf32> to vector<256x128xf32>
    %c0_30 = arith.constant 0 : index
    %c2 = arith.constant 2 : index
    %c0_31 = arith.constant 0 : index
    %24 = vector.load %arg6[%c0_30, %c2, %c0_31] : memref<18x18x128xf32, #tpu.memory_space<vmem>>, vector<16x16x128xf32>
    %25 = vector.shape_cast %24 : vector<16x16x128xf32> to vector<256x128xf32>
    %c1_32 = arith.constant 1 : index
    %c0_33 = arith.constant 0 : index
    %c0_34 = arith.constant 0 : index
    %26 = vector.load %arg6[%c1_32, %c0_33, %c0_34] : memref<18x18x128xf32, #tpu.memory_space<vmem>>, vector<16x16x128xf32>
    %27 = vector.shape_cast %26 : vector<16x16x128xf32> to vector<256x128xf32>
    %c1_35 = arith.constant 1 : index
    %c1_36 = arith.constant 1 : index
    %c0_37 = arith.constant 0 : index
    %28 = vector.load %arg6[%c1_35, %c1_36, %c0_37] : memref<18x18x128xf32, #tpu.memory_space<vmem>>, vector<16x16x128xf32>
    %29 = vector.shape_cast %28 : vector<16x16x128xf32> to vector<256x128xf32>
    %c1_38 = arith.constant 1 : index
    %c2_39 = arith.constant 2 : index
    %c0_40 = arith.constant 0 : index
    %30 = vector.load %arg6[%c1_38, %c2_39, %c0_40] : memref<18x18x128xf32, #tpu.memory_space<vmem>>, vector<16x16x128xf32>
    %31 = vector.shape_cast %30 : vector<16x16x128xf32> to vector<256x128xf32>
    %c2_41 = arith.constant 2 : index
    %c0_42 = arith.constant 0 : index
    %c0_43 = arith.constant 0 : index
    %32 = vector.load %arg6[%c2_41, %c0_42, %c0_43] : memref<18x18x128xf32, #tpu.memory_space<vmem>>, vector<16x16x128xf32>
    %33 = vector.shape_cast %32 : vector<16x16x128xf32> to vector<256x128xf32>
    %c2_44 = arith.constant 2 : index
    %c1_45 = arith.constant 1 : index
    %c0_46 = arith.constant 0 : index
    %34 = vector.load %arg6[%c2_44, %c1_45, %c0_46] : memref<18x18x128xf32, #tpu.memory_space<vmem>>, vector<16x16x128xf32>
    %35 = vector.shape_cast %34 : vector<16x16x128xf32> to vector<256x128xf32>
    %c2_47 = arith.constant 2 : index
    %c2_48 = arith.constant 2 : index
    %c0_49 = arith.constant 0 : index
    %36 = vector.load %arg6[%c2_47, %c2_48, %c0_49] : memref<18x18x128xf32, #tpu.memory_space<vmem>>, vector<16x16x128xf32>
    %37 = vector.shape_cast %36 : vector<16x16x128xf32> to vector<256x128xf32>
    %38 = tpu.concatenate %21, %23, %25, %27, %29, %31, %33, %35, %37 in 1 : vector<256x128xf32>, vector<256x128xf32>, vector<256x128xf32>, vector<256x128xf32>, vector<256x128xf32>, vector<256x128xf32>, vector<256x128xf32>, vector<256x128xf32>, vector<256x128xf32> -> vector<256x1152xf32>
    %39 = arith.truncf %38 : vector<256x1152xf32> to vector<256x1152xbf16>
    %c0_50 = arith.constant 0 : index
    %c0_51 = arith.constant 0 : index
    %40 = vector.load %arg3[%c0_50, %c0_51] : memref<1152x128xbf16, #tpu.memory_space<vmem>>, vector<1152x128xbf16>
    %cst_52 = arith.constant dense<0.000000e+00> : vector<256x128xf32>
    %41 = tpu.matmul %39, %40, %cst_52 {dimension_numbers = #tpu.dot_dimension_numbers<[1], [0], [0], [1], [0, 0, 1, 1], [], []>} : vector<256x1152xbf16>, vector<1152x128xbf16>, vector<256x128xf32> -> vector<256x128xf32>
    %42 = vector.shape_cast %41 : vector<256x128xf32> to vector<1x16x16x128xf32>
    %c0_53 = arith.constant 0 : index
    %c0_54 = arith.constant 0 : index
    %c0_55 = arith.constant 0 : index
    %c0_56 = arith.constant 0 : index
    %43 = vector.load %arg4[%c0_53, %c0_54, %c0_55, %c0_56] : memref<1x16x16x128xf32, #tpu.memory_space<vmem>>, vector<1x16x16x128xf32>
    tpu.vector_store %arg4[%c0_53, %c0_54, %c0_55, %c0_56], %42 {strides = array<i32>} : memref<1x16x16x128xf32, #tpu.memory_space<vmem>>, vector<1x16x16x128xf32>,
    %cst_57 = arith.constant dense<0.000000e+00> : vector<128xf32>
    %44 = vector.multi_reduction <add>, %41, %cst_57 [0] : vector<256x128xf32> to vector<128xf32>
    %45 = vector.shape_cast %44 : vector<128xf32> to vector<1x128xf32>
    %46 = arith.mulf %41, %41 : vector<256x128xf32>
    %cst_58 = arith.constant dense<0.000000e+00> : vector<128xf32>
    %47 = vector.multi_reduction <add>, %46, %cst_58 [0] : vector<256x128xf32> to vector<128xf32>
    %48 = vector.shape_cast %47 : vector<128xf32> to vector<1x128xf32>
    %cst_59 = arith.constant 0.000000e+00 : f32
    %49 = vector.broadcast %cst_59 : f32 to vector<6x128xf32>
    %50 = tpu.concatenate %45, %48, %49 in 0 : vector<1x128xf32>, vector<1x128xf32>, vector<6x128xf32> -> vector<8x128xf32>
    %51 = vector.shape_cast %50 : vector<8x128xf32> to vector<1x8x128xf32>
    %c0_60 = arith.constant 0 : index
    %c0_61 = arith.constant 0 : index
    %c0_62 = arith.constant 0 : index
    %52 = vector.load %arg5[%c0_60, %c0_61, %c0_62] : memref<1x8x128xf32, #tpu.memory_space<vmem>>, vector<1x8x128xf32>
    tpu.vector_store %arg5[%c0_60, %c0_61, %c0_62], %51 {strides = array<i32>} : memref<1x8x128xf32, #tpu.memory_space<vmem>>, vector<1x8x128xf32>,
    return
  }
  func.func @transform_0(%arg0: i32) -> (i32, i32, i32, i32) {
    %c0_i32 = arith.constant 0 : i32
    %c0_i32_0 = arith.constant 0 : i32
    %c0_i32_1 = arith.constant 0 : i32
    %c0_i32_2 = arith.constant 0 : i32
    return %arg0, %c0_i32, %c0_i32_0, %c0_i32_1 : i32, i32, i32, i32
  }
  func.func @transform_1(%arg0: i32) -> (i32, i32) {
    %c0_i32 = arith.constant 0 : i32
    %c0_i32_0 = arith.constant 0 : i32
    %c0_i32_1 = arith.constant 0 : i32
    return %c0_i32, %c0_i32_0 : i32, i32
  }
  func.func @transform_2(%arg0: i32) -> (i32, i32) {
    %c0_i32 = arith.constant 0 : i32
    %c0_i32_0 = arith.constant 0 : i32
    %c0_i32_1 = arith.constant 0 : i32
    return %c0_i32, %c0_i32_0 : i32, i32
  }
  func.func @transform_3(%arg0: i32) -> (i32, i32, i32, i32) {
    %c0_i32 = arith.constant 0 : i32
    %c0_i32_0 = arith.constant 0 : i32
    %c0_i32_1 = arith.constant 0 : i32
    %c0_i32_2 = arith.constant 0 : i32
    return %arg0, %c0_i32, %c0_i32_0, %c0_i32_1 : i32, i32, i32, i32
  }
  func.func @transform_4(%arg0: i32) -> (i32, i32, i32) {
    %c0_i32 = arith.constant 0 : i32
    %c0_i32_0 = arith.constant 0 : i32
    %c0_i32_1 = arith.constant 0 : i32
    return %arg0, %c0_i32, %c0_i32_0 : i32, i32, i32
  }
}

module attributes {stable_mosaic.version = 11 : i64} {
  func.func @_bn_residual_relu_kernel(%arg0: i32, %arg1: memref<1x16x16x128xf32, #tpu.memory_space<vmem>>, %arg2: memref<8x128xf32, #tpu.memory_space<vmem>>, %arg3: memref<1x16x16x128xf32, #tpu.memory_space<vmem>>, %arg4: memref<1x16x16x128xf32, #tpu.memory_space<vmem>>) attributes {dimension_semantics = [#tpu.dimension_semantics<parallel>], iteration_bounds = array<i64: 2>, scalar_prefetch = 0 : i64, scratch_operands = 0 : i64, tpu.core_type = #tpu.core_type<tc>, window_params = [{transform_indices = @transform_0, window_bounds = array<i64: 1, 16, 16, 128>}, {pipeline_mode = #tpu.pipeline_mode<synchronous>, transform_indices = @transform_1, window_bounds = array<i64: 8, 128>}, {transform_indices = @transform_2, window_bounds = array<i64: 1, 16, 16, 128>}, {transform_indices = @transform_3, window_bounds = array<i64: 1, 16, 16, 128>}]} {
    %c0 = arith.constant 0 : index
    %c0_0 = arith.constant 0 : index
    %0 = vector.load %arg2[%c0, %c0_0] : memref<8x128xf32, #tpu.memory_space<vmem>>, vector<1x128xf32>
    %c1 = arith.constant 1 : index
    %c0_1 = arith.constant 0 : index
    %1 = vector.load %arg2[%c1, %c0_1] : memref<8x128xf32, #tpu.memory_space<vmem>>, vector<1x128xf32>
    %c0_2 = arith.constant 0 : index
    %c0_3 = arith.constant 0 : index
    %c0_4 = arith.constant 0 : index
    %c0_5 = arith.constant 0 : index
    %2 = vector.load %arg1[%c0_2, %c0_3, %c0_4, %c0_5] : memref<1x16x16x128xf32, #tpu.memory_space<vmem>>, vector<1x16x16x128xf32>
    %3 = vector.shape_cast %2 : vector<1x16x16x128xf32> to vector<256x128xf32>
    %4 = vector.broadcast %0 : vector<1x128xf32> to vector<256x128xf32>
    %5 = arith.mulf %3, %4 : vector<256x128xf32>
    %6 = vector.broadcast %1 : vector<1x128xf32> to vector<256x128xf32>
    %7 = arith.addf %5, %6 : vector<256x128xf32>
    %c0_6 = arith.constant 0 : index
    %c0_7 = arith.constant 0 : index
    %c0_8 = arith.constant 0 : index
    %c0_9 = arith.constant 0 : index
    %8 = vector.load %arg3[%c0_6, %c0_7, %c0_8, %c0_9] : memref<1x16x16x128xf32, #tpu.memory_space<vmem>>, vector<1x16x16x128xf32>
    %9 = vector.shape_cast %8 : vector<1x16x16x128xf32> to vector<256x128xf32>
    %10 = arith.addf %7, %9 : vector<256x128xf32>
    %cst = arith.constant 0.000000e+00 : f32
    %11 = vector.broadcast %cst : f32 to vector<256x128xf32>
    %12 = arith.maximumf %10, %11 : vector<256x128xf32>
    %13 = vector.shape_cast %12 : vector<256x128xf32> to vector<1x16x16x128xf32>
    %c0_10 = arith.constant 0 : index
    %c0_11 = arith.constant 0 : index
    %c0_12 = arith.constant 0 : index
    %c0_13 = arith.constant 0 : index
    %14 = vector.load %arg4[%c0_10, %c0_11, %c0_12, %c0_13] : memref<1x16x16x128xf32, #tpu.memory_space<vmem>>, vector<1x16x16x128xf32>
    tpu.vector_store %arg4[%c0_10, %c0_11, %c0_12, %c0_13], %13 {strides = array<i32>} : memref<1x16x16x128xf32, #tpu.memory_space<vmem>>, vector<1x16x16x128xf32>,
    return
  }
  func.func @transform_0(%arg0: i32) -> (i32, i32, i32, i32) {
    %c0_i32 = arith.constant 0 : i32
    %c0_i32_0 = arith.constant 0 : i32
    %c0_i32_1 = arith.constant 0 : i32
    %c0_i32_2 = arith.constant 0 : i32
    return %arg0, %c0_i32, %c0_i32_0, %c0_i32_1 : i32, i32, i32, i32
  }
  func.func @transform_1(%arg0: i32) -> (i32, i32) {
    %c0_i32 = arith.constant 0 : i32
    %c0_i32_0 = arith.constant 0 : i32
    %c0_i32_1 = arith.constant 0 : i32
    return %c0_i32, %c0_i32_0 : i32, i32
  }
  func.func @transform_2(%arg0: i32) -> (i32, i32, i32, i32) {
    %c0_i32 = arith.constant 0 : i32
    %c0_i32_0 = arith.constant 0 : i32
    %c0_i32_1 = arith.constant 0 : i32
    %c0_i32_2 = arith.constant 0 : i32
    return %arg0, %c0_i32, %c0_i32_0, %c0_i32_1 : i32, i32, i32, i32
  }
  func.func @transform_3(%arg0: i32) -> (i32, i32, i32, i32) {
    %c0_i32 = arith.constant 0 : i32
    %c0_i32_0 = arith.constant 0 : i32
    %c0_i32_1 = arith.constant 0 : i32
    %c0_i32_2 = arith.constant 0 : i32
    return %arg0, %c0_i32, %c0_i32_0, %c0_i32_1 : i32, i32, i32, i32
  }
}

module attributes {stable_mosaic.version = 11 : i64} {
  func.func @_bn_relu_conv1x1_stats_kernel(%arg0: i32, %arg1: memref<1x16x16x128xf32, #tpu.memory_space<vmem>>, %arg2: memref<8x128xf32, #tpu.memory_space<vmem>>, %arg3: memref<128x128xbf16, #tpu.memory_space<vmem>>, %arg4: memref<1x16x16x128xf32, #tpu.memory_space<vmem>>, %arg5: memref<1x8x128xf32, #tpu.memory_space<vmem>>) attributes {dimension_semantics = [#tpu.dimension_semantics<parallel>], iteration_bounds = array<i64: 2>, scalar_prefetch = 0 : i64, scratch_operands = 0 : i64, tpu.core_type = #tpu.core_type<tc>, window_params = [{transform_indices = @transform_0, window_bounds = array<i64: 1, 16, 16, 128>}, {pipeline_mode = #tpu.pipeline_mode<synchronous>, transform_indices = @transform_1, window_bounds = array<i64: 8, 128>}, {pipeline_mode = #tpu.pipeline_mode<synchronous>, transform_indices = @transform_2, window_bounds = array<i64: 128, 128>}, {transform_indices = @transform_3, window_bounds = array<i64: 1, 16, 16, 128>}, {transform_indices = @transform_4, window_bounds = array<i64: 1, 8, 128>}]} {
    %c0 = arith.constant 0 : index
    %c0_0 = arith.constant 0 : index
    %0 = vector.load %arg2[%c0, %c0_0] : memref<8x128xf32, #tpu.memory_space<vmem>>, vector<1x128xf32>
    %c1 = arith.constant 1 : index
    %c0_1 = arith.constant 0 : index
    %1 = vector.load %arg2[%c1, %c0_1] : memref<8x128xf32, #tpu.memory_space<vmem>>, vector<1x128xf32>
    %c0_2 = arith.constant 0 : index
    %c0_3 = arith.constant 0 : index
    %c0_4 = arith.constant 0 : index
    %c0_5 = arith.constant 0 : index
    %2 = vector.load %arg1[%c0_2, %c0_3, %c0_4, %c0_5] : memref<1x16x16x128xf32, #tpu.memory_space<vmem>>, vector<1x16x16x128xf32>
    %3 = vector.shape_cast %2 : vector<1x16x16x128xf32> to vector<256x128xf32>
    %4 = vector.broadcast %0 : vector<1x128xf32> to vector<256x128xf32>
    %5 = arith.mulf %3, %4 : vector<256x128xf32>
    %6 = vector.broadcast %1 : vector<1x128xf32> to vector<256x128xf32>
    %7 = arith.addf %5, %6 : vector<256x128xf32>
    %cst = arith.constant 0.000000e+00 : f32
    %8 = vector.broadcast %cst : f32 to vector<256x128xf32>
    %9 = arith.maximumf %7, %8 : vector<256x128xf32>
    %10 = arith.truncf %9 : vector<256x128xf32> to vector<256x128xbf16>
    %c0_6 = arith.constant 0 : index
    %c0_7 = arith.constant 0 : index
    %11 = vector.load %arg3[%c0_6, %c0_7] : memref<128x128xbf16, #tpu.memory_space<vmem>>, vector<128x128xbf16>
    %cst_8 = arith.constant dense<0.000000e+00> : vector<256x128xf32>
    %12 = tpu.matmul %10, %11, %cst_8 {dimension_numbers = #tpu.dot_dimension_numbers<[1], [0], [0], [1], [0, 0, 1, 1], [], []>} : vector<256x128xbf16>, vector<128x128xbf16>, vector<256x128xf32> -> vector<256x128xf32>
    %13 = vector.shape_cast %12 : vector<256x128xf32> to vector<1x16x16x128xf32>
    %c0_9 = arith.constant 0 : index
    %c0_10 = arith.constant 0 : index
    %c0_11 = arith.constant 0 : index
    %c0_12 = arith.constant 0 : index
    %14 = vector.load %arg4[%c0_9, %c0_10, %c0_11, %c0_12] : memref<1x16x16x128xf32, #tpu.memory_space<vmem>>, vector<1x16x16x128xf32>
    tpu.vector_store %arg4[%c0_9, %c0_10, %c0_11, %c0_12], %13 {strides = array<i32>} : memref<1x16x16x128xf32, #tpu.memory_space<vmem>>, vector<1x16x16x128xf32>,
    %cst_13 = arith.constant dense<0.000000e+00> : vector<128xf32>
    %15 = vector.multi_reduction <add>, %12, %cst_13 [0] : vector<256x128xf32> to vector<128xf32>
    %16 = vector.shape_cast %15 : vector<128xf32> to vector<1x128xf32>
    %17 = arith.mulf %12, %12 : vector<256x128xf32>
    %cst_14 = arith.constant dense<0.000000e+00> : vector<128xf32>
    %18 = vector.multi_reduction <add>, %17, %cst_14 [0] : vector<256x128xf32> to vector<128xf32>
    %19 = vector.shape_cast %18 : vector<128xf32> to vector<1x128xf32>
    %cst_15 = arith.constant 0.000000e+00 : f32
    %20 = vector.broadcast %cst_15 : f32 to vector<6x128xf32>
    %21 = tpu.concatenate %16, %19, %20 in 0 : vector<1x128xf32>, vector<1x128xf32>, vector<6x128xf32> -> vector<8x128xf32>
    %22 = vector.shape_cast %21 : vector<8x128xf32> to vector<1x8x128xf32>
    %c0_16 = arith.constant 0 : index
    %c0_17 = arith.constant 0 : index
    %c0_18 = arith.constant 0 : index
    %23 = vector.load %arg5[%c0_16, %c0_17, %c0_18] : memref<1x8x128xf32, #tpu.memory_space<vmem>>, vector<1x8x128xf32>
    tpu.vector_store %arg5[%c0_16, %c0_17, %c0_18], %22 {strides = array<i32>} : memref<1x8x128xf32, #tpu.memory_space<vmem>>, vector<1x8x128xf32>,
    return
  }
  func.func @transform_0(%arg0: i32) -> (i32, i32, i32, i32) {
    %c0_i32 = arith.constant 0 : i32
    %c0_i32_0 = arith.constant 0 : i32
    %c0_i32_1 = arith.constant 0 : i32
    %c0_i32_2 = arith.constant 0 : i32
    return %arg0, %c0_i32, %c0_i32_0, %c0_i32_1 : i32, i32, i32, i32
  }
  func.func @transform_1(%arg0: i32) -> (i32, i32) {
    %c0_i32 = arith.constant 0 : i32
    %c0_i32_0 = arith.constant 0 : i32
    %c0_i32_1 = arith.constant 0 : i32
    return %c0_i32, %c0_i32_0 : i32, i32
  }
  func.func @transform_2(%arg0: i32) -> (i32, i32) {
    %c0_i32 = arith.constant 0 : i32
    %c0_i32_0 = arith.constant 0 : i32
    %c0_i32_1 = arith.constant 0 : i32
    return %c0_i32, %c0_i32_0 : i32, i32
  }
  func.func @transform_3(%arg0: i32) -> (i32, i32, i32, i32) {
    %c0_i32 = arith.constant 0 : i32
    %c0_i32_0 = arith.constant 0 : i32
    %c0_i32_1 = arith.constant 0 : i32
    %c0_i32_2 = arith.constant 0 : i32
    return %arg0, %c0_i32, %c0_i32_0, %c0_i32_1 : i32, i32, i32, i32
  }
  func.func @transform_4(%arg0: i32) -> (i32, i32, i32) {
    %c0_i32 = arith.constant 0 : i32
    %c0_i32_0 = arith.constant 0 : i32
    %c0_i32_1 = arith.constant 0 : i32
    return %arg0, %c0_i32, %c0_i32_0 : i32, i32, i32
  }
}

</mosaic_0001>

<bundles_post_ra>
// kernel: bottleneck_pallas.4
= control target key start
LH: loop header
LB: loop body
LE: loop exit
PB: predicated region body
PF: predicated region fallthrough
CT: control target
= control target key end

     0   :  { %s839_s12 = smov 0   ;;  %s1037_s0 = inlined_call_operand.vmem [shape: f32[2,16,16,128], index: 0, kind: input, shape index: {}]   ;;  %s1038_s1 = inlined_call_operand.vmem [shape: bf16[128,128], index: 1, kind: input, shape index: {}]   ;;  %s1039_s2 = inlined_call_operand.vmem [shape: f32[2,16,16,128], index: 2, kind: output, shape index: {0}]   ;;  %s1040_s3 = inlined_call_operand.vmem [shape: f32[2,8,128], index: 3, kind: output, shape index: {1}]  }
   0x1 LB: > { %s685_s13 = sadd.s32 4294967295, %s817_s12   ;;  %p689_p0 = scmp.ge.s32.totalorder %s817_s12, 1  ;;  %s817_s12 = sphi %s839_s12, %s14_s12  }
   0x2   : > { %p140_p1 = scmp.lt.s32.totalorder %s817_s12, 3 }
   0x4   : > { %p141_p2 = pnand %p689_p0, %p140_p1 }
   0x5   : > { %v803_v0 = vld [vmem:[%s1038_s1] sm:$0xff] (!%p141_p2)   ;;  %p168_p3 = scmp.lt.s32.totalorder (!%p141_p2), %s685_s13, 1  ;;  %v804_v1 = vld [vmem:[%s1038_s1 + $0x8] sm:$0xff] (!%p141_p2)   ;;  %v805_v2 = vld [vmem:[%s1038_s1 + $0x10] sm:$0xff] (!%p141_p2)   ;;  %vm594_vm0 = vcmask (!%p141_p2), 1040384   ;;  %vm596_vm1 = vcmask (!%p141_p2), 1041408  }
   0x6   : > { %144 = sbr.rel (%p141_p2) target bundleno = 332 (0x14c), region = 28  ;;  %731 = vmatprep.subr.bf16.mxu0 (!%p141_p2), %v803_v0  ;;  %779 = vmatprep.subr.bf16.mxu1 (!%p141_p2), %v803_v0  ;;  %v806_v3 = vld [vmem:[%s1038_s1 + $0x18] sm:$0xff] (!%p141_p2)   ;;  %v807_v7 = vld [vmem:[%s1038_s1 + $0x20] sm:$0xff] (!%p141_p2)   ;;  %v808_v11 = vld [vmem:[%s1038_s1 + $0x28] sm:$0xff] (!%p141_p2)  }
   0x7   : > { %732 = vmatpush3.bf16.msra.mxu0 (!%p141_p2), %v803_v0  ;;  %787 = vmatpush3.bf16.msra.mxu1 (!%p141_p2), %v803_v0  ;;  %v809_v12 = vld [vmem:[%s1038_s1 + $0x30] sm:$0xff] (!%p141_p2)   ;;  %v810_v13 = vld [vmem:[%s1038_s1 + $0x38] sm:$0xff] (!%p141_p2)  }
   0x8   : > { %733 = vmatprep.subr.bf16.mxu0 (!%p141_p2), %v804_v1  ;;  %780 = vmatprep.subr.bf16.mxu1 (!%p141_p2), %v804_v1 }
   0xb   : > { %734 = vmatpush3.bf16.msra.mxu0 (!%p141_p2), %v804_v1  ;;  %788 = vmatpush3.bf16.msra.mxu1 (!%p141_p2), %v804_v1 }
   0xc   : > { %735 = vmatprep.subr.bf16.mxu0 (!%p141_p2), %v805_v2  ;;  %781 = vmatprep.subr.bf16.mxu1 (!%p141_p2), %v805_v2 }
   0xd   : > { %s1042_s13 = smov (!%p168_p3, %s685_s13), 1 }
   0xe   : > { %s705_s20 = sshll.u32 %s1042_s13, 8  ;;  %s694_s10 = sshll.u32 %s1042_s13, 3 }
   0xf   : > { %s864_s23 = scalar_lea.vmem %s1037_s0, %s705_s20  ;;  %736 = vmatpush3.bf16.msra.mxu0 %v805_v2  ;;  %789 = vmatpush3.bf16.msra.mxu1 %v805_v2  ;;  %s918_s9 = scalar_lea.vmem %s1039_s2, %s705_s20 }
  0x10   : > { %v183_v4 = vld [vmem:[%s864_s23] sm:$0xff]  ;;  %v184_v5 = vld [vmem:[%s864_s23 + $0x8] sm:$0xff]  ;;  %737 = vmatprep.subr.bf16.mxu0 %v806_v3  ;;  %782 = vmatprep.subr.bf16.mxu1 %v806_v3  ;;  %v185_v14 = vld [vmem:[%s864_s23 + $0x10] sm:$0xff]  ;;  %s181_s15 = scalar_lea.vmem %s1040_s3, %s694_s10 }
  0x11   : > { %v215_v6 = vpack.c.bf16 %v184_v5, %v183_v4  ;;  %v199_v8 = vld [vmem:[%s864_s23 + $0x80] sm:$0xff]  ;;  %v200_v9 = vld [vmem:[%s864_s23 + $0x88] sm:$0xff]  ;;  %v186_v15 = vld [vmem:[%s864_s23 + $0x18] sm:$0xff] }
  0x12   : > { %v223_v10 = vpack.c.bf16 %v200_v9, %v199_v8  ;;  %v187_v16 = vld [vmem:[%s864_s23 + $0x20] sm:$0xff]  ;;  %v188_v17 = vld [vmem:[%s864_s23 + $0x28] sm:$0xff]  ;;  %v201_v18 = vld [vmem:[%s864_s23 + $0x90] sm:$0xff]  ;;  %v216_v22 = vpack.c.bf16 %v186_v15, %v185_v14 }
  0x13   : > { %747 = vmatprep.mubr.bf16.mxu0 %v215_v6  ;;  %738 = vmatpush3.bf16.msra.mxu0 %v806_v3  ;;  %v202_v19 = vld [vmem:[%s864_s23 + $0x98] sm:$0xff]  ;;  %v203_v20 = vld [vmem:[%s864_s23 + $0xa0] sm:$0xff]  ;;  %v204_v21 = vld [vmem:[%s864_s23 + $0xa8] sm:$0xff]  ;;  %v217_v23 = vpack.c.bf16 %v188_v17, %v187_v16 }
  0x14   : > { %739 = vmatprep.subr.bf16.mxu0 %v807_v7  ;;  %790 = vmatpush3.bf16.msra.mxu1 %v806_v3  ;;  %v224_v24 = vpack.c.bf16 %v202_v19, %v201_v18  ;;  %v225_v25 = vpack.c.bf16 %v204_v21, %v203_v20  ;;  %v189_v26 = vld [vmem:[%s864_s23 + $0x30] sm:$0xff]  ;;  %v190_v27 = vld [vmem:[%s864_s23 + $0x38] sm:$0xff]  ;;  %v191_v28 = vld [vmem:[%s864_s23 + $0x40] sm:$0xff] }
  0x15   : > { %783 = vmatprep.subr.bf16.mxu1 %v807_v7  ;;  %763 = vmatprep.mubr.bf16.mxu1 %v223_v10  ;;  %v192_v29 = vld [vmem:[%s864_s23 + $0x48] sm:$0xff]  ;;  %v205_v30 = vld [vmem:[%s864_s23 + $0xb0] sm:$0xff]  ;;  %v206_v31 = vld [vmem:[%s864_s23 + $0xb8] sm:$0xff]  ;;  %v218_v34 = vpack.c.bf16 %v190_v27, %v189_v26 }
  0x16   : > { %v207_v32 = vld [vmem:[%s864_s23 + $0xc0] sm:$0xff]  ;;  %v208_v33 = vld [vmem:[%s864_s23 + $0xc8] sm:$0xff]  ;;  %v219_v35 = vpack.c.bf16 %v192_v29, %v191_v28  ;;  %v226_v36 = vpack.c.bf16 %v206_v31, %v205_v30  ;;  %v193_v38 = vld [vmem:[%s864_s23 + $0x50] sm:$0xff] }
  0x17   : > { %740 = vmatpush3.bf16.msra.mxu0 %v807_v7  ;;  %v227_v37 = vpack.c.bf16 %v208_v33, %v207_v32  ;;  %v194_v39 = vld [vmem:[%s864_s23 + $0x58] sm:$0xff]  ;;  %v195_v40 = vld [vmem:[%s864_s23 + $0x60] sm:$0xff]  ;;  %v196_v41 = vld [vmem:[%s864_s23 + $0x68] sm:$0xff] }
  0x18   : > { %741 = vmatprep.subr.bf16.mxu0 %v808_v11  ;;  %791 = vmatpush3.bf16.msra.mxu1 %v807_v7  ;;  %v209_v42 = vld [vmem:[%s864_s23 + $0xd0] sm:$0xff]  ;;  %v210_v43 = vld [vmem:[%s864_s23 + $0xd8] sm:$0xff]  ;;  %v211_v44 = vld [vmem:[%s864_s23 + $0xe0] sm:$0xff]  ;;  %v220_v46 = vpack.c.bf16 %v194_v39, %v193_v38  ;;  %v221_v47 = vpack.c.bf16 %v196_v41, %v195_v40 }
  0x19   : > { %784 = vmatprep.subr.bf16.mxu1 %v808_v11  ;;  %v212_v45 = vld [vmem:[%s864_s23 + $0xe8] sm:$0xff]  ;;  %v228_v48 = vpack.c.bf16 %v210_v43, %v209_v42  ;;  %v197_v50 = vld [vmem:[%s864_s23 + $0x70] sm:$0xff]  ;;  %v198_v51 = vld [vmem:[%s864_s23 + $0x78] sm:$0xff] }
  0x1a   : > { %v229_v49 = vpack.c.bf16 %v212_v45, %v211_v44  ;;  %v213_v52 = vld [vmem:[%s864_s23 + $0xf0] sm:$0xff]  ;;  %v214_v53 = vld [vmem:[%s864_s23 + $0xf8] sm:$0xff]  ;;  %v222_v54 = vpack.c.bf16 %v198_v51, %v197_v50 }
  0x1b   : > { %742 = vmatpush3.bf16.msra.mxu0 %v808_v11  ;;  %v230_v55 = vpack.c.bf16 %v214_v53, %v213_v52 }
  0x1c   : > { %743 = vmatprep.subr.bf16.mxu0 %v809_v12  ;;  %792 = vmatpush3.bf16.msra.mxu1 %v808_v11 }
  0x1d   : > { %785 = vmatprep.subr.bf16.mxu1 %v809_v12 }
  0x1f   : > { %744 = vmatpush3.bf16.msra.mxu0 %v809_v12 }
  0x20   : > { %745 = vmatprep.subr.bf16.mxu0 %v810_v13  ;;  %793 = vmatpush3.bf16.msra.mxu1 %v809_v12 }
  0x21   : > { %786 = vmatprep.subr.bf16.mxu1 %v810_v13 }
  0x23   : > { %746 = vmatpush3.bf16.msra.mxu0 %v810_v13 }
  0x24   : > { %794 = vmatpush3.bf16.msra.mxu1 %v810_v13 }
  0x26   : > { %748 = vmatmul.mubr.bf16.vlgmr.msra.gmra.mrb[0].mxu0 %v216_v22 }
  0x27   : > { %751 = vmatprep.mubr.bf16.mxu0 %v217_v23  ;;  %764 = vmatmul.mubr.bf16.vlgmr.msra.gmra.mrb[0].mxu1 %v224_v24 }
  0x28   : > { %767 = vmatprep.mubr.bf16.mxu1 %v225_v25 }
  0x2e   : > { %752 = vmatmul.mubr.bf16.gmra.mrb[4].mxu0 %v218_v34 }
  0x2f   : > { %755 = vmatprep.mubr.bf16.mxu0 %v219_v35  ;;  %768 = vmatmul.mubr.bf16.gmra.mrb[4].mxu1 %v226_v36 }
  0x30   : > { %771 = vmatprep.mubr.bf16.mxu1 %v227_v37 }
  0x36   : > { %756 = vmatmul.mubr.bf16.gmra.mrb[8].mxu0 %v220_v46 }
  0x37   : > { %759 = vmatprep.mubr.bf16.mxu0 %v221_v47  ;;  %772 = vmatmul.mubr.bf16.gmra.mrb[8].mxu1 %v228_v48 }
  0x38   : > { %775 = vmatprep.mubr.bf16.mxu1 %v229_v49 }
  0x3e   : > { %760 = vmatmul.mubr.bf16.gmra.mrb[12].mxu0 %v222_v54 }
  0x3f   : > { %776 = vmatmul.mubr.bf16.gmra.mrb[12].mxu1 %v230_v55 }
  0xf9   : > { %v749_v56 = vpop.f32.mrb[0].mxu0 }
  0xfa   : > { %458 = vst [vmem:[%s918_s9 + $0x10] sm:$0xff] %v749_v56  ;;  %v329_v57 = vpop.f32.mrb[1].mxu0  ;;  %v921_v58 = vpop.f32.mrb[0].mxu1  ;;  %v527_v3 = vmul.f32 %v749_v56, %v749_v56 }
  0xfb   : > { %456 = vst [vmem:[%s918_s9] sm:$0xff] %v329_v57  ;;  %v750_v59 = vpop.f32.mrb[2].mxu0  ;;  %474 = vst [vmem:[%s918_s9 + $0x90] sm:$0xff] %v921_v58  ;;  %v926_v60 = vpop.f32.mrb[1].mxu1  ;;  %v525_v63 = vmul.f32 %v329_v57, %v329_v57 }
  0xfc   : > { %459 = vst [vmem:[%s918_s9 + $0x18] sm:$0xff] %v750_v59  ;;  %v332_v61 = vpop.f32.mrb[3].mxu0  ;;  %472 = vst [vmem:[%s918_s9 + $0x80] sm:$0xff] %v926_v60  ;;  %v931_v62 = vpop.f32.mrb[2].mxu1  ;;  %v528_v6 = vmul.f32 %v750_v59, %v750_v59 }
  0xfd   : > { %457 = vst [vmem:[%s918_s9 + $0x8] sm:$0xff] %v332_v61  ;;  %v488_v0 = vadd.f32 %v332_v61, %v329_v57  ;;  %v526_v1 = vmul.f32 %v332_v61, %v332_v61  ;;  %475 = vst [vmem:[%s918_s9 + $0x98] sm:$0xff] %v931_v62  ;;  %v936_v2 = vpop.f32.mrb[3].mxu1 }
  0xfe   : > { %473 = vst [vmem:[%s918_s9 + $0x88] sm:$0xff] %v936_v2 }
  0xff   : > { %v489_v4 = vadd.f32 %v749_v56, %v488_v0  ;;  %v557_v5 = vadd.f32 %v526_v1, %v525_v63 }
 0x101   : > { %v558_v7 = vadd.f32 %v557_v5, %v527_v3  ;;  %v753_v8 = vpop.f32.mrb[4].mxu0  ;;  %v490_v9 = vadd.f32 %v750_v59, %v489_v4 }
 0x102   : > { %462 = vst [vmem:[%s918_s9 + $0x30] sm:$0xff] %v753_v8  ;;  %v345_v10 = vpop.f32.mrb[5].mxu0  ;;  %v941_v11 = vpop.f32.mrb[4].mxu1  ;;  %v531_v23 = vmul.f32 %v753_v8, %v753_v8 }
 0x103   : > { %460 = vst [vmem:[%s918_s9 + $0x20] sm:$0xff] %v345_v10  ;;  %v491_v12 = vadd.f32 %v490_v9, %v345_v10  ;;  %v529_v13 = vmul.f32 %v345_v10, %v345_v10  ;;  %v559_v14 = vadd.f32 %v558_v7, %v528_v6  ;;  %v754_v15 = vpop.f32.mrb[6].mxu0  ;;  %478 = vst [vmem:[%s918_s9 + $0xb0] sm:$0xff] %v941_v11  ;;  %v946_v16 = vpop.f32.mrb[5].mxu1 }
 0x104   : > { %463 = vst [vmem:[%s918_s9 + $0x38] sm:$0xff] %v754_v15  ;;  %v348_v17 = vpop.f32.mrb[7].mxu0  ;;  %476 = vst [vmem:[%s918_s9 + $0xa0] sm:$0xff] %v946_v16  ;;  %v951_v18 = vpop.f32.mrb[6].mxu1  ;;  %v532_v26 = vmul.f32 %v754_v15, %v754_v15  ;;  %v541_v9 = vmul.f32 %v926_v60, %v926_v60 }
 0x105   : > { %v560_v19 = vadd.f32 %v559_v14, %v529_v13  ;;  %461 = vst [vmem:[%s918_s9 + $0x28] sm:$0xff] %v348_v17  ;;  %v492_v20 = vadd.f32 %v491_v12, %v348_v17  ;;  %v530_v21 = vmul.f32 %v348_v17, %v348_v17  ;;  %479 = vst [vmem:[%s918_s9 + $0xb8] sm:$0xff] %v951_v18  ;;  %v956_v22 = vpop.f32.mrb[7].mxu1 }
 0x106   : > { %477 = vst [vmem:[%s918_s9 + $0xa8] sm:$0xff] %v956_v22  ;;  %v543_v17 = vmul.f32 %v921_v58, %v921_v58 }
 0x107   : > { %v493_v24 = vadd.f32 %v753_v8, %v492_v20  ;;  %v561_v25 = vadd.f32 %v560_v19, %v530_v21  ;;  %v544_v21 = vmul.f32 %v931_v62, %v931_v62 }
 0x109   : > { %v562_v27 = vadd.f32 %v561_v25, %v531_v23  ;;  %v757_v28 = vpop.f32.mrb[8].mxu0  ;;  %v494_v29 = vadd.f32 %v754_v15, %v493_v24  ;;  %v542_v15 = vmul.f32 %v936_v2, %v936_v2 }
 0x10a   : > { %466 = vst [vmem:[%s918_s9 + $0x50] sm:$0xff] %v757_v28  ;;  %v361_v30 = vpop.f32.mrb[9].mxu0  ;;  %v961_v31 = vpop.f32.mrb[8].mxu1  ;;  %v535_v43 = vmul.f32 %v757_v28, %v757_v28 }
 0x10b   : > { %464 = vst [vmem:[%s918_s9 + $0x40] sm:$0xff] %v361_v30  ;;  %v495_v32 = vadd.f32 %v494_v29, %v361_v30  ;;  %v533_v33 = vmul.f32 %v361_v30, %v361_v30  ;;  %v563_v34 = vadd.f32 %v562_v27, %v532_v26  ;;  %v758_v35 = vpop.f32.mrb[10].mxu0  ;;  %482 = vst [vmem:[%s918_s9 + $0xd0] sm:$0xff] %v961_v31  ;;  %v966_v36 = vpop.f32.mrb[9].mxu1 }
 0x10c   : > { %467 = vst [vmem:[%s918_s9 + $0x58] sm:$0xff] %v758_v35  ;;  %v364_v37 = vpop.f32.mrb[11].mxu0  ;;  %480 = vst [vmem:[%s918_s9 + $0xc0] sm:$0xff] %v966_v36  ;;  %v971_v38 = vpop.f32.mrb[10].mxu1  ;;  %v536_v46 = vmul.f32 %v758_v35, %v758_v35 }
 0x10d   : > { %v564_v39 = vadd.f32 %v563_v34, %v533_v33  ;;  %465 = vst [vmem:[%s918_s9 + $0x48] sm:$0xff] %v364_v37  ;;  %v496_v40 = vadd.f32 %v495_v32, %v364_v37  ;;  %v534_v41 = vmul.f32 %v364_v37, %v364_v37  ;;  %483 = vst [vmem:[%s918_s9 + $0xd8] sm:$0xff] %v971_v38  ;;  %v976_v42 = vpop.f32.mrb[11].mxu1 }
 0x10e   : > { %481 = vst [vmem:[%s918_s9 + $0xc8] sm:$0xff] %v976_v42 }
 0x10f   : > { %v497_v44 = vadd.f32 %v757_v28, %v496_v40  ;;  %v565_v45 = vadd.f32 %v564_v39, %v534_v41  ;;  %v546_v28 = vmul.f32 %v956_v22, %v956_v22  ;;  %v550_v39 = vmul.f32 %v976_v42, %v976_v42 }
 0x111   : > { %v566_v47 = vadd.f32 %v565_v45, %v535_v43  ;;  %v761_v48 = vpop.f32.mrb[12].mxu0  ;;  %v498_v49 = vadd.f32 %v758_v35, %v497_v44 }
 0x112   : > { %470 = vst [vmem:[%s918_s9 + $0x70] sm:$0xff] %v761_v48  ;;  %v377_v50 = vpop.f32.mrb[13].mxu0  ;;  %v981_v51 = vpop.f32.mrb[12].mxu1  ;;  %v539_v3 = vmul.f32 %v761_v48, %v761_v48 }
 0x113   : > { %468 = vst [vmem:[%s918_s9 + $0x60] sm:$0xff] %v377_v50  ;;  %v499_v52 = vadd.f32 %v498_v49, %v377_v50  ;;  %v537_v53 = vmul.f32 %v377_v50, %v377_v50  ;;  %v567_v54 = vadd.f32 %v566_v47, %v536_v46  ;;  %v762_v55 = vpop.f32.mrb[14].mxu0  ;;  %486 = vst [vmem:[%s918_s9 + $0xf0] sm:$0xff] %v981_v51  ;;  %v441_v56 = vpop.f32.mrb[13].mxu1 }
 0x114   : > { %471 = vst [vmem:[%s918_s9 + $0x78] sm:$0xff] %v762_v55  ;;  %v380_v57 = vpop.f32.mrb[15].mxu0  ;;  %484 = vst [vmem:[%s918_s9 + $0xe0] sm:$0xff] %v441_v56  ;;  %v778_v59 = vpop.f32.mrb[14].mxu1  ;;  %v540_v6 = vmul.f32 %v762_v55, %v762_v55 }
 0x115   : > { %v568_v61 = vadd.f32 %v567_v54, %v537_v53  ;;  %469 = vst [vmem:[%s918_s9 + $0x68] sm:$0xff] %v380_v57  ;;  %v500_v63 = vadd.f32 %v499_v52, %v380_v57  ;;  %v538_v0 = vmul.f32 %v380_v57, %v380_v57  ;;  %487 = vst [vmem:[%s918_s9 + $0xf8] sm:$0xff] %v778_v59  ;;  %v444_v1 = vpop.f32.mrb[15].mxu1 }
 0x116   : > { %485 = vst [vmem:[%s918_s9 + $0xe8] sm:$0xff] %v444_v1  ;;  %v554_v49 = vmul.f32 %v444_v1, %v444_v1  ;;  %v556_v52 = vmul.f32 %v778_v59, %v778_v59 }
 0x117   : > { %v501_v4 = vadd.f32 %v761_v48, %v500_v63  ;;  %v569_v5 = vadd.f32 %v568_v61, %v538_v0 }
 0x119   : > { %v570_v7 = vadd.f32 %v569_v5, %v539_v3  ;;  %v502_v8 = vadd.f32 %v762_v55, %v501_v4 }
 0x11b   : > { %v503_v10 = vadd.f32 %v502_v8, %v926_v60  ;;  %v571_v12 = vadd.f32 %v570_v7, %v540_v6  ;;  %v545_v60 = vmul.f32 %v946_v16, %v946_v16 }
 0x11d   : > { %v572_v13 = vadd.f32 %v571_v12, %v541_v9  ;;  %v504_v14 = vadd.f32 %v503_v10, %v936_v2 }
 0x11f   : > { %v505_v19 = vadd.f32 %v921_v58, %v504_v14  ;;  %v573_v20 = vadd.f32 %v572_v13, %v542_v15  ;;  %v547_v58 = vmul.f32 %v941_v11, %v941_v11 }
 0x121   : > { %v574_v23 = vadd.f32 %v573_v20, %v543_v17  ;;  %v506_v24 = vadd.f32 %v931_v62, %v505_v19  ;;  %v548_v62 = vmul.f32 %v951_v18, %v951_v18 }
 0x123   : > { %v507_v25 = vadd.f32 %v506_v24, %v946_v16  ;;  %v575_v26 = vadd.f32 %v574_v23, %v544_v21  ;;  %v549_v16 = vmul.f32 %v966_v36, %v966_v36 }
 0x125   : > { %v576_v27 = vadd.f32 %v575_v26, %v545_v60  ;;  %v508_v2 = vadd.f32 %v507_v25, %v956_v22 }
 0x127   : > { %v509_v29 = vadd.f32 %v941_v11, %v508_v2  ;;  %v577_v30 = vadd.f32 %v576_v27, %v546_v28  ;;  %v551_v11 = vmul.f32 %v961_v31, %v961_v31 }
 0x129   : > { %v578_v32 = vadd.f32 %v577_v30, %v547_v58  ;;  %v510_v33 = vadd.f32 %v951_v18, %v509_v29  ;;  %v552_v18 = vmul.f32 %v971_v38, %v971_v38 }
 0x12b   : > { %v511_v34 = vadd.f32 %v510_v33, %v966_v36  ;;  %v579_v35 = vadd.f32 %v578_v32, %v548_v62  ;;  %v553_v36 = vmul.f32 %v441_v56, %v441_v56 }
 0x12d   : > { %v580_v37 = vadd.f32 %v579_v35, %v549_v16  ;;  %v512_v22 = vadd.f32 %v511_v34, %v976_v42  ;;  %v555_v42 = vmul.f32 %v981_v51, %v981_v51 }
 0x12f   : > { %v513_v40 = vadd.f32 %v961_v31, %v512_v22  ;;  %v581_v41 = vadd.f32 %v580_v37, %v550_v39 }
 0x131   : > { %v582_v43 = vadd.f32 %v581_v41, %v551_v11  ;;  %v514_v44 = vadd.f32 %v971_v38, %v513_v40 }
 0x133   : > { %v515_v45 = vadd.f32 %v514_v44, %v441_v56  ;;  %v583_v46 = vadd.f32 %v582_v43, %v552_v18 }
 0x135   : > { %v584_v47 = vadd.f32 %v583_v46, %v553_v36  ;;  %v516_v48 = vadd.f32 %v515_v45, %v444_v1 }
 0x137   : > { %v517_v50 = vadd.f32 %v981_v51, %v516_v48  ;;  %v585_v31 = vadd.f32 %v584_v47, %v554_v49 }
 0x139   : > { %v518_v53 = vadd.f32 %v778_v59, %v517_v50  ;;  %v586_v54 = vadd.f32 %v585_v31, %v555_v42 }
 0x13b   : > { %v519_v55 = vrot.slane %v518_v53, 4  ;;  %v587_v57 = vadd.f32 %v586_v54, %v556_v52 }
 0x13d   : > { %v520_v61 = vadd.f32 %v519_v55, %v518_v53  ;;  %v588_v38 = vrot.slane %v587_v57, 4 }
 0x13f   : > { %v521_v63 = vrot.slane %v520_v61, 2  ;;  %v589_v56 = vadd.f32 %v588_v38, %v587_v57 }
 0x141   : > { %v522_v0 = vadd.f32 %v521_v63, %v520_v61  ;;  %v590_v3 = vrot.slane %v589_v56, 2 }
 0x143   : > { %v523_v4 = vrot.slane %v522_v0, 1  ;;  %v591_v1 = vadd.f32 %v590_v3, %v589_v56 }
 0x145   : > { %v592_v5 = vrot.slane %v591_v1, 1  ;;  %v524_v6 = vadd.f32 %v523_v4, %v522_v0 }
 0x147   : > { %v593_v7 = vadd.f32 %v592_v5, %v591_v1 }
 0x149   : > { %v595_v51 = vsel %vm594_vm0, %v524_v6, %v593_v7 }
 0x14a   : > { %v597_v59 = vsel %vm596_vm1, %v595_v51, 0.0 }
 0x14b   : > { %598 = vst [vmem:[%s181_s15] sm:$0xff] %v597_v59 }
 0x14c PF: > { %s14_s12 = sadd.s32 1, %s817_s12  }
 0x14d   : > { %p11_p4 = scmp.ge.s32.totalorder %s14_s12, 4  }
 0x14f   :  { %13 = sbr.rel (!%p11_p4) target bundleno = 1 (0x1), region = 70 }

// kernel: bottleneck_pallas.7
= control target key start
LH: loop header
LB: loop body
LE: loop exit
PB: predicated region body
PF: predicated region fallthrough
CT: control target
= control target key end

     0   :  { %s546_s12 = smov 0   ;;  %s747_s0 = inlined_call_operand.vmem [shape: f32[2,16,16,128], index: 0, kind: input, shape index: {}]   ;;  %s748_s1 = inlined_call_operand.vmem [shape: f32[8,128], index: 1, kind: input, shape index: {}]   ;;  %s749_s2 = inlined_call_operand.vmem [shape: f32[2,16,16,128], index: 2, kind: input, shape index: {}]   ;;  %s750_s3 = inlined_call_operand.vmem [shape: f32[2,16,16,128], index: 3, kind: output, shape index: {}]  }
   0x1 LB: > { %s492_s13 = sadd.s32 4294967295, %s524_s12   ;;  %p496_p0 = scmp.ge.s32.totalorder %s524_s12, 1  ;;  %s524_s12 = sphi %s546_s12, %s13_s12  }
   0x2   : > { %p147_p1 = scmp.lt.s32.totalorder %s524_s12, 3 }
   0x4   : > { %p148_p2 = pnand %p496_p0, %p147_p1 }
   0x5   : > { %p176_p3 = scmp.lt.s32.totalorder (!%p148_p2), %s492_s13, 1  ;;  %v559_v0 = vld [vmem:[%s748_s1] ss:$0 sm:$0xff] (!%p148_p2)  ;;  %v576_v1 = vld [vmem:[%s748_s1 + $0x1] ss:$0 sm:$0xff] (!%p148_p2) }
   0x6   : > { %151 = sbr.rel (%p148_p2) target bundleno = 55 (0x37), region = 32 }
   0xd   : > { %s752_s13 = smov (!%p176_p3, %s492_s13), 1 }
   0xe   : > { %s554_s14 = sshll.u32 %s752_s13, 8 }
   0xf   : > { %s565_s19 = scalar_lea.vmem %s747_s0, %s554_s14  ;;  %s571_s22 = scalar_lea.vmem %s749_s2, %s554_s14 }
  0x10   : > { %v193_v2 = vld [vmem:[%s565_s19] sm:$0xff]  ;;  %v194_v3 = vld [vmem:[%s565_s19 + $0x8] sm:$0xff]  ;;  %v195_v7 = vld [vmem:[%s565_s19 + $0x10] sm:$0xff]  ;;  %s607_s27 = scalar_lea.vmem %s750_s3, %s554_s14 }
  0x11   : > { %v229_v4 = vmul.f32 %v559_v0, %v193_v2  ;;  %v297_v5 = vld [vmem:[%s571_s22] sm:$0xff]  ;;  %v230_v6 = vmul.f32 %v559_v0, %v194_v3  ;;  %v298_v8 = vld [vmem:[%s571_s22 + $0x8] sm:$0xff]  ;;  %v231_v9 = vmul.f32 %v559_v0, %v195_v7  ;;  %v196_v10 = vld [vmem:[%s565_s19 + $0x18] sm:$0xff] }
  0x12   : > { %v197_v11 = vld [vmem:[%s565_s19 + $0x20] sm:$0xff]  ;;  %v299_v14 = vld [vmem:[%s571_s22 + $0x10] sm:$0xff]  ;;  %v232_v15 = vmul.f32 %v559_v0, %v196_v10  ;;  %v300_v16 = vld [vmem:[%s571_s22 + $0x18] sm:$0xff] }
  0x13   : > { %v265_v12 = vadd.f32 %v576_v1, %v229_v4  ;;  %v266_v13 = vadd.f32 %v576_v1, %v230_v6  ;;  %v233_v17 = vmul.f32 %v559_v0, %v197_v11  ;;  %v198_v18 = vld [vmem:[%s565_s19 + $0x28] sm:$0xff]  ;;  %v267_v19 = vadd.f32 %v576_v1, %v231_v9  ;;  %v301_v20 = vld [vmem:[%s571_s22 + $0x20] sm:$0xff]  ;;  %v199_v22 = vld [vmem:[%s565_s19 + $0x30] sm:$0xff] }
  0x14   : > { %v234_v21 = vmul.f32 %v559_v0, %v198_v18  ;;  %v200_v23 = vld [vmem:[%s565_s19 + $0x38] sm:$0xff]  ;;  %v268_v26 = vadd.f32 %v576_v1, %v232_v15  ;;  %v302_v28 = vld [vmem:[%s571_s22 + $0x28] sm:$0xff]  ;;  %v235_v31 = vmul.f32 %v559_v0, %v199_v22  ;;  %v201_v33 = vld [vmem:[%s565_s19 + $0x40] sm:$0xff] }
  0x15   : > { %v329_v24 = vadd.f32 %v297_v5, %v265_v12  ;;  %v330_v25 = vadd.f32 %v298_v8, %v266_v13  ;;  %v269_v27 = vadd.f32 %v576_v1, %v233_v17  ;;  %v331_v29 = vadd.f32 %v299_v14, %v267_v19  ;;  %v202_v34 = vld [vmem:[%s565_s19 + $0x48] sm:$0xff]  ;;  %v303_v39 = vld [vmem:[%s571_s22 + $0x30] sm:$0xff]  ;;  %v304_v40 = vld [vmem:[%s571_s22 + $0x38] sm:$0xff] }
  0x16   : > { %v270_v30 = vadd.f32 %v576_v1, %v234_v21  ;;  %v236_v32 = vmul.f32 %v559_v0, %v200_v23  ;;  %v332_v37 = vadd.f32 %v300_v16, %v268_v26  ;;  %v203_v41 = vld [vmem:[%s565_s19 + $0x50] sm:$0xff]  ;;  %v271_v44 = vadd.f32 %v576_v1, %v235_v31  ;;  %v204_v46 = vld [vmem:[%s565_s19 + $0x58] sm:$0xff]  ;;  %v205_v47 = vld [vmem:[%s565_s19 + $0x60] sm:$0xff] }
  0x17   : > { %v361_v35 = vmax.f32 %v329_v24, 0.0  ;;  %v362_v36 = vmax.f32 %v330_v25, 0.0  ;;  %v333_v38 = vadd.f32 %v301_v20, %v269_v27  ;;  %v363_v42 = vmax.f32 %v331_v29, 0.0  ;;  %v206_v52 = vld [vmem:[%s565_s19 + $0x68] sm:$0xff]  ;;  %v305_v56 = vld [vmem:[%s571_s22 + $0x40] sm:$0xff]  ;;  %v307_v61 = vld [vmem:[%s571_s22 + $0x50] sm:$0xff] }
  0x18   : > { %v334_v43 = vadd.f32 %v302_v28, %v270_v30  ;;  %v272_v45 = vadd.f32 %v576_v1, %v236_v32  ;;  %v364_v48 = vmax.f32 %v332_v37, 0.0  ;;  %v237_v50 = vmul.f32 %v559_v0, %v201_v33  ;;  %v306_v57 = vld [vmem:[%s571_s22 + $0x48] sm:$0xff]  ;;  %v207_v2 = vld [vmem:[%s565_s19 + $0x70] sm:$0xff]  ;;  %v208_v3 = vld [vmem:[%s565_s19 + $0x78] sm:$0xff] }
  0x19   : > { %393 = vst [vmem:[%s607_s27] sm:$0xff] %v361_v35  ;;  %394 = vst [vmem:[%s607_s27 + $0x8] sm:$0xff] %v362_v36  ;;  %v365_v49 = vmax.f32 %v333_v38, 0.0  ;;  %v238_v51 = vmul.f32 %v559_v0, %v202_v34  ;;  %v335_v54 = vadd.f32 %v303_v39, %v271_v44  ;;  %v239_v58 = vmul.f32 %v559_v0, %v203_v41  ;;  %v308_v7 = vld [vmem:[%s571_s22 + $0x58] sm:$0xff]  ;;  %v309_v8 = vld [vmem:[%s571_s22 + $0x60] sm:$0xff] }
  0x1a   : > { %395 = vst [vmem:[%s607_s27 + $0x10] sm:$0xff] %v363_v42  ;;  %v366_v53 = vmax.f32 %v334_v43, 0.0  ;;  %v336_v55 = vadd.f32 %v304_v40, %v272_v45  ;;  %396 = vst [vmem:[%s607_s27 + $0x18] sm:$0xff] %v364_v48  ;;  %v273_v59 = vadd.f32 %v576_v1, %v237_v50  ;;  %v240_v62 = vmul.f32 %v559_v0, %v204_v46  ;;  %v310_v14 = vld [vmem:[%s571_s22 + $0x68] sm:$0xff]  ;;  %v209_v19 = vld [vmem:[%s565_s19 + $0x80] sm:$0xff] }
  0x1b   : > { %397 = vst [vmem:[%s607_s27 + $0x20] sm:$0xff] %v365_v49  ;;  %v274_v60 = vadd.f32 %v576_v1, %v238_v51  ;;  %v241_v63 = vmul.f32 %v559_v0, %v205_v47  ;;  %v367_v4 = vmax.f32 %v335_v54, 0.0  ;;  %v275_v6 = vadd.f32 %v576_v1, %v239_v58  ;;  %v210_v20 = vld [vmem:[%s565_s19 + $0x88] sm:$0xff]  ;;  %v311_v25 = vld [vmem:[%s571_s22 + $0x70] sm:$0xff]  ;;  %v312_v26 = vld [vmem:[%s571_s22 + $0x78] sm:$0xff] }
  0x1c   : > { %398 = vst [vmem:[%s607_s27 + $0x28] sm:$0xff] %v366_v53  ;;  %v368_v5 = vmax.f32 %v336_v55, 0.0  ;;  %v242_v9 = vmul.f32 %v559_v0, %v206_v52  ;;  %v337_v10 = vadd.f32 %v305_v56, %v273_v59  ;;  %v276_v12 = vadd.f32 %v576_v1, %v240_v62  ;;  %v211_v27 = vld [vmem:[%s565_s19 + $0x90] sm:$0xff]  ;;  %v212_v32 = vld [vmem:[%s565_s19 + $0x98] sm:$0xff]  ;;  %v213_v33 = vld [vmem:[%s565_s19 + $0xa0] sm:$0xff] }
  0x1d   : > { %v338_v11 = vadd.f32 %v306_v57, %v274_v60  ;;  %v277_v13 = vadd.f32 %v576_v1, %v241_v63  ;;  %399 = vst [vmem:[%s607_s27 + $0x30] sm:$0xff] %v367_v4  ;;  %v339_v15 = vadd.f32 %v307_v61, %v275_v6  ;;  %v243_v17 = vmul.f32 %v559_v0, %v207_v2  ;;  %v214_v38 = vld [vmem:[%s565_s19 + $0xa8] sm:$0xff]  ;;  %v313_v42 = vld [vmem:[%s571_s22 + $0x80] sm:$0xff]  ;;  %v315_v47 = vld [vmem:[%s571_s22 + $0x90] sm:$0xff] }
  0x1e   : > { %400 = vst [vmem:[%s607_s27 + $0x38] sm:$0xff] %v368_v5  ;;  %v278_v16 = vadd.f32 %v576_v1, %v242_v9  ;;  %v244_v18 = vmul.f32 %v559_v0, %v208_v3  ;;  %v369_v21 = vmax.f32 %v337_v10, 0.0  ;;  %v340_v23 = vadd.f32 %v308_v7, %v276_v12  ;;  %v314_v43 = vld [vmem:[%s571_s22 + $0x88] sm:$0xff]  ;;  %v215_v50 = vld [vmem:[%s565_s19 + $0xb0] sm:$0xff]  ;;  %v216_v51 = vld [vmem:[%s565_s19 + $0xb8] sm:$0xff] }
  0x1f   : > { %v370_v22 = vmax.f32 %v338_v11, 0.0  ;;  %v341_v24 = vadd.f32 %v309_v8, %v277_v13  ;;  %v371_v28 = vmax.f32 %v339_v15, 0.0  ;;  %v279_v30 = vadd.f32 %v576_v1, %v243_v17  ;;  %v316_v55 = vld [vmem:[%s571_s22 + $0x98] sm:$0xff]  ;;  %v317_v56 = vld [vmem:[%s571_s22 + $0xa0] sm:$0xff]  ;;  %v318_v62 = vld [vmem:[%s571_s22 + $0xa8] sm:$0xff] }
  0x20   : > { %v342_v29 = vadd.f32 %v310_v14, %v278_v16  ;;  %v280_v31 = vadd.f32 %v576_v1, %v244_v18  ;;  %401 = vst [vmem:[%s607_s27 + $0x40] sm:$0xff] %v369_v21  ;;  %v372_v34 = vmax.f32 %v340_v23, 0.0  ;;  %v245_v36 = vmul.f32 %v559_v0, %v209_v19  ;;  %v217_v5 = vld [vmem:[%s565_s19 + $0xc0] sm:$0xff]  ;;  %v218_v6 = vld [vmem:[%s565_s19 + $0xc8] sm:$0xff]  ;;  %v319_v11 = vld [vmem:[%s571_s22 + $0xb0] sm:$0xff] }
  0x21   : > { %402 = vst [vmem:[%s607_s27 + $0x48] sm:$0xff] %v370_v22  ;;  %v373_v35 = vmax.f32 %v341_v24, 0.0  ;;  %v246_v37 = vmul.f32 %v559_v0, %v210_v20  ;;  %403 = vst [vmem:[%s607_s27 + $0x50] sm:$0xff] %v371_v28  ;;  %v343_v40 = vadd.f32 %v311_v25, %v279_v30  ;;  %v247_v44 = vmul.f32 %v559_v0, %v211_v27  ;;  %v320_v12 = vld [vmem:[%s571_s22 + $0xb8] sm:$0xff]  ;;  %v219_v13 = vld [vmem:[%s565_s19 + $0xd0] sm:$0xff] }
  0x22   : > { %v374_v39 = vmax.f32 %v342_v29, 0.0  ;;  %v344_v41 = vadd.f32 %v312_v26, %v280_v31  ;;  %404 = vst [vmem:[%s607_s27 + $0x58] sm:$0xff] %v372_v34  ;;  %v281_v45 = vadd.f32 %v576_v1, %v245_v36  ;;  %v248_v48 = vmul.f32 %v559_v0, %v212_v32  ;;  %v220_v18 = vld [vmem:[%s565_s19 + $0xd8] sm:$0xff]  ;;  %v221_v19 = vld [vmem:[%s565_s19 + $0xe0] sm:$0xff]  ;;  %v222_v24 = vld [vmem:[%s565_s19 + $0xe8] sm:$0xff] }
  0x23   : > { %405 = vst [vmem:[%s607_s27 + $0x60] sm:$0xff] %v373_v35  ;;  %v282_v46 = vadd.f32 %v576_v1, %v246_v37  ;;  %v249_v49 = vmul.f32 %v559_v0, %v213_v33  ;;  %v375_v52 = vmax.f32 %v343_v40, 0.0  ;;  %v283_v54 = vadd.f32 %v576_v1, %v247_v44  ;;  %v321_v28 = vld [vmem:[%s571_s22 + $0xc0] sm:$0xff]  ;;  %v322_v29 = vld [vmem:[%s571_s22 + $0xc8] sm:$0xff]  ;;  %v323_v33 = vld [vmem:[%s571_s22 + $0xd0] sm:$0xff] }
  0x24   : > { %406 = vst [vmem:[%s607_s27 + $0x68] sm:$0xff] %v374_v39  ;;  %v376_v53 = vmax.f32 %v344_v41, 0.0  ;;  %v250_v57 = vmul.f32 %v559_v0, %v214_v38  ;;  %v345_v58 = vadd.f32 %v313_v42, %v281_v45  ;;  %v284_v60 = vadd.f32 %v576_v1, %v248_v48  ;;  %v223_v36 = vld [vmem:[%s565_s19 + $0xf0] sm:$0xff]  ;;  %v224_v37 = vld [vmem:[%s565_s19 + $0xf8] sm:$0xff]  ;;  %v325_v42 = vld [vmem:[%s571_s22 + $0xe0] sm:$0xff] }
  0x25   : > { %v346_v59 = vadd.f32 %v314_v43, %v282_v46  ;;  %v285_v61 = vadd.f32 %v576_v1, %v249_v49  ;;  %407 = vst [vmem:[%s607_s27 + $0x70] sm:$0xff] %v375_v52  ;;  %v347_v63 = vadd.f32 %v315_v47, %v283_v54  ;;  %v251_v3 = vmul.f32 %v559_v0, %v215_v50  ;;  %v324_v41 = vld [vmem:[%s571_s22 + $0xd8] sm:$0xff]  ;;  %v326_v48 = vld [vmem:[%s571_s22 + $0xe8] sm:$0xff] }
  0x26   : > { %408 = vst [vmem:[%s607_s27 + $0x78] sm:$0xff] %v376_v53  ;;  %v286_v2 = vadd.f32 %v576_v1, %v250_v57  ;;  %v252_v4 = vmul.f32 %v559_v0, %v216_v51  ;;  %v377_v7 = vmax.f32 %v345_v58, 0.0  ;;  %v348_v9 = vadd.f32 %v316_v55, %v284_v60  ;;  %v327_v57 = vld [vmem:[%s571_s22 + $0xf0] sm:$0xff]  ;;  %v328_v58 = vld [vmem:[%s571_s22 + $0xf8] sm:$0xff] }
  0x27   : > { %v378_v8 = vmax.f32 %v346_v59, 0.0  ;;  %v349_v10 = vadd.f32 %v317_v56, %v285_v61  ;;  %v379_v14 = vmax.f32 %v347_v63, 0.0  ;;  %v287_v16 = vadd.f32 %v576_v1, %v251_v3 }
  0x28   : > { %v350_v15 = vadd.f32 %v318_v62, %v286_v2  ;;  %v288_v17 = vadd.f32 %v576_v1, %v252_v4  ;;  %409 = vst [vmem:[%s607_s27 + $0x80] sm:$0xff] %v377_v7  ;;  %v380_v20 = vmax.f32 %v348_v9, 0.0  ;;  %v253_v22 = vmul.f32 %v559_v0, %v217_v5 }
  0x29   : > { %410 = vst [vmem:[%s607_s27 + $0x88] sm:$0xff] %v378_v8  ;;  %v381_v21 = vmax.f32 %v349_v10, 0.0  ;;  %v254_v23 = vmul.f32 %v559_v0, %v218_v6  ;;  %411 = vst [vmem:[%s607_s27 + $0x90] sm:$0xff] %v379_v14  ;;  %v351_v26 = vadd.f32 %v319_v11, %v287_v16  ;;  %v255_v30 = vmul.f32 %v559_v0, %v219_v13 }
  0x2a   : > { %v382_v25 = vmax.f32 %v350_v15, 0.0  ;;  %v352_v27 = vadd.f32 %v320_v12, %v288_v17  ;;  %412 = vst [vmem:[%s607_s27 + $0x98] sm:$0xff] %v380_v20  ;;  %v289_v31 = vadd.f32 %v576_v1, %v253_v22  ;;  %v256_v34 = vmul.f32 %v559_v0, %v220_v18 }
  0x2b   : > { %413 = vst [vmem:[%s607_s27 + $0xa0] sm:$0xff] %v381_v21  ;;  %v290_v32 = vadd.f32 %v576_v1, %v254_v23  ;;  %v257_v35 = vmul.f32 %v559_v0, %v221_v19  ;;  %v383_v38 = vmax.f32 %v351_v26, 0.0  ;;  %v291_v40 = vadd.f32 %v576_v1, %v255_v30 }
  0x2c   : > { %414 = vst [vmem:[%s607_s27 + $0xa8] sm:$0xff] %v382_v25  ;;  %v384_v39 = vmax.f32 %v352_v27, 0.0  ;;  %v258_v43 = vmul.f32 %v559_v0, %v222_v24  ;;  %v353_v44 = vadd.f32 %v321_v28, %v289_v31  ;;  %v292_v46 = vadd.f32 %v576_v1, %v256_v34 }
  0x2d   : > { %v354_v45 = vadd.f32 %v322_v29, %v290_v32  ;;  %v293_v47 = vadd.f32 %v576_v1, %v257_v35  ;;  %415 = vst [vmem:[%s607_s27 + $0xb0] sm:$0xff] %v383_v38  ;;  %v355_v49 = vadd.f32 %v323_v33, %v291_v40  ;;  %v259_v51 = vmul.f32 %v559_v0, %v223_v36 }
  0x2e   : > { %416 = vst [vmem:[%s607_s27 + $0xb8] sm:$0xff] %v384_v39  ;;  %v294_v50 = vadd.f32 %v576_v1, %v258_v43  ;;  %v260_v52 = vmul.f32 %v559_v0, %v224_v37  ;;  %v385_v53 = vmax.f32 %v353_v44, 0.0  ;;  %v356_v55 = vadd.f32 %v324_v41, %v292_v46 }
  0x2f   : > { %v386_v54 = vmax.f32 %v354_v45, 0.0  ;;  %v357_v56 = vadd.f32 %v325_v42, %v293_v47  ;;  %v387_v59 = vmax.f32 %v355_v49, 0.0  ;;  %v295_v61 = vadd.f32 %v576_v1, %v259_v51 }
  0x30   : > { %v358_v60 = vadd.f32 %v326_v48, %v294_v50  ;;  %v296_v62 = vadd.f32 %v576_v1, %v260_v52  ;;  %417 = vst [vmem:[%s607_s27 + $0xc0] sm:$0xff] %v385_v53  ;;  %v388_v0 = vmax.f32 %v356_v55, 0.0 }
  0x31   : > { %418 = vst [vmem:[%s607_s27 + $0xc8] sm:$0xff] %v386_v54  ;;  %v389_v63 = vmax.f32 %v357_v56, 0.0  ;;  %419 = vst [vmem:[%s607_s27 + $0xd0] sm:$0xff] %v387_v59  ;;  %v359_v3 = vadd.f32 %v327_v57, %v295_v61 }
  0x32   : > { %v390_v2 = vmax.f32 %v358_v60, 0.0  ;;  %v360_v4 = vadd.f32 %v328_v58, %v296_v62  ;;  %420 = vst [vmem:[%s607_s27 + $0xd8] sm:$0xff] %v388_v0 }
  0x33   : > { %421 = vst [vmem:[%s607_s27 + $0xe0] sm:$0xff] %v389_v63  ;;  %v391_v5 = vmax.f32 %v359_v3, 0.0 }
  0x34   : > { %422 = vst [vmem:[%s607_s27 + $0xe8] sm:$0xff] %v390_v2  ;;  %v392_v6 = vmax.f32 %v360_v4, 0.0 }
  0x35   : > { %423 = vst [vmem:[%s607_s27 + $0xf0] sm:$0xff] %v391_v5 }
  0x36   : > { %424 = vst [vmem:[%s607_s27 + $0xf8] sm:$0xff] %v392_v6 }
  0x37 PF: > { %s13_s12 = sadd.s32 1, %s524_s12  }
  0x38   : > { %p10_p4 = scmp.ge.s32.totalorder %s13_s12, 4  }
  0x3a   :  { %12 = sbr.rel (!%p10_p4) target bundleno = 1 (0x1), region = 65 }

// kernel: bottleneck_pallas.6
= control target key start
LH: loop header
LB: loop body
LE: loop exit
PB: predicated region body
PF: predicated region fallthrough
CT: control target
= control target key end

     0   :  { %s979_s15 = smov 0   ;;  %s1268_s0 = inlined_call_operand.vmem [shape: f32[2,16,16,128], index: 0, kind: input, shape index: {}]   ;;  %s1269_s1 = inlined_call_operand.vmem [shape: f32[8,128], index: 1, kind: input, shape index: {}]   ;;  %s1270_s2 = inlined_call_operand.vmem [shape: bf16[128,128], index: 2, kind: input, shape index: {}]   ;;  %s1271_s3 = inlined_call_operand.vmem [shape: f32[2,16,16,128], index: 3, kind: output, shape index: {0}]   ;;  %s1272_s4 = inlined_call_operand.vmem [shape: f32[2,8,128], index: 4, kind: output, shape index: {1}]  }
   0x1 LB: > { %s818_s16 = sadd.s32 4294967295, %s952_s15   ;;  %p822_p0 = scmp.ge.s32.totalorder %s952_s15, 1  ;;  %s952_s15 = sphi %s979_s15, %s15_s15  }
   0x2   : > { %p165_p1 = scmp.lt.s32.totalorder %s952_s15, 3 }
   0x4   : > { %p166_p2 = pnand %p822_p0, %p165_p1 }
   0x5   : > { %v938_v0 = vld [vmem:[%s1270_s2] sm:$0xff] (!%p166_p2)   ;;  %p195_p3 = scmp.lt.s32.totalorder (!%p166_p2), %s818_s16, 1  ;;  %v939_v1 = vld [vmem:[%s1270_s2 + $0x8] sm:$0xff] (!%p166_p2)   ;;  %v940_v2 = vld [vmem:[%s1270_s2 + $0x10] sm:$0xff] (!%p166_p2)   ;;  %vm727_vm0 = vcmask (!%p166_p2), 1040384   ;;  %vm729_vm1 = vcmask (!%p166_p2), 1041408  }
   0x6   : > { %169 = sbr.rel (%p166_p2) target bundleno = 332 (0x14c), region = 32  ;;  %866 = vmatprep.subr.bf16.mxu0 (!%p166_p2), %v938_v0  ;;  %914 = vmatprep.subr.bf16.mxu1 (!%p166_p2), %v938_v0  ;;  %v941_v3 = vld [vmem:[%s1270_s2 + $0x18] sm:$0xff] (!%p166_p2)   ;;  %v1012_v4 = vld [vmem:[%s1269_s1] ss:$0 sm:$0xff] (!%p166_p2)  ;;  %v1017_v5 = vld [vmem:[%s1269_s1 + $0x1] ss:$0 sm:$0xff] (!%p166_p2) }
   0x7   : > { %867 = vmatpush3.bf16.msra.mxu0 (!%p166_p2), %v938_v0  ;;  %922 = vmatpush3.bf16.msra.mxu1 (!%p166_p2), %v938_v0  ;;  %v942_v13 = vld [vmem:[%s1270_s2 + $0x20] sm:$0xff] (!%p166_p2)   ;;  %v943_v25 = vld [vmem:[%s1270_s2 + $0x28] sm:$0xff] (!%p166_p2)   ;;  %v944_v33 = vld [vmem:[%s1270_s2 + $0x30] sm:$0xff] (!%p166_p2)  }
   0x8   : > { %868 = vmatprep.subr.bf16.mxu0 (!%p166_p2), %v939_v1  ;;  %915 = vmatprep.subr.bf16.mxu1 (!%p166_p2), %v939_v1  ;;  %v945_v52 = vld [vmem:[%s1270_s2 + $0x38] sm:$0xff] (!%p166_p2)  }
   0xb   : > { %869 = vmatpush3.bf16.msra.mxu0 (!%p166_p2), %v939_v1  ;;  %923 = vmatpush3.bf16.msra.mxu1 (!%p166_p2), %v939_v1 }
   0xc   : > { %870 = vmatprep.subr.bf16.mxu0 (!%p166_p2), %v940_v2  ;;  %916 = vmatprep.subr.bf16.mxu1 (!%p166_p2), %v940_v2 }
   0xd   : > { %s1274_s16 = smov (!%p195_p3, %s818_s16), 1 }
   0xe   : > { %s840_s23 = sshll.u32 %s1274_s16, 8  ;;  %s827_s20 = sshll.u32 %s1274_s16, 3 }
   0xf   : > { %s1004_s26 = scalar_lea.vmem %s1268_s0, %s840_s23  ;;  %871 = vmatpush3.bf16.msra.mxu0 %v940_v2  ;;  %924 = vmatpush3.bf16.msra.mxu1 %v940_v2  ;;  %s1149_s19 = scalar_lea.vmem %s1271_s3, %s840_s23 }
  0x10   : > { %v212_v6 = vld [vmem:[%s1004_s26] sm:$0xff]  ;;  %v213_v7 = vld [vmem:[%s1004_s26 + $0x8] sm:$0xff]  ;;  %v214_v9 = vld [vmem:[%s1004_s26 + $0x10] sm:$0xff]  ;;  %872 = vmatprep.subr.bf16.mxu0 %v941_v3  ;;  %917 = vmatprep.subr.bf16.mxu1 %v941_v3  ;;  %s208_s23 = scalar_lea.vmem %s1272_s4, %s827_s20 }
  0x11   : > { %v248_v8 = vmul.f32 %v1012_v4, %v212_v6  ;;  %v215_v10 = vld [vmem:[%s1004_s26 + $0x18] sm:$0xff]  ;;  %v249_v11 = vmul.f32 %v1012_v4, %v213_v7  ;;  %v250_v15 = vmul.f32 %v1012_v4, %v214_v9  ;;  %v216_v17 = vld [vmem:[%s1004_s26 + $0x20] sm:$0xff]  ;;  %v217_v18 = vld [vmem:[%s1004_s26 + $0x28] sm:$0xff] }
  0x12   : > { %v251_v16 = vmul.f32 %v1012_v4, %v215_v10  ;;  %v218_v21 = vld [vmem:[%s1004_s26 + $0x30] sm:$0xff]  ;;  %v252_v22 = vmul.f32 %v1012_v4, %v216_v17  ;;  %v253_v23 = vmul.f32 %v1012_v4, %v217_v18  ;;  %v219_v24 = vld [vmem:[%s1004_s26 + $0x38] sm:$0xff]  ;;  %v228_v31 = vld [vmem:[%s1004_s26 + $0x80] sm:$0xff] }
  0x13   : > { %v284_v12 = vadd.f32 %v1017_v5, %v248_v8  ;;  %v285_v14 = vadd.f32 %v1017_v5, %v249_v11  ;;  %873 = vmatpush3.bf16.msra.mxu0 %v941_v3  ;;  %925 = vmatpush3.bf16.msra.mxu1 %v941_v3  ;;  %v286_v27 = vadd.f32 %v1017_v5, %v250_v15  ;;  %v220_v37 = vld [vmem:[%s1004_s26 + $0x40] sm:$0xff]  ;;  %v229_v38 = vld [vmem:[%s1004_s26 + $0x88] sm:$0xff]  ;;  %v230_v42 = vld [vmem:[%s1004_s26 + $0x90] sm:$0xff] }
  0x14   : > { %874 = vmatprep.subr.bf16.mxu0 %v942_v13  ;;  %v287_v28 = vadd.f32 %v1017_v5, %v251_v16  ;;  %918 = vmatprep.subr.bf16.mxu1 %v942_v13  ;;  %v254_v29 = vmul.f32 %v1012_v4, %v218_v21  ;;  %v255_v30 = vmul.f32 %v1012_v4, %v219_v24  ;;  %v221_v40 = vld [vmem:[%s1004_s26 + $0x48] sm:$0xff]  ;;  %v231_v44 = vld [vmem:[%s1004_s26 + $0x98] sm:$0xff]  ;;  %v232_v49 = vld [vmem:[%s1004_s26 + $0xa0] sm:$0xff] }
  0x15   : > { %v316_v19 = vmax.f32 %v284_v12, 0.0  ;;  %v317_v20 = vmax.f32 %v285_v14, 0.0  ;;  %v1047_v32 = vadd.f32 %v1017_v5, %v252_v22  ;;  %v318_v34 = vmax.f32 %v286_v27, 0.0  ;;  %v233_v50 = vld [vmem:[%s1004_s26 + $0xa8] sm:$0xff]  ;;  %v234_v51 = vld [vmem:[%s1004_s26 + $0xb0] sm:$0xff]  ;;  %v235_v57 = vld [vmem:[%s1004_s26 + $0xb8] sm:$0xff] }
  0x16   : > { %v319_v35 = vmax.f32 %v287_v28, 0.0  ;;  %v1053_v36 = vadd.f32 %v1017_v5, %v253_v23  ;;  %v1058_v39 = vadd.f32 %v1017_v5, %v254_v29  ;;  %v264_v41 = vmul.f32 %v1012_v4, %v228_v31  ;;  %v236_v2 = vld [vmem:[%s1004_s26 + $0xc0] sm:$0xff]  ;;  %v237_v9 = vld [vmem:[%s1004_s26 + $0xc8] sm:$0xff]  ;;  %v222_v14 = vld [vmem:[%s1004_s26 + $0x50] sm:$0xff] }
  0x17   : > { %v348_v26 = vpack.c.bf16 %v317_v20, %v316_v19  ;;  %875 = vmatpush3.bf16.msra.mxu0 %v942_v13  ;;  %926 = vmatpush3.bf16.msra.mxu1 %v942_v13  ;;  %v1064_v43 = vadd.f32 %v1017_v5, %v255_v30  ;;  %v320_v45 = vmax.f32 %v1047_v32, 0.0  ;;  %v256_v46 = vmul.f32 %v1012_v4, %v220_v37  ;;  %v223_v15 = vld [vmem:[%s1004_s26 + $0x58] sm:$0xff]  ;;  %v224_v20 = vld [vmem:[%s1004_s26 + $0x60] sm:$0xff]  ;;  %v225_v21 = vld [vmem:[%s1004_s26 + $0x68] sm:$0xff] }
  0x18   : > { %876 = vmatprep.subr.bf16.mxu0 %v943_v25  ;;  %919 = vmatprep.subr.bf16.mxu1 %v943_v25  ;;  %v265_v47 = vmul.f32 %v1012_v4, %v229_v38  ;;  %v300_v48 = vadd.f32 %v1017_v5, %v264_v41  ;;  %v349_v53 = vpack.c.bf16 %v319_v35, %v318_v34  ;;  %v321_v54 = vmax.f32 %v1053_v36, 0.0  ;;  %v238_v30 = vld [vmem:[%s1004_s26 + $0xd0] sm:$0xff]  ;;  %v239_v31 = vld [vmem:[%s1004_s26 + $0xd8] sm:$0xff]  ;;  %v240_v36 = vld [vmem:[%s1004_s26 + $0xe0] sm:$0xff] }
  0x19   : > { %882 = vmatprep.mubr.bf16.mxu0 %v348_v26  ;;  %v257_v55 = vmul.f32 %v1012_v4, %v221_v40  ;;  %v266_v56 = vmul.f32 %v1012_v4, %v230_v42  ;;  %v322_v58 = vmax.f32 %v1058_v39, 0.0  ;;  %v267_v61 = vmul.f32 %v1012_v4, %v231_v44  ;;  %v241_v37 = vld [vmem:[%s1004_s26 + $0xe8] sm:$0xff] }
  0x1a   : > { %v301_v59 = vadd.f32 %v1017_v5, %v265_v47  ;;  %v332_v60 = vmax.f32 %v300_v48, 0.0  ;;  %v268_v63 = vmul.f32 %v1012_v4, %v232_v49  ;;  %v269_v0 = vmul.f32 %v1012_v4, %v233_v50 }
  0x1b   : > { %877 = vmatpush3.bf16.msra.mxu0 %v943_v25  ;;  %927 = vmatpush3.bf16.msra.mxu1 %v943_v25  ;;  %v302_v62 = vadd.f32 %v1017_v5, %v266_v56  ;;  %v270_v1 = vmul.f32 %v1012_v4, %v234_v51  ;;  %v1090_v3 = vadd.f32 %v1017_v5, %v256_v46  ;;  %v323_v27 = vmax.f32 %v1064_v43, 0.0  ;;  %v226_v56 = vld [vmem:[%s1004_s26 + $0x70] sm:$0xff] }
  0x1c   : > { %878 = vmatprep.subr.bf16.mxu0 %v944_v33  ;;  %920 = vmatprep.subr.bf16.mxu1 %v944_v33  ;;  %v333_v6 = vmax.f32 %v301_v59, 0.0  ;;  %v303_v7 = vadd.f32 %v1017_v5, %v267_v61  ;;  %v271_v8 = vmul.f32 %v1012_v4, %v235_v57  ;;  %v293_v10 = vadd.f32 %v1017_v5, %v257_v55  ;;  %v227_v57 = vld [vmem:[%s1004_s26 + $0x78] sm:$0xff] }
  0x1d   : > { %v334_v11 = vmax.f32 %v302_v62, 0.0  ;;  %v304_v12 = vadd.f32 %v1017_v5, %v268_v63  ;;  %v305_v13 = vadd.f32 %v1017_v5, %v269_v0  ;;  %v306_v18 = vadd.f32 %v1017_v5, %v270_v1  ;;  %v242_v0 = vld [vmem:[%s1004_s26 + $0xf0] sm:$0xff]  ;;  %v243_v1 = vld [vmem:[%s1004_s26 + $0xf8] sm:$0xff] }
  0x1e   : > { %v356_v16 = vpack.c.bf16 %v333_v6, %v332_v60  ;;  %v335_v17 = vmax.f32 %v303_v7, 0.0  ;;  %v272_v19 = vmul.f32 %v1012_v4, %v236_v2  ;;  %v307_v24 = vadd.f32 %v1017_v5, %v271_v8 }
  0x1f   : > { %879 = vmatpush3.bf16.msra.mxu0 %v944_v33  ;;  %928 = vmatpush3.bf16.msra.mxu1 %v944_v33  ;;  %v336_v22 = vmax.f32 %v304_v12, 0.0  ;;  %v337_v23 = vmax.f32 %v305_v13, 0.0  ;;  %v273_v25 = vmul.f32 %v1012_v4, %v237_v9  ;;  %v350_v26 = vpack.c.bf16 %v321_v54, %v320_v45 }
  0x20   : > { %880 = vmatprep.subr.bf16.mxu0 %v945_v52  ;;  %921 = vmatprep.subr.bf16.mxu1 %v945_v52  ;;  %v357_v28 = vpack.c.bf16 %v335_v17, %v334_v11  ;;  %v308_v29 = vadd.f32 %v1017_v5, %v272_v19  ;;  %v258_v32 = vmul.f32 %v1012_v4, %v222_v14  ;;  %v324_v38 = vmax.f32 %v1090_v3, 0.0 }
  0x21   : > { %v259_v33 = vmul.f32 %v1012_v4, %v223_v15  ;;  %898 = vmatprep.mubr.bf16.mxu1 %v356_v16  ;;  %v358_v34 = vpack.c.bf16 %v337_v23, %v336_v22  ;;  %v309_v35 = vadd.f32 %v1017_v5, %v273_v25  ;;  %v325_v40 = vmax.f32 %v293_v10, 0.0 }
  0x22   : > { %v260_v41 = vmul.f32 %v1012_v4, %v224_v20  ;;  %v261_v42 = vmul.f32 %v1012_v4, %v225_v21  ;;  %v338_v43 = vmax.f32 %v306_v18, 0.0  ;;  %v339_v44 = vmax.f32 %v307_v24, 0.0 }
  0x23   : > { %881 = vmatpush3.bf16.msra.mxu0 %v945_v52  ;;  %929 = vmatpush3.bf16.msra.mxu1 %v945_v52  ;;  %v274_v45 = vmul.f32 %v1012_v4, %v238_v30  ;;  %v275_v46 = vmul.f32 %v1012_v4, %v239_v31  ;;  %v340_v47 = vmax.f32 %v308_v29, 0.0  ;;  %v341_v48 = vmax.f32 %v309_v35, 0.0 }
  0x24   : > { %v276_v49 = vmul.f32 %v1012_v4, %v240_v36  ;;  %v277_v50 = vmul.f32 %v1012_v4, %v241_v37  ;;  %v351_v51 = vpack.c.bf16 %v323_v27, %v322_v58  ;;  %v294_v52 = vadd.f32 %v1017_v5, %v258_v32 }
  0x25   : > { %v296_v54 = vadd.f32 %v1017_v5, %v260_v41  ;;  %v297_v55 = vadd.f32 %v1017_v5, %v261_v42  ;;  %v359_v59 = vpack.c.bf16 %v339_v44, %v338_v43  ;;  %v310_v60 = vadd.f32 %v1017_v5, %v274_v45 }
  0x26   : > { %883 = vmatmul.mubr.bf16.vlgmr.msra.gmra.mrb[0].mxu0 %v349_v53  ;;  %899 = vmatmul.mubr.bf16.vlgmr.msra.gmra.mrb[0].mxu1 %v357_v28  ;;  %v295_v53 = vadd.f32 %v1017_v5, %v259_v33  ;;  %v311_v61 = vadd.f32 %v1017_v5, %v275_v46  ;;  %v352_v62 = vpack.c.bf16 %v325_v40, %v324_v38  ;;  %v326_v2 = vmax.f32 %v294_v52, 0.0 }
  0x27   : > { %886 = vmatprep.mubr.bf16.mxu0 %v350_v26  ;;  %902 = vmatprep.mubr.bf16.mxu1 %v358_v34  ;;  %v360_v63 = vpack.c.bf16 %v341_v48, %v340_v47  ;;  %v312_v39 = vadd.f32 %v1017_v5, %v276_v49  ;;  %v313_v58 = vadd.f32 %v1017_v5, %v277_v50  ;;  %v342_v8 = vmax.f32 %v310_v60, 0.0 }
  0x28   : > { %v327_v3 = vmax.f32 %v295_v53, 0.0  ;;  %v262_v6 = vmul.f32 %v1012_v4, %v226_v56  ;;  %v263_v7 = vmul.f32 %v1012_v4, %v227_v57  ;;  %v343_v9 = vmax.f32 %v311_v61, 0.0 }
  0x29   : > { %v278_v10 = vmul.f32 %v1012_v4, %v242_v0  ;;  %v279_v11 = vmul.f32 %v1012_v4, %v243_v1  ;;  %v328_v12 = vmax.f32 %v296_v54, 0.0  ;;  %v329_v13 = vmax.f32 %v297_v55, 0.0 }
  0x2a   : > { %v344_v14 = vmax.f32 %v312_v39, 0.0  ;;  %v345_v15 = vmax.f32 %v313_v58, 0.0  ;;  %v298_v16 = vadd.f32 %v1017_v5, %v262_v6  ;;  %v299_v17 = vadd.f32 %v1017_v5, %v263_v7 }
  0x2b   : > { %v353_v18 = vpack.c.bf16 %v327_v3, %v326_v2  ;;  %v361_v19 = vpack.c.bf16 %v343_v9, %v342_v8  ;;  %v314_v20 = vadd.f32 %v1017_v5, %v278_v10  ;;  %v315_v21 = vadd.f32 %v1017_v5, %v279_v11 }
  0x2c   : > { %v354_v22 = vpack.c.bf16 %v329_v13, %v328_v12  ;;  %v362_v23 = vpack.c.bf16 %v345_v15, %v344_v14  ;;  %v330_v4 = vmax.f32 %v298_v16, 0.0  ;;  %v331_v24 = vmax.f32 %v299_v17, 0.0 }
  0x2d   : > { %v346_v25 = vmax.f32 %v314_v20, 0.0  ;;  %v347_v26 = vmax.f32 %v315_v21, 0.0 }
  0x2e   : > { %887 = vmatmul.mubr.bf16.gmra.mrb[4].mxu0 %v351_v51  ;;  %903 = vmatmul.mubr.bf16.gmra.mrb[4].mxu1 %v359_v59  ;;  %v355_v27 = vpack.c.bf16 %v331_v24, %v330_v4 }
  0x2f   : > { %890 = vmatprep.mubr.bf16.mxu0 %v352_v62  ;;  %906 = vmatprep.mubr.bf16.mxu1 %v360_v63  ;;  %v363_v28 = vpack.c.bf16 %v347_v26, %v346_v25 }
  0x36   : > { %891 = vmatmul.mubr.bf16.gmra.mrb[8].mxu0 %v353_v18  ;;  %907 = vmatmul.mubr.bf16.gmra.mrb[8].mxu1 %v361_v19 }
  0x37   : > { %894 = vmatprep.mubr.bf16.mxu0 %v354_v22  ;;  %910 = vmatprep.mubr.bf16.mxu1 %v362_v23 }
  0x3e   : > { %895 = vmatmul.mubr.bf16.gmra.mrb[12].mxu0 %v355_v27  ;;  %911 = vmatmul.mubr.bf16.gmra.mrb[12].mxu1 %v363_v28 }
  0xf9   : > { %v884_v5 = vpop.f32.mrb[0].mxu0  ;;  %v1151_v29 = vpop.f32.mrb[0].mxu1 }
  0xfa   : > { %591 = vst [vmem:[%s1149_s19 + $0x10] sm:$0xff] %v884_v5  ;;  %v462_v30 = vpop.f32.mrb[1].mxu0  ;;  %607 = vst [vmem:[%s1149_s19 + $0x90] sm:$0xff] %v1151_v29  ;;  %v1156_v31 = vpop.f32.mrb[1].mxu1  ;;  %v660_v40 = vmul.f32 %v884_v5, %v884_v5 }
  0xfb   : > { %589 = vst [vmem:[%s1149_s19] sm:$0xff] %v462_v30  ;;  %v885_v32 = vpop.f32.mrb[2].mxu0  ;;  %605 = vst [vmem:[%s1149_s19 + $0x80] sm:$0xff] %v1156_v31  ;;  %v1161_v33 = vpop.f32.mrb[2].mxu1  ;;  %v658_v36 = vmul.f32 %v462_v30, %v462_v30 }
  0xfc   : > { %592 = vst [vmem:[%s1149_s19 + $0x18] sm:$0xff] %v885_v32  ;;  %v465_v34 = vpop.f32.mrb[3].mxu0  ;;  %608 = vst [vmem:[%s1149_s19 + $0x98] sm:$0xff] %v1161_v33  ;;  %v1166_v35 = vpop.f32.mrb[3].mxu1  ;;  %v661_v43 = vmul.f32 %v885_v32, %v885_v32 }
  0xfd   : > { %590 = vst [vmem:[%s1149_s19 + $0x8] sm:$0xff] %v465_v34  ;;  %v621_v37 = vadd.f32 %v465_v34, %v462_v30  ;;  %v659_v38 = vmul.f32 %v465_v34, %v465_v34  ;;  %606 = vst [vmem:[%s1149_s19 + $0x88] sm:$0xff] %v1166_v35 }
  0xff   : > { %v622_v41 = vadd.f32 %v884_v5, %v621_v37  ;;  %v690_v42 = vadd.f32 %v659_v38, %v658_v36 }
 0x101   : > { %v691_v44 = vadd.f32 %v690_v42, %v660_v40  ;;  %v888_v45 = vpop.f32.mrb[4].mxu0  ;;  %v623_v46 = vadd.f32 %v885_v32, %v622_v41  ;;  %v1171_v47 = vpop.f32.mrb[4].mxu1 }
 0x102   : > { %595 = vst [vmem:[%s1149_s19 + $0x30] sm:$0xff] %v888_v45  ;;  %v478_v48 = vpop.f32.mrb[5].mxu0  ;;  %611 = vst [vmem:[%s1149_s19 + $0xb0] sm:$0xff] %v1171_v47  ;;  %v1176_v49 = vpop.f32.mrb[5].mxu1  ;;  %v664_v61 = vmul.f32 %v888_v45, %v888_v45 }
 0x103   : > { %593 = vst [vmem:[%s1149_s19 + $0x20] sm:$0xff] %v478_v48  ;;  %v624_v50 = vadd.f32 %v623_v46, %v478_v48  ;;  %v662_v51 = vmul.f32 %v478_v48, %v478_v48  ;;  %v692_v52 = vadd.f32 %v691_v44, %v661_v43  ;;  %v889_v53 = vpop.f32.mrb[6].mxu0  ;;  %609 = vst [vmem:[%s1149_s19 + $0xa0] sm:$0xff] %v1176_v49  ;;  %v1181_v54 = vpop.f32.mrb[6].mxu1 }
 0x104   : > { %596 = vst [vmem:[%s1149_s19 + $0x38] sm:$0xff] %v889_v53  ;;  %v481_v55 = vpop.f32.mrb[7].mxu0  ;;  %612 = vst [vmem:[%s1149_s19 + $0xb8] sm:$0xff] %v1181_v54  ;;  %v1186_v56 = vpop.f32.mrb[7].mxu1  ;;  %v665_v39 = vmul.f32 %v889_v53, %v889_v53  ;;  %v674_v46 = vmul.f32 %v1156_v31, %v1156_v31 }
 0x105   : > { %v693_v57 = vadd.f32 %v692_v52, %v662_v51  ;;  %594 = vst [vmem:[%s1149_s19 + $0x28] sm:$0xff] %v481_v55  ;;  %v625_v59 = vadd.f32 %v624_v50, %v481_v55  ;;  %v663_v60 = vmul.f32 %v481_v55, %v481_v55  ;;  %610 = vst [vmem:[%s1149_s19 + $0xa8] sm:$0xff] %v1186_v56 }
 0x106   : > { %v676_v55 = vmul.f32 %v1151_v29, %v1151_v29 }
 0x107   : > { %v626_v62 = vadd.f32 %v888_v45, %v625_v59  ;;  %v694_v63 = vadd.f32 %v693_v57, %v663_v60  ;;  %v677_v60 = vmul.f32 %v1161_v33, %v1161_v33 }
 0x109   : > { %v695_v58 = vadd.f32 %v694_v63, %v664_v61  ;;  %v892_v0 = vpop.f32.mrb[8].mxu0  ;;  %v627_v1 = vadd.f32 %v889_v53, %v626_v62  ;;  %v1191_v2 = vpop.f32.mrb[8].mxu1  ;;  %v675_v53 = vmul.f32 %v1166_v35, %v1166_v35 }
 0x10a   : > { %599 = vst [vmem:[%s1149_s19 + $0x50] sm:$0xff] %v892_v0  ;;  %v494_v3 = vpop.f32.mrb[9].mxu0  ;;  %615 = vst [vmem:[%s1149_s19 + $0xd0] sm:$0xff] %v1191_v2  ;;  %v1196_v6 = vpop.f32.mrb[9].mxu1  ;;  %v668_v17 = vmul.f32 %v892_v0, %v892_v0 }
 0x10b   : > { %597 = vst [vmem:[%s1149_s19 + $0x40] sm:$0xff] %v494_v3  ;;  %v628_v7 = vadd.f32 %v627_v1, %v494_v3  ;;  %v666_v8 = vmul.f32 %v494_v3, %v494_v3  ;;  %v696_v9 = vadd.f32 %v695_v58, %v665_v39  ;;  %v893_v10 = vpop.f32.mrb[10].mxu0  ;;  %613 = vst [vmem:[%s1149_s19 + $0xc0] sm:$0xff] %v1196_v6  ;;  %v1201_v11 = vpop.f32.mrb[10].mxu1 }
 0x10c   : > { %600 = vst [vmem:[%s1149_s19 + $0x58] sm:$0xff] %v893_v10  ;;  %v497_v12 = vpop.f32.mrb[11].mxu0  ;;  %616 = vst [vmem:[%s1149_s19 + $0xd8] sm:$0xff] %v1201_v11  ;;  %v1206_v13 = vpop.f32.mrb[11].mxu1  ;;  %v669_v20 = vmul.f32 %v893_v10, %v893_v10 }
 0x10d   : > { %v697_v14 = vadd.f32 %v696_v9, %v666_v8  ;;  %598 = vst [vmem:[%s1149_s19 + $0x48] sm:$0xff] %v497_v12  ;;  %v629_v15 = vadd.f32 %v628_v7, %v497_v12  ;;  %v667_v16 = vmul.f32 %v497_v12, %v497_v12  ;;  %614 = vst [vmem:[%s1149_s19 + $0xc8] sm:$0xff] %v1206_v13 }
 0x10f   : > { %v630_v18 = vadd.f32 %v892_v0, %v629_v15  ;;  %v698_v19 = vadd.f32 %v697_v14, %v667_v16  ;;  %v679_v0 = vmul.f32 %v1186_v56, %v1186_v56  ;;  %v683_v14 = vmul.f32 %v1206_v13, %v1206_v13 }
 0x111   : > { %v699_v21 = vadd.f32 %v698_v19, %v668_v17  ;;  %v896_v22 = vpop.f32.mrb[12].mxu0  ;;  %v631_v23 = vadd.f32 %v893_v10, %v630_v18  ;;  %v1211_v4 = vpop.f32.mrb[12].mxu1 }
 0x112   : > { %603 = vst [vmem:[%s1149_s19 + $0x70] sm:$0xff] %v896_v22  ;;  %v510_v24 = vpop.f32.mrb[13].mxu0  ;;  %619 = vst [vmem:[%s1149_s19 + $0xf0] sm:$0xff] %v1211_v4  ;;  %v574_v25 = vpop.f32.mrb[13].mxu1  ;;  %v672_v40 = vmul.f32 %v896_v22, %v896_v22 }
 0x113   : > { %601 = vst [vmem:[%s1149_s19 + $0x60] sm:$0xff] %v510_v24  ;;  %v632_v26 = vadd.f32 %v631_v23, %v510_v24  ;;  %v670_v27 = vmul.f32 %v510_v24, %v510_v24  ;;  %v700_v28 = vadd.f32 %v699_v21, %v669_v20  ;;  %v897_v5 = vpop.f32.mrb[14].mxu0  ;;  %617 = vst [vmem:[%s1149_s19 + $0xe0] sm:$0xff] %v574_v25  ;;  %v913_v30 = vpop.f32.mrb[14].mxu1 }
 0x114   : > { %604 = vst [vmem:[%s1149_s19 + $0x78] sm:$0xff] %v897_v5  ;;  %v513_v32 = vpop.f32.mrb[15].mxu0  ;;  %620 = vst [vmem:[%s1149_s19 + $0xf8] sm:$0xff] %v913_v30  ;;  %v577_v34 = vpop.f32.mrb[15].mxu1  ;;  %v673_v43 = vmul.f32 %v897_v5, %v897_v5 }
 0x115   : > { %v701_v36 = vadd.f32 %v700_v28, %v670_v27  ;;  %602 = vst [vmem:[%s1149_s19 + $0x68] sm:$0xff] %v513_v32  ;;  %v633_v37 = vadd.f32 %v632_v26, %v513_v32  ;;  %v671_v38 = vmul.f32 %v513_v32, %v513_v32  ;;  %618 = vst [vmem:[%s1149_s19 + $0xe8] sm:$0xff] %v577_v34 }
 0x116   : > { %v687_v23 = vmul.f32 %v577_v34, %v577_v34  ;;  %v689_v26 = vmul.f32 %v913_v30, %v913_v30 }
 0x117   : > { %v634_v41 = vadd.f32 %v896_v22, %v633_v37  ;;  %v702_v42 = vadd.f32 %v701_v36, %v671_v38 }
 0x119   : > { %v703_v44 = vadd.f32 %v702_v42, %v672_v40  ;;  %v635_v45 = vadd.f32 %v897_v5, %v634_v41 }
 0x11b   : > { %v636_v48 = vadd.f32 %v635_v45, %v1156_v31  ;;  %v704_v50 = vadd.f32 %v703_v44, %v673_v43  ;;  %v678_v31 = vmul.f32 %v1176_v49, %v1176_v49 }
 0x11d   : > { %v705_v51 = vadd.f32 %v704_v50, %v674_v46  ;;  %v637_v52 = vadd.f32 %v636_v48, %v1166_v35 }
 0x11f   : > { %v638_v57 = vadd.f32 %v1151_v29, %v637_v52  ;;  %v706_v59 = vadd.f32 %v705_v51, %v675_v53  ;;  %v680_v29 = vmul.f32 %v1171_v47, %v1171_v47 }
 0x121   : > { %v707_v61 = vadd.f32 %v706_v59, %v676_v55  ;;  %v639_v62 = vadd.f32 %v1161_v33, %v638_v57  ;;  %v681_v33 = vmul.f32 %v1181_v54, %v1181_v54 }
 0x123   : > { %v640_v63 = vadd.f32 %v639_v62, %v1176_v49  ;;  %v708_v39 = vadd.f32 %v707_v61, %v677_v60  ;;  %v682_v49 = vmul.f32 %v1196_v6, %v1196_v6 }
 0x125   : > { %v709_v58 = vadd.f32 %v708_v39, %v678_v31  ;;  %v641_v35 = vadd.f32 %v640_v63, %v1186_v56 }
 0x127   : > { %v642_v1 = vadd.f32 %v1171_v47, %v641_v35  ;;  %v710_v3 = vadd.f32 %v709_v58, %v679_v0  ;;  %v684_v47 = vmul.f32 %v1191_v2, %v1191_v2 }
 0x129   : > { %v711_v7 = vadd.f32 %v710_v3, %v680_v29  ;;  %v643_v8 = vadd.f32 %v1181_v54, %v642_v1  ;;  %v685_v54 = vmul.f32 %v1201_v11, %v1201_v11 }
 0x12b   : > { %v644_v9 = vadd.f32 %v643_v8, %v1196_v6  ;;  %v712_v10 = vadd.f32 %v711_v7, %v681_v33  ;;  %v686_v6 = vmul.f32 %v574_v25, %v574_v25 }
 0x12d   : > { %v713_v12 = vadd.f32 %v712_v10, %v682_v49  ;;  %v645_v56 = vadd.f32 %v644_v9, %v1206_v13  ;;  %v688_v13 = vmul.f32 %v1211_v4, %v1211_v4 }
 0x12f   : > { %v646_v15 = vadd.f32 %v1191_v2, %v645_v56  ;;  %v714_v16 = vadd.f32 %v713_v12, %v683_v14 }
 0x131   : > { %v715_v17 = vadd.f32 %v714_v16, %v684_v47  ;;  %v647_v18 = vadd.f32 %v1201_v11, %v646_v15 }
 0x133   : > { %v648_v19 = vadd.f32 %v647_v18, %v574_v25  ;;  %v716_v20 = vadd.f32 %v715_v17, %v685_v54 }
 0x135   : > { %v717_v21 = vadd.f32 %v716_v20, %v686_v6  ;;  %v649_v22 = vadd.f32 %v648_v19, %v577_v34 }
 0x137   : > { %v650_v24 = vadd.f32 %v1211_v4, %v649_v22  ;;  %v718_v2 = vadd.f32 %v717_v21, %v687_v23 }
 0x139   : > { %v651_v27 = vadd.f32 %v913_v30, %v650_v24  ;;  %v719_v28 = vadd.f32 %v718_v2, %v688_v13 }
 0x13b   : > { %v652_v5 = vrot.slane %v651_v27, 4  ;;  %v720_v32 = vadd.f32 %v719_v28, %v689_v26 }
 0x13d   : > { %v653_v36 = vadd.f32 %v652_v5, %v651_v27  ;;  %v721_v11 = vrot.slane %v720_v32, 4 }
 0x13f   : > { %v654_v37 = vrot.slane %v653_v36, 2  ;;  %v722_v25 = vadd.f32 %v721_v11, %v720_v32 }
 0x141   : > { %v655_v38 = vadd.f32 %v654_v37, %v653_v36  ;;  %v723_v40 = vrot.slane %v722_v25, 2 }
 0x143   : > { %v656_v41 = vrot.slane %v655_v38, 1  ;;  %v724_v34 = vadd.f32 %v723_v40, %v722_v25 }
 0x145   : > { %v725_v42 = vrot.slane %v724_v34, 1  ;;  %v657_v43 = vadd.f32 %v656_v41, %v655_v38 }
 0x147   : > { %v726_v44 = vadd.f32 %v725_v42, %v724_v34 }
 0x149   : > { %v728_v4 = vsel %vm727_vm0, %v657_v43, %v726_v44 }
 0x14a   : > { %v730_v30 = vsel %vm729_vm1, %v728_v4, 0.0 }
 0x14b   : > { %731 = vst [vmem:[%s208_s23] sm:$0xff] %v730_v30 }
 0x14c PF: > { %s15_s15 = sadd.s32 1, %s952_s15  }
 0x14d   : > { %p12_p4 = scmp.ge.s32.totalorder %s15_s15, 4  }
 0x14f   :  { %14 = sbr.rel (!%p12_p4) target bundleno = 1 (0x1), region = 74 }

// kernel: bottleneck_pallas.5
= control target key start
LH: loop header
LB: loop body
LE: loop exit
PB: predicated region body
PF: predicated region fallthrough
CT: control target
= control target key end

     0   :  { %s3204_s15 = smov 0   ;;  %s4239_s0 = inlined_call_operand.vmem [shape: f32[2,16,16,128], index: 0, kind: input, shape index: {}]   ;;  %s4240_s1 = inlined_call_operand.vmem [shape: f32[8,128], index: 1, kind: input, shape index: {}]   ;;  %s4241_s2 = inlined_call_operand.vmem [shape: bf16[1152,128], index: 2, kind: input, shape index: {}]   ;;  %s4242_s3 = inlined_call_operand.vmem [shape: f32[2,16,16,128], index: 3, kind: output, shape index: {0}]   ;;  %s4243_s4 = inlined_call_operand.vmem [shape: f32[2,8,128], index: 4, kind: output, shape index: {1}]  }
   0x1 LB: > { %s2463_s16 = sadd.s32 4294967295, %s3175_s15   ;;  %p2467_p0 = scmp.ge.s32.totalorder %s3175_s15, 1  ;;  %s3175_s15 = sphi %s3204_s15, %s15_s15  }
   0x2   : > { %p165_p1 = scmp.lt.s32.totalorder %s3175_s15, 3 }
   0x4   : > { %p166_p2 = pnand %p2467_p0, %p165_p1 }
   0x5   : > { %v3096_v0 = vld [vmem:[%s4241_s2 + $0x40] sm:$0xff] (!%p166_p2)   ;;  %v3177_v2 = vmov (!%p166_p2), 0.0   ;;  %v3098_v3 = vld [vmem:[%s4241_s2 + $0x48] sm:$0xff] (!%p166_p2)   ;;  %p195_p3 = scmp.lt.s32.totalorder (!%p166_p2), %s2463_s16, 1  ;;  %v3100_v5 = vld [vmem:[%s4241_s2 + $0x50] sm:$0xff] (!%p166_p2)   ;;  %v3178_v63 = vmov (!%p166_p2), 0.0|0.0  }
   0x6   : > { %169 = sbr.rel (%p166_p2) target bundleno = 559 (0x22f), region = 32  ;;  %v3097_v1 = vld [vmem:[%s4241_s2] sm:$0xff] (!%p166_p2)   ;;  %348 = vst [vmem:[#allocation2] sm:$0xff] (!%p166_p2), %v3177_v2  ;;  %349 = vst [vmem:[#allocation2 + $0x8] sm:$0xff] (!%p166_p2), %v3177_v2  ;;  %2551 = vmatprep.subr.bf16.mxu0 (!%p166_p2), %v3096_v0  ;;  %3071 = vmatprep.subr.bf16.mxu1 (!%p166_p2), %v3096_v0  ;;  %v3099_v4 = vld [vmem:[%s4241_s2 + $0x8] sm:$0xff] (!%p166_p2)   ;;  %vm2372_vm0 = vcmask (!%p166_p2), 1040384  }
   0x7   : > { %350 = vst [vmem:[#allocation2 + $0x10] sm:$0x3] (!%p166_p2), %v3177_v2  ;;  %352 = vst [vmem:[#allocation2 + $0x198] sm:$0xff] (!%p166_p2), %v3177_v2  ;;  %2552 = vmatpush3.bf16.msra.mxu0 (!%p166_p2), %v3097_v1  ;;  %3079 = vmatpush3.bf16.msra.mxu1 (!%p166_p2), %v3097_v1  ;;  %v3101_v6 = vld [vmem:[%s4241_s2 + $0x10] sm:$0xff] (!%p166_p2)   ;;  %v3102_v7 = vld [vmem:[%s4241_s2 + $0x58] sm:$0xff] (!%p166_p2)   ;;  %vm2374_vm1 = vcmask (!%p166_p2), 1041408  }
   0x8   : > { %353 = vst [vmem:[#allocation2 + $0x1a0] sm:$0xff] (!%p166_p2), %v3177_v2  ;;  %354 = vst [vmem:[#allocation2 + $0x1a8] sm:$0x3] (!%p166_p2), %v3177_v2  ;;  %2553 = vmatprep.subr.bf16.mxu0 (!%p166_p2), %v3098_v3  ;;  %3072 = vmatprep.subr.bf16.mxu1 (!%p166_p2), %v3098_v3  ;;  %v3103_v8 = vld [vmem:[%s4241_s2 + $0x18] sm:$0xff] (!%p166_p2)   ;;  %v3104_v9 = vld [vmem:[%s4241_s2 + $0x60] sm:$0xff] (!%p166_p2)  }
   0x9   : > { %356 = vst [vmem:[#allocation2 + $0x18] sm:$0x1] (!%p166_p2), %v3177_v2  ;;  %357 = vst [vmem:[#allocation2 + $0x30] sm:$0x1] (!%p166_p2), %v3177_v2  ;;  %v3105_v10 = vld [vmem:[%s4241_s2 + $0x20] sm:$0xff] (!%p166_p2)   ;;  %v3106_v11 = vld [vmem:[%s4241_s2 + $0x68] sm:$0xff] (!%p166_p2)  }
   0xa   : > { %358 = vst [vmem:[#allocation2 + $0x48] sm:$0x1] (!%p166_p2), %v3177_v2  ;;  %359 = vst [vmem:[#allocation2 + $0x60] sm:$0x1] (!%p166_p2), %v3177_v2  ;;  %v3262_v14 = vld [vmem:[%s4240_s1] ss:$0 sm:$0xff] (!%p166_p2) }
   0xb   : > { %360 = vst [vmem:[#allocation2 + $0x78] sm:$0x1] (!%p166_p2), %v3177_v2  ;;  %361 = vst [vmem:[#allocation2 + $0x90] sm:$0x1] (!%p166_p2), %v3177_v2  ;;  %2554 = vmatpush3.bf16.msra.mxu0 (!%p166_p2), %v3099_v4  ;;  %3080 = vmatpush3.bf16.msra.mxu1 (!%p166_p2), %v3099_v4  ;;  %v3267_v16 = vld [vmem:[%s4240_s1 + $0x1] ss:$0 sm:$0xff] (!%p166_p2) }
   0xc   : > { %362 = vst [vmem:[#allocation2 + $0xa8] sm:$0x1] (!%p166_p2), %v3177_v2  ;;  %363 = vst [vmem:[#allocation2 + $0xc0] sm:$0x1] (!%p166_p2), %v3177_v2  ;;  %2555 = vmatprep.subr.bf16.mxu0 (!%p166_p2), %v3100_v5  ;;  %3073 = vmatprep.subr.bf16.mxu1 (!%p166_p2), %v3100_v5  ;;  %v3107_v21 = vld [vmem:[%s4241_s2 + $0x28] sm:$0xff] (!%p166_p2)   ;;  %v3108_v22 = vld [vmem:[%s4241_s2 + $0x70] sm:$0xff] (!%p166_p2)  }
   0xd   : > { %364 = vst [vmem:[#allocation2 + $0xd8] sm:$0x1] %v3177_v2  ;;  %365 = vst [vmem:[#allocation2 + $0xf0] sm:$0x1] %v3177_v2  ;;  %s4245_s16 = smov (!%p195_p3, %s2463_s16), 1  ;;  %v452_v12 = vld [vmem:[#allocation2 + $0x1] sm:$0xff] }
   0xe   : > { %366 = vst [vmem:[#allocation2 + $0x108] sm:$0x1] %v3177_v2  ;;  %367 = vst [vmem:[#allocation2 + $0x120] sm:$0x1] %v3177_v2  ;;  %s2549_s7 = sshll.u32 %s4245_s16, 8  ;;  %v453_v13 = vld [vmem:[#allocation2 + $0x9] sm:$0xff] }
   0xf   : > { %368 = vst [vmem:[#allocation2 + $0x138] sm:$0x1] %v3177_v2  ;;  %369 = vst [vmem:[#allocation2 + $0x150] sm:$0x1] %v3177_v2  ;;  %2556 = vmatpush3.bf16.msra.mxu0 %v3101_v6  ;;  %3081 = vmatpush3.bf16.msra.mxu1 %v3101_v6  ;;  %s3254_s14 = scalar_lea.vmem %s4239_s0, %s2549_s7  ;;  %v710_v15 = vpack.c.bf16 %v453_v13, %v452_v12  ;;  %v3109_v27 = vld [vmem:[%s4241_s2 + $0x30] sm:$0xff]   ;;  %v3110_v28 = vld [vmem:[%s4241_s2 + $0x78] sm:$0xff]   ;;  %s4148_s11 = scalar_lea.vmem %s4242_s3, %s2549_s7 }
  0x10   : > { %370 = vst [vmem:[#allocation2 + $0x168] sm:$0x1] %v3177_v2  ;;  %371 = vst [vmem:[#allocation2 + $0x180] sm:$0x1] %v3177_v2  ;;  %2557 = vmatprep.subr.bf16.mxu0 %v3102_v7  ;;  %3074 = vmatprep.subr.bf16.mxu1 %v3102_v7  ;;  %v234_v17 = vld [vmem:[%s3254_s14 + $0xb0] sm:$0xff]  ;;  %v235_v18 = vld [vmem:[%s3254_s14 + $0xb8] sm:$0xff] }
  0x11   : > { %372 = vst [vmem:[#allocation2 + $0x29] sm:$0x1] %v3177_v2  ;;  %373 = vst [vmem:[#allocation2 + $0x41] sm:$0x1] %v3177_v2  ;;  %v270_v19 = vmul.f32 %v3262_v14, %v234_v17  ;;  %v271_v20 = vmul.f32 %v3262_v14, %v235_v18  ;;  %1461 = vmatprep.mubr.bf16.mxu0 %v710_v15  ;;  %v212_v30 = vld [vmem:[%s3254_s14] sm:$0xff]  ;;  %v213_v31 = vld [vmem:[%s3254_s14 + $0x8] sm:$0xff] }
  0x12   : > { %374 = vst [vmem:[#allocation2 + $0x59] sm:$0x1] %v3177_v2  ;;  %375 = vst [vmem:[#allocation2 + $0x71] sm:$0x1] %v3177_v2  ;;  %v248_v32 = vmul.f32 %v3262_v14, %v212_v30  ;;  %v249_v33 = vmul.f32 %v3262_v14, %v213_v31  ;;  %v236_v34 = vld [vmem:[%s3254_s14 + $0xc0] sm:$0xff]  ;;  %v237_v35 = vld [vmem:[%s3254_s14 + $0xc8] sm:$0xff] }
  0x13   : > { %376 = vst [vmem:[#allocation2 + $0x89] sm:$0x1] %v3177_v2  ;;  %377 = vst [vmem:[#allocation2 + $0xa1] sm:$0x1] %v3177_v2  ;;  %2558 = vmatpush3.bf16.msra.mxu0 %v3103_v8  ;;  %3082 = vmatpush3.bf16.msra.mxu1 %v3103_v8  ;;  %v306_v23 = vadd.f32 %v3267_v16, %v270_v19  ;;  %v307_v24 = vadd.f32 %v3267_v16, %v271_v20  ;;  %v3111_v36 = vld [vmem:[%s4241_s2 + $0x38] sm:$0xff]   ;;  %v3112_v39 = vld [vmem:[%s4241_s2 + $0xc0] sm:$0xff]  }
  0x14   : > { %378 = vst [vmem:[#allocation2 + $0xb9] sm:$0x1] %v3177_v2  ;;  %379 = vst [vmem:[#allocation2 + $0xd1] sm:$0x1] %v3177_v2  ;;  %2559 = vmatprep.subr.bf16.mxu0 %v3104_v9  ;;  %3075 = vmatprep.subr.bf16.mxu1 %v3104_v9  ;;  %v272_v37 = vmul.f32 %v3262_v14, %v236_v34  ;;  %v273_v38 = vmul.f32 %v3262_v14, %v237_v35  ;;  %v3113_v42 = vld [vmem:[%s4241_s2 + $0x140] sm:$0xff]   ;;  %v3116_v49 = vld [vmem:[%s4241_s2 + $0xc8] sm:$0xff]  }
  0x15   : > { %380 = vst [vmem:[#allocation2 + $0xe9] sm:$0x1] %v3177_v2  ;;  %381 = vst [vmem:[#allocation2 + $0x101] sm:$0x1] %v3177_v2  ;;  %v338_v25 = vmax.f32 %v306_v23, 0.0  ;;  %v339_v26 = vmax.f32 %v307_v24, 0.0  ;;  %v284_v40 = vadd.f32 %v3267_v16, %v248_v32  ;;  %v285_v41 = vadd.f32 %v3267_v16, %v249_v33 }
  0x16   : > { %382 = vst [vmem:[#allocation2 + $0x119] sm:$0x1] %v3177_v2  ;;  %383 = vst [vmem:[#allocation2 + $0x131] sm:$0x1] %v3177_v2  ;;  %v308_v43 = vadd.f32 %v3267_v16, %v272_v37  ;;  %v309_v44 = vadd.f32 %v3267_v16, %v273_v38  ;;  %v3114_v45 = vld [vmem:[%s4241_s2 + $0x80] sm:$0xff]   ;;  %v3121_v56 = vld [vmem:[%s4241_s2 + $0x148] sm:$0xff]  }
  0x17   : > { %384 = vst [vmem:[#allocation2 + $0x149] sm:$0x1] %v3177_v2  ;;  %385 = vst [vmem:[#allocation2 + $0x161] sm:$0x1] %v3177_v2  ;;  %2560 = vmatpush3.bf16.msra.mxu0 %v3105_v10  ;;  %3083 = vmatpush3.bf16.msra.mxu1 %v3105_v10  ;;  %v818_v29 = vpack.c.bf16 %v339_v26, %v338_v25  ;;  %v3115_v46 = vld [vmem:[%s4241_s2 + $0x100] sm:$0xff]   ;;  %v316_v47 = vmax.f32 %v284_v40, 0.0 }
  0x18   : > { %386 = vst [vmem:[#allocation2 + $0x179] sm:$0x1] %v3177_v2  ;;  %387 = vst [vmem:[#allocation2 + $0x191] sm:$0x1] %v3177_v2  ;;  %2561 = vmatprep.subr.bf16.mxu0 %v3106_v11  ;;  %3076 = vmatprep.subr.bf16.mxu1 %v3106_v11  ;;  %v317_v48 = vmax.f32 %v285_v41, 0.0  ;;  %v340_v50 = vmax.f32 %v308_v43, 0.0 }
  0x19   : > { %410 = vst [vmem:[#allocation2 + $0x121] sm:$0xff] %v338_v25  ;;  %411 = vst [vmem:[#allocation2 + $0x129] sm:$0xff] %v339_v26  ;;  %1557 = vmatprep.mubr.bf16.mxu1 %v818_v29  ;;  %v341_v51 = vmax.f32 %v309_v44, 0.0  ;;  %v214_v57 = vld [vmem:[%s3254_s14 + $0x10] sm:$0xff]  ;;  %v215_v59 = vld [vmem:[%s3254_s14 + $0x18] sm:$0xff]  ;;  %s2472_s7 = sshll.u32 %s4245_s16, 3 }
  0x1a   : > { %388 = vst [vmem:[#allocation2 + $0x19] sm:$0xff] %v316_v47  ;;  %389 = vst [vmem:[#allocation2 + $0x21] sm:$0xff] %v317_v48  ;;  %v3317_v55 = vpack.c.bf16 %v317_v48, %v316_v47  ;;  %v250_v60 = vmul.f32 %v3262_v14, %v214_v57  ;;  %v238_v61 = vld [vmem:[%s3254_s14 + $0xd0] sm:$0xff]  ;;  %v239_v62 = vld [vmem:[%s3254_s14 + $0xd8] sm:$0xff]  ;;  %v251_v1 = vmul.f32 %v3262_v14, %v215_v59  ;;  %s208_s17 = scalar_lea.vmem %s4243_s4, %s2472_s7 }
  0x1b   : > { %2562 = vmatpush3.bf16.msra.mxu0 %v3107_v21  ;;  %3084 = vmatpush3.bf16.msra.mxu1 %v3107_v21  ;;  %412 = vst [vmem:[#allocation2 + $0x139] sm:$0xff] %v340_v50  ;;  %413 = vst [vmem:[#allocation2 + $0x141] sm:$0xff] %v341_v51  ;;  %v827_v58 = vpack.c.bf16 %v341_v51, %v340_v50  ;;  %v3117_v0 = vld [vmem:[%s4241_s2 + $0x88] sm:$0xff]   ;;  %v274_v2 = vmul.f32 %v3262_v14, %v238_v61  ;;  %v3118_v6 = vld [vmem:[%s4241_s2 + $0xd0] sm:$0xff]  }
  0x1c   : > { %2563 = vmatprep.subr.bf16.mxu0 %v3108_v22  ;;  %3077 = vmatprep.subr.bf16.mxu1 %v3108_v22  ;;  %v275_v3 = vmul.f32 %v3262_v14, %v239_v62  ;;  %v3123_v4 = vld [vmem:[%s4241_s2 + $0x108] sm:$0xff]   ;;  %v286_v5 = vadd.f32 %v3267_v16, %v250_v60  ;;  %v287_v7 = vadd.f32 %v3267_v16, %v251_v1  ;;  %v3119_v10 = vld [vmem:[%s4241_s2 + $0x90] sm:$0xff]   ;;  %v3120_v15 = vld [vmem:[%s4241_s2 + $0xd8] sm:$0xff]  }
  0x1d   : > { %v310_v8 = vadd.f32 %v3267_v16, %v274_v2  ;;  %v216_v20 = vld [vmem:[%s3254_s14 + $0x20] sm:$0xff]  ;;  %v217_v24 = vld [vmem:[%s3254_s14 + $0x28] sm:$0xff]  ;;  %v3122_v32 = vld [vmem:[%s4241_s2 + $0x98] sm:$0xff]  }
  0x1e   : > { %v311_v9 = vadd.f32 %v3267_v16, %v275_v3  ;;  %v318_v11 = vmax.f32 %v286_v5, 0.0  ;;  %v319_v17 = vmax.f32 %v287_v7, 0.0  ;;  %v252_v25 = vmul.f32 %v3262_v14, %v216_v20  ;;  %v240_v30 = vld [vmem:[%s3254_s14 + $0xe0] sm:$0xff]  ;;  %v241_v31 = vld [vmem:[%s3254_s14 + $0xe8] sm:$0xff]  ;;  %v3129_v37 = vld [vmem:[%s4241_s2 + $0x150] sm:$0xff]  }
  0x1f   : > { %2564 = vmatpush3.bf16.msra.mxu0 %v3109_v27  ;;  %3085 = vmatpush3.bf16.msra.mxu1 %v3109_v27  ;;  %v342_v18 = vmax.f32 %v310_v8, 0.0  ;;  %v253_v29 = vmul.f32 %v3262_v14, %v217_v24  ;;  %v276_v34 = vmul.f32 %v3262_v14, %v240_v30  ;;  %v277_v35 = vmul.f32 %v3262_v14, %v241_v31  ;;  %v3124_v38 = vld [vmem:[%s4241_s2 + $0xe0] sm:$0xff]   ;;  %v3131_v43 = vld [vmem:[%s4241_s2 + $0x110] sm:$0xff]   ;;  %v3127_v61 = vld [vmem:[%s4241_s2 + $0xa8] sm:$0xff]  }
  0x20   : > { %2565 = vmatprep.subr.bf16.mxu0 %v3110_v28  ;;  %3078 = vmatprep.subr.bf16.mxu1 %v3110_v28  ;;  %v444_v52 = vld [vmem:[#allocation2 + $0x120] sm:$0xff]  ;;  %v445_v53 = vld [vmem:[#allocation2 + $0x128] sm:$0xff]  ;;  %v343_v19 = vmax.f32 %v311_v9, 0.0  ;;  %390 = vst [vmem:[#allocation2 + $0x31] sm:$0xff] %v318_v11  ;;  %391 = vst [vmem:[#allocation2 + $0x39] sm:$0xff] %v319_v17  ;;  %v3357_v27 = vpack.c.bf16 %v319_v17, %v318_v11  ;;  %v288_v33 = vadd.f32 %v3267_v16, %v252_v25 }
  0x21   : > { %v817_v54 = vpack.c.bf16 %v445_v53, %v444_v52  ;;  %v422_v12 = vld [vmem:[#allocation2 + $0x18] sm:$0xff]  ;;  %v423_v13 = vld [vmem:[#allocation2 + $0x20] sm:$0xff]  ;;  %414 = vst [vmem:[#allocation2 + $0x151] sm:$0xff] %v342_v18  ;;  %v312_v40 = vadd.f32 %v3267_v16, %v276_v34  ;;  %v313_v41 = vadd.f32 %v3267_v16, %v277_v35  ;;  %v218_v57 = vld [vmem:[%s3254_s14 + $0x30] sm:$0xff] }
  0x22   : > { %v3351_v21 = vpack.c.bf16 %v423_v13, %v422_v12  ;;  %v446_v22 = vld [vmem:[#allocation2 + $0x138] sm:$0xff]  ;;  %v447_v23 = vld [vmem:[#allocation2 + $0x140] sm:$0xff]  ;;  %415 = vst [vmem:[#allocation2 + $0x159] sm:$0xff] %v343_v19  ;;  %v836_v28 = vpack.c.bf16 %v343_v19, %v342_v18  ;;  %v254_v59 = vmul.f32 %v3262_v14, %v218_v57  ;;  %v3128_v62 = vld [vmem:[%s4241_s2 + $0xf0] sm:$0xff]  }
  0x23   : > { %2566 = vmatpush3.bf16.msra.mxu0 %v3111_v36  ;;  %3086 = vmatpush3.bf16.msra.mxu1 %v3111_v36  ;;  %v3355_v26 = vpack.c.bf16 %v447_v23, %v446_v22  ;;  %v289_v36 = vadd.f32 %v3267_v16, %v253_v29  ;;  %v3125_v44 = vld [vmem:[%s4241_s2 + $0xa0] sm:$0xff]   ;;  %v3136_v2 = vld [vmem:[%s4241_s2 + $0x158] sm:$0xff]   ;;  %v3130_v12 = vld [vmem:[%s4241_s2 + $0xb0] sm:$0xff]  }
  0x24   : > { %2663 = vmatprep.subr.bf16.mxu1 %v3112_v39  ;;  %2775 = vmatprep.subr.bf16.mxu0 %v3113_v42  ;;  %v320_v39 = vmax.f32 %v288_v33, 0.0  ;;  %v3132_v18 = vld [vmem:[%s4241_s2 + $0xf8] sm:$0xff]   ;;  %v222_v20 = vld [vmem:[%s3254_s14 + $0x50] sm:$0xff]  ;;  %v484_v24 = vld [vmem:[#allocation2 + $0x2] sm:$0xff] }
  0x25   : > { %v321_v42 = vmax.f32 %v289_v36, 0.0  ;;  %v223_v22 = vld [vmem:[%s3254_s14 + $0x58] sm:$0xff]  ;;  %v485_v25 = vld [vmem:[#allocation2 + $0xa] sm:$0xff]  ;;  %v258_v29 = vmul.f32 %v3262_v14, %v222_v20  ;;  %v3134_v33 = vld [vmem:[%s4241_s2 + $0x1c0] sm:$0xff]  }
  0x26   : > { %1462 = vmatmul.mubr.bf16.vlgmr.msra.gmra.mrb[0].mxu0 %v3178_v63  ;;  %1558 = vmatmul.mubr.bf16.vlgmr.msra.gmra.mrb[0].mxu1 %v817_v54  ;;  %392 = vst [vmem:[#allocation2 + $0x49] sm:$0xff] %v320_v39  ;;  %v3126_v54 = vld [vmem:[%s4241_s2 + $0xe8] sm:$0xff]   ;;  %v290_v63 = vadd.f32 %v3267_v16, %v254_v59  ;;  %v3133_v23 = vld [vmem:[%s4241_s2 + $0xb8] sm:$0xff]   ;;  %v259_v30 = vmul.f32 %v3262_v14, %v223_v22  ;;  %v226_v59 = vld [vmem:[%s3254_s14 + $0x70] sm:$0xff] }
  0x27   : > { %2664 = vmatpush3.bf16.msra.mxu1 %v3114_v45  ;;  %2776 = vmatpush3.bf16.msra.mxu0 %v3115_v46  ;;  %v344_v45 = vmax.f32 %v312_v40, 0.0  ;;  %v345_v46 = vmax.f32 %v313_v41, 0.0  ;;  %v424_v47 = vld [vmem:[#allocation2 + $0x30] sm:$0xff]  ;;  %393 = vst [vmem:[#allocation2 + $0x51] sm:$0xff] %v321_v42  ;;  %v425_v48 = vld [vmem:[#allocation2 + $0x38] sm:$0xff]  ;;  %v3386_v51 = vpack.c.bf16 %v321_v42, %v320_v39  ;;  %v3451_v35 = vadd.f32 %v3267_v16, %v258_v29  ;;  %v224_v41 = vld [vmem:[%s3254_s14 + $0x60] sm:$0xff] }
  0x28   : > { %2665 = vmatprep.subr.bf16.mxu1 %v3116_v49  ;;  %1469 = vmatprep.mubr.bf16.mxu0 %v3317_v55  ;;  %v448_v49 = vld [vmem:[#allocation2 + $0x150] sm:$0xff]  ;;  %v3388_v52 = vpack.c.bf16 %v425_v48, %v424_v47  ;;  %v295_v36 = vadd.f32 %v3267_v16, %v259_v30  ;;  %v225_v42 = vld [vmem:[%s3254_s14 + $0x68] sm:$0xff]  ;;  %v3135_v48 = vld [vmem:[%s4241_s2 + $0x180] sm:$0xff]  }
  0x29   : > { %1565 = vmatprep.mubr.bf16.mxu1 %v827_v58  ;;  %2777 = vmatprep.subr.bf16.mxu0 %v3121_v56  ;;  %v449_v50 = vld [vmem:[#allocation2 + $0x158] sm:$0xff]  ;;  %416 = vst [vmem:[#allocation2 + $0x169] sm:$0xff] %v344_v45  ;;  %417 = vst [vmem:[#allocation2 + $0x171] sm:$0xff] %v345_v46  ;;  %v845_v56 = vpack.c.bf16 %v345_v46, %v344_v45  ;;  %v326_v39 = vmax.f32 %v3451_v35, 0.0  ;;  %v711_v45 = vpack.c.bf16 %v485_v25, %v484_v24  ;;  %v3145_v22 = vld [vmem:[%s4241_s2 + $0x190] sm:$0xff]  }
  0x2a   : > { %v3390_v53 = vpack.c.bf16 %v449_v50, %v448_v49  ;;  %v219_v58 = vld [vmem:[%s3254_s14 + $0x38] sm:$0xff]  ;;  %v327_v40 = vmax.f32 %v295_v36, 0.0  ;;  %v261_v46 = vmul.f32 %v3262_v14, %v225_v42  ;;  %v3146_v25 = vld [vmem:[%s4241_s2 + $0x170] sm:$0xff]  }
  0x2b   : > { %2666 = vmatpush3.bf16.msra.mxu1 %v3117_v0  ;;  %2778 = vmatpush3.bf16.msra.mxu0 %v3123_v4  ;;  %v255_v60 = vmul.f32 %v3262_v14, %v219_v58  ;;  %v322_v4 = vmax.f32 %v290_v63, 0.0  ;;  %398 = vst [vmem:[#allocation2 + $0x91] sm:$0xff] %v326_v39  ;;  %v486_v50 = vld [vmem:[#allocation2 + $0x1a] sm:$0xff]  ;;  %v3142_v58 = vld [vmem:[%s4241_s2 + $0x168] sm:$0xff]   ;;  %v3147_v29 = vld [vmem:[%s4241_s2 + $0x130] sm:$0xff]  }
  0x2c   : > { %2667 = vmatprep.subr.bf16.mxu1 %v3118_v6  ;;  %2779 = vmatprep.subr.bf16.mxu0 %v3129_v37  ;;  %v3137_v6 = vld [vmem:[%s4241_s2 + $0x118] sm:$0xff]   ;;  %399 = vst [vmem:[#allocation2 + $0x99] sm:$0xff] %v327_v40  ;;  %v3477_v57 = vadd.f32 %v3267_v16, %v261_v46  ;;  %v3519_v20 = vpack.c.bf16 %v327_v40, %v326_v39  ;;  %v230_v30 = vld [vmem:[%s3254_s14 + $0x90] sm:$0xff] }
  0x2d   : > { %v291_v0 = vadd.f32 %v3267_v16, %v255_v60  ;;  %v426_v1 = vld [vmem:[#allocation2 + $0x48] sm:$0xff]  ;;  %394 = vst [vmem:[#allocation2 + $0x61] sm:$0xff] %v322_v4  ;;  %v227_v60 = vld [vmem:[%s3254_s14 + $0x78] sm:$0xff]  ;;  %v266_v35 = vmul.f32 %v3262_v14, %v230_v30 }
  0x2e   : > { %1470 = vmatmul.mubr.bf16.gmra.mrb[4].mxu0 %v3351_v21  ;;  %1566 = vmatmul.mubr.bf16.gmra.mrb[4].mxu1 %v3355_v26  ;;  %v427_v3 = vld [vmem:[#allocation2 + $0x50] sm:$0xff]  ;;  %v329_v63 = vmax.f32 %v3477_v57, 0.0  ;;  %v3148_v42 = vld [vmem:[%s4241_s2 + $0x1d8] sm:$0xff]  }
  0x2f   : > { %2668 = vmatpush3.bf16.msra.mxu1 %v3119_v10  ;;  %1477 = vmatprep.mubr.bf16.mxu0 %v3357_v27  ;;  %v323_v5 = vmax.f32 %v291_v0, 0.0  ;;  %v3416_v7 = vpack.c.bf16 %v427_v3, %v426_v1  ;;  %v220_v10 = vld [vmem:[%s3254_s14 + $0x40] sm:$0xff]  ;;  %v3143_v0 = vld [vmem:[%s4241_s2 + $0x128] sm:$0xff]   ;;  %v262_v1 = vmul.f32 %v3262_v14, %v226_v59  ;;  %v3554_v40 = vadd.f32 %v3267_v16, %v266_v35  ;;  %v3150_v46 = vld [vmem:[%s4241_s2 + $0x178] sm:$0xff]  }
  0x30   : > { %2669 = vmatprep.subr.bf16.mxu1 %v3120_v15  ;;  %1573 = vmatprep.mubr.bf16.mxu1 %v836_v28  ;;  %v450_v8 = vld [vmem:[#allocation2 + $0x168] sm:$0xff]  ;;  %v451_v9 = vld [vmem:[#allocation2 + $0x170] sm:$0xff]  ;;  %v256_v17 = vmul.f32 %v3262_v14, %v220_v10  ;;  %401 = vst [vmem:[#allocation2 + $0xb1] sm:$0xff] %v329_v63  ;;  %v228_v10 = vld [vmem:[%s3254_s14 + $0x80] sm:$0xff] }
  0x31   : > { %2780 = vmatpush3.bf16.msra.mxu0 %v3131_v43  ;;  %v3419_v11 = vpack.c.bf16 %v451_v9, %v450_v8  ;;  %395 = vst [vmem:[#allocation2 + $0x69] sm:$0xff] %v323_v5  ;;  %v3424_v13 = vpack.c.bf16 %v323_v5, %v322_v4  ;;  %v221_v15 = vld [vmem:[%s3254_s14 + $0x48] sm:$0xff]  ;;  %v3502_v5 = vadd.f32 %v3267_v16, %v262_v1  ;;  %v3144_v8 = vld [vmem:[%s4241_s2 + $0x1d0] sm:$0xff]  }
  0x32   : > { %2781 = vmatprep.subr.bf16.mxu0 %v3136_v2  ;;  %v257_v19 = vmul.f32 %v3262_v14, %v221_v15  ;;  %v292_v28 = vadd.f32 %v3267_v16, %v256_v17  ;;  %v263_v2 = vmul.f32 %v3262_v14, %v227_v60  ;;  %v3141_v3 = vld [vmem:[%s4241_s2 + $0x188] sm:$0xff]  }
  0x33   : > { %2670 = vmatpush3.bf16.msra.mxu1 %v3122_v32  ;;  %v3138_v32 = vld [vmem:[%s4241_s2 + $0x160] sm:$0xff]   ;;  %v330_v17 = vmax.f32 %v3502_v5, 0.0  ;;  %v490_v60 = vld [vmem:[#allocation2 + $0x4a] sm:$0xff] }
  0x34   : > { %2671 = vmatprep.subr.bf16.mxu1 %v3124_v38  ;;  %v293_v31 = vadd.f32 %v3267_v16, %v257_v19  ;;  %v324_v34 = vmax.f32 %v292_v28, 0.0  ;;  %v3140_v38 = vld [vmem:[%s4241_s2 + $0x120] sm:$0xff]   ;;  %v264_v19 = vmul.f32 %v3262_v14, %v228_v10 }
  0x35   : > { %2782 = vmatpush3.bf16.msra.mxu0 %v3137_v6  ;;  %v428_v43 = vld [vmem:[#allocation2 + $0x60] sm:$0xff]  ;;  %v3505_v6 = vadd.f32 %v3267_v16, %v263_v2  ;;  %402 = vst [vmem:[#allocation2 + $0xc1] sm:$0xff] %v330_v17 }
  0x36   : > { %1478 = vmatmul.mubr.bf16.gmra.mrb[8].mxu0 %v3388_v52  ;;  %1574 = vmatmul.mubr.bf16.gmra.mrb[8].mxu1 %v3390_v53  ;;  %v325_v37 = vmax.f32 %v293_v31, 0.0  ;;  %396 = vst [vmem:[#allocation2 + $0x79] sm:$0xff] %v324_v34  ;;  %v3530_v24 = vadd.f32 %v3267_v16, %v264_v19  ;;  %v231_v31 = vld [vmem:[%s3254_s14 + $0x98] sm:$0xff]  ;;  %v3609_v2 = vld [vmem:[%s4241_s2 + $0x200] sm:$0xff]   ;;  %v3155_v19 = vld [vmem:[%s4241_s2 + $0x1e8] sm:$0xff]  }
  0x37   : > { %2672 = vmatpush3.bf16.msra.mxu1 %v3125_v44  ;;  %1485 = vmatprep.mubr.bf16.mxu0 %v3386_v51  ;;  %v267_v36 = vmul.f32 %v3262_v14, %v231_v31  ;;  %v3160_v31 = vld [vmem:[%s4241_s2 + $0x1b0] sm:$0xff]  }
  0x38   : > { %2673 = vmatprep.subr.bf16.mxu1 %v3126_v54  ;;  %1581 = vmatprep.mubr.bf16.mxu1 %v845_v56  ;;  %v429_v44 = vld [vmem:[#allocation2 + $0x68] sm:$0xff]  ;;  %397 = vst [vmem:[#allocation2 + $0x81] sm:$0xff] %v325_v37  ;;  %v3468_v49 = vpack.c.bf16 %v325_v37, %v324_v34  ;;  %v332_v34 = vmax.f32 %v3530_v24, 0.0  ;;  %v432_v37 = vld [vmem:[#allocation2 + $0x90] sm:$0xff]  ;;  %v3161_v24 = vld [vmem:[%s4241_s2 + $0x1f8] sm:$0xff]  }
  0x39   : > { %2783 = vmatprep.subr.bf16.mxu0 %v3138_v32  ;;  %v3463_v47 = vpack.c.bf16 %v429_v44, %v428_v43  ;;  %v3139_v54 = vld [vmem:[%s4241_s2 + $0x1c8] sm:$0xff]   ;;  %v488_v32 = vld [vmem:[#allocation2 + $0x32] sm:$0xff] }
  0x3a   : > { %2784 = vmatpush3.bf16.msra.mxu0 %v3140_v38  ;;  %v433_v38 = vld [vmem:[#allocation2 + $0x98] sm:$0xff]  ;;  %404 = vst [vmem:[#allocation2 + $0xd9] sm:$0xff] %v332_v34  ;;  %v492_v5 = vld [vmem:[#allocation2 + $0x62] sm:$0xff] }
  0x3b   : > { %2674 = vmatpush3.bf16.msra.mxu1 %v3127_v61  ;;  %v487_v61 = vld [vmem:[#allocation2 + $0x22] sm:$0xff]  ;;  %2785 = vmatprep.subr.bf16.mxu0 %v3142_v58  ;;  %v3567_v43 = vpack.c.bf16 %v433_v38, %v432_v37  ;;  %v243_v37 = vld [vmem:[%s3254_s14 + $0xf8] sm:$0xff] }
  0x3c   : > { %2675 = vmatprep.subr.bf16.mxu1 %v3128_v62  ;;  %v233_v58 = vld [vmem:[%s3254_s14 + $0xa8] sm:$0xff] }
  0x3d   : > { %v430_v4 = vld [vmem:[#allocation2 + $0x78] sm:$0xff]  ;;  %v269_v57 = vmul.f32 %v3262_v14, %v233_v58 }
  0x3e   : > { %1486 = vmatmul.mubr.bf16.gmra.mrb[12].mxu0 %v3416_v7  ;;  %1582 = vmatmul.mubr.bf16.gmra.mrb[12].mxu1 %v3419_v11 }
  0x3f   : > { %2676 = vmatpush3.bf16.msra.mxu1 %v3130_v12  ;;  %1493 = vmatprep.mubr.bf16.mxu0 %v3424_v13  ;;  %v431_v9 = vld [vmem:[#allocation2 + $0x80] sm:$0xff]  ;;  %v229_v12 = vld [vmem:[%s3254_s14 + $0x88] sm:$0xff]  ;;  %v3604_v1 = vadd.f32 %v3267_v16, %v269_v57 }
  0x40   : > { %2677 = vmatprep.subr.bf16.mxu1 %v3132_v18  ;;  %1622 = vmatprep.mubr.bf16.mxu1 %v3351_v21  ;;  %v260_v21 = vmul.f32 %v3262_v14, %v224_v41  ;;  %v3514_v15 = vpack.c.bf16 %v431_v9, %v430_v4  ;;  %v331_v18 = vmax.f32 %v3505_v6, 0.0  ;;  %v3557_v41 = vadd.f32 %v3267_v16, %v267_v36  ;;  %v3157_v6 = vld [vmem:[%s4241_s2 + $0x1a8] sm:$0xff]   ;;  %v242_v36 = vld [vmem:[%s3254_s14 + $0xf0] sm:$0xff] }
  0x41   : > { %2786 = vmatpush3.bf16.msra.mxu0 %v3143_v0  ;;  %v337_v4 = vmax.f32 %v3604_v1, 0.0  ;;  %v495_v35 = vld [vmem:[#allocation2 + $0x82] sm:$0xff]  ;;  %v278_v38 = vmul.f32 %v3262_v14, %v242_v36 }
  0x42   : > { %v3474_v56 = vadd.f32 %v3267_v16, %v260_v21  ;;  %403 = vst [vmem:[#allocation2 + $0xc9] sm:$0xff] %v331_v18  ;;  %2787 = vmatprep.subr.bf16.mxu0 %v3146_v25  ;;  %v335_v21 = vmax.f32 %v3557_v41, 0.0  ;;  %v497_v41 = vld [vmem:[#allocation2 + $0x9a] sm:$0xff] }
  0x43   : > { %2678 = vmatpush3.bf16.msra.mxu1 %v3133_v23  ;;  %v265_v23 = vmul.f32 %v3262_v14, %v229_v12  ;;  %v3625_v12 = vpack.c.bf16 %v331_v18, %v330_v17  ;;  %409 = vst [vmem:[#allocation2 + $0x111] sm:$0xff] %v337_v4  ;;  %v436_v17 = vld [vmem:[#allocation2 + $0xc0] sm:$0xff] }
  0x44   : > { %2887 = vmatprep.subr.bf16.mxu1 %v3134_v33  ;;  %v328_v62 = vmax.f32 %v3474_v56, 0.0  ;;  %v489_v33 = vld [vmem:[#allocation2 + $0x3a] sm:$0xff]  ;;  %407 = vst [vmem:[#allocation2 + $0xf9] sm:$0xff] %v335_v21 }
  0x45   : > { %v3536_v28 = vadd.f32 %v3267_v16, %v265_v23  ;;  %2788 = vmatpush3.bf16.msra.mxu0 %v3147_v29  ;;  %v3569_v44 = vpack.c.bf16 %v489_v33, %v488_v32  ;;  %v3158_v23 = vld [vmem:[%s4241_s2 + $0x1f0] sm:$0xff]   ;;  %v438_v32 = vld [vmem:[#allocation2 + $0xd8] sm:$0xff] }
  0x46   : > { %1494 = vmatmul.mubr.bf16.gmra.mrb[16].mxu0 %v3463_v47  ;;  %1623 = vmatmul.mubr.bf16.vlgmr.msra.gmra.mrb[16].mxu1 %v711_v45  ;;  %400 = vst [vmem:[#allocation2 + $0xa9] sm:$0xff] %v328_v62  ;;  %v334_v45 = vmax.f32 %v3554_v40, 0.0  ;;  %v494_v33 = vld [vmem:[#allocation2 + $0x7a] sm:$0xff] }
  0x47   : > { %2888 = vmatpush3.bf16.msra.mxu1 %v3135_v48  ;;  %1501 = vmatprep.mubr.bf16.mxu0 %v3468_v49  ;;  %v333_v39 = vmax.f32 %v3536_v28, 0.0  ;;  %v3151_v48 = vld [vmem:[%s4241_s2 + $0x138] sm:$0xff]  }
  0x48   : > { %1630 = vmatprep.mubr.bf16.mxu1 %v3388_v52  ;;  %2889 = vmatprep.subr.bf16.mxu1 %v3139_v54  ;;  %v3510_v52 = vpack.c.bf16 %v487_v61, %v486_v50  ;;  %v3583_v50 = vpack.c.bf16 %v329_v63, %v328_v62  ;;  %406 = vst [vmem:[#allocation2 + $0xf1] sm:$0xff] %v334_v45  ;;  %v232_v54 = vld [vmem:[%s3254_s14 + $0xa0] sm:$0xff]  ;;  %v491_v61 = vld [vmem:[#allocation2 + $0x52] sm:$0xff] }
  0x49   : > { %405 = vst [vmem:[#allocation2 + $0xe1] sm:$0xff] %v333_v39  ;;  %2789 = vmatprep.subr.bf16.mxu0 %v3150_v46  ;;  %v268_v56 = vmul.f32 %v3262_v14, %v232_v54  ;;  %v3152_v62 = vld [vmem:[%s4241_s2 + $0x1e0] sm:$0xff]   ;;  %v3618_v10 = vpack.c.bf16 %v491_v61, %v490_v60  ;;  %v437_v18 = vld [vmem:[#allocation2 + $0xc8] sm:$0xff]  ;;  %v3652_v30 = vpack.c.bf16 %v333_v39, %v332_v34  ;;  %v3163_v34 = vld [vmem:[%s4241_s2 + $0x1b8] sm:$0xff]  }
  0x4a   : > { %2790 = vmatpush3.bf16.msra.mxu0 %v3151_v48  ;;  %v3644_v25 = vpack.c.bf16 %v437_v18, %v436_v17  ;;  %v3679_v46 = vpack.c.bf16 %v335_v21, %v334_v45  ;;  %v314_v48 = vadd.f32 %v3267_v16, %v278_v38  ;;  %v500_v1 = vld [vmem:[#allocation2 + $0xc2] sm:$0xff] }
  0x4b   : > { %2890 = vmatpush3.bf16.msra.mxu1 %v3141_v3  ;;  %v3601_v0 = vadd.f32 %v3267_v16, %v268_v56  ;;  %3023 = vmatprep.subr.bf16.mxu0 %v3609_v2  ;;  %v538_v18 = vld [vmem:[#allocation2 + $0x120] sm:$0xff] }
  0x4c   : > { %2891 = vmatprep.subr.bf16.mxu1 %v3144_v8  ;;  %v3154_v8 = vld [vmem:[%s4241_s2 + $0x1a0] sm:$0xff]   ;;  %v346_v58 = vmax.f32 %v314_v48, 0.0 }
  0x4d   : > { %v434_v59 = vld [vmem:[#allocation2 + $0xa8] sm:$0xff]  ;;  %v435_v63 = vld [vmem:[#allocation2 + $0xb0] sm:$0xff]  ;;  %v336_v3 = vmax.f32 %v3601_v0, 0.0  ;;  %v513_v48 = vld [vmem:[#allocation2 + $0x15a] sm:$0xff] }
  0x4e   : > { %1502 = vmatmul.mubr.bf16.gmra.mrb[20].mxu0 %v3514_v15  ;;  %1631 = vmatmul.mubr.bf16.gmra.mrb[20].mxu1 %v3510_v52  ;;  %v3616_v9 = vpack.c.bf16 %v435_v63, %v434_v59  ;;  %v496_v59 = vld [vmem:[#allocation2 + $0x92] sm:$0xff]  ;;  %418 = vst [vmem:[#allocation2 + $0x181] sm:$0xff] %v346_v58  ;;  %v498_v61 = vld [vmem:[#allocation2 + $0xaa] sm:$0xff]  ;;  %v511_v38 = vld [vmem:[#allocation2 + $0x142] sm:$0xff] }
  0x4f   : > { %1509 = vmatprep.mubr.bf16.mxu0 %v3519_v20  ;;  %1638 = vmatprep.mubr.bf16.mxu1 %v3416_v7  ;;  %v3149_v7 = vld [vmem:[%s4241_s2 + $0x198] sm:$0xff]   ;;  %408 = vst [vmem:[#allocation2 + $0x109] sm:$0xff] %v336_v3  ;;  %v3689_v21 = vpack.c.bf16 %v497_v41, %v496_v59 }
  0x50   : > { %2892 = vmatpush3.bf16.msra.mxu1 %v3145_v22  ;;  %v493_v22 = vld [vmem:[#allocation2 + $0x6a] sm:$0xff]  ;;  %v439_v28 = vld [vmem:[#allocation2 + $0xe0] sm:$0xff]  ;;  %v441_v40 = vld [vmem:[#allocation2 + $0xf8] sm:$0xff] }
  0x51   : > { %2893 = vmatprep.subr.bf16.mxu1 %v3148_v42  ;;  %v3646_v29 = vpack.c.bf16 %v493_v22, %v492_v5  ;;  %v3670_v39 = vpack.c.bf16 %v439_v28, %v438_v32  ;;  %v3672_v42 = vpack.c.bf16 %v495_v35, %v494_v33  ;;  %v502_v5 = vld [vmem:[#allocation2 + $0xda] sm:$0xff]  ;;  %v539_v22 = vld [vmem:[#allocation2 + $0x128] sm:$0xff]  ;;  %v507_v33 = vld [vmem:[#allocation2 + $0x112] sm:$0xff] }
  0x52   : > { %v3738_v32 = vpack.c.bf16 %v539_v22, %v538_v18  ;;  %v3166_v35 = vld [vmem:[%s4241_s2 + $0x230] sm:$0xff]   ;;  %v508_v28 = vld [vmem:[#allocation2 + $0x122] sm:$0xff] }
  0x53   : > { %v573_v18 = vld [vmem:[#allocation2 + $0x141] sm:$0xff] }
  0x54   : > { %2894 = vmatpush3.bf16.msra.mxu1 %v3149_v7  ;;  %v279_v7 = vmul.f32 %v3262_v14, %v243_v37  ;;  %v440_v14 = vld [vmem:[#allocation2 + $0xf0] sm:$0xff]  ;;  %v510_v37 = vld [vmem:[#allocation2 + $0x13a] sm:$0xff] }
  0x55   : > { %2895 = vmatprep.subr.bf16.mxu1 %v3152_v62  ;;  %v3687_v45 = vpack.c.bf16 %v441_v40, %v440_v14  ;;  %v499_v62 = vld [vmem:[#allocation2 + $0xb2] sm:$0xff] }
  0x56   : > { %1510 = vmatmul.mubr.bf16.gmra.mrb[24].mxu0 %v3567_v43  ;;  %1639 = vmatmul.mubr.bf16.gmra.mrb[24].mxu1 %v3569_v44  ;;  %v315_v54 = vadd.f32 %v3267_v16, %v279_v7  ;;  %v3695_v16 = vpack.c.bf16 %v337_v4, %v336_v3  ;;  %v442_v56 = vld [vmem:[#allocation2 + $0x108] sm:$0xff]  ;;  %v443_v57 = vld [vmem:[#allocation2 + $0x110] sm:$0xff]  ;;  %v646_v40 = vld [vmem:[#allocation2 + $0x39] sm:$0xff] }
  0x57   : > { %1517 = vmatprep.mubr.bf16.mxu0 %v3583_v50  ;;  %1646 = vmatprep.mubr.bf16.mxu1 %v3463_v47  ;;  %v3701_v63 = vpack.c.bf16 %v443_v57, %v442_v56  ;;  %v501_v3 = vld [vmem:[#allocation2 + $0xca] sm:$0xff]  ;;  %v512_v7 = vld [vmem:[#allocation2 + $0x152] sm:$0xff] }
  0x58   : > { %2896 = vmatpush3.bf16.msra.mxu1 %v3154_v8  ;;  %v347_v60 = vmax.f32 %v315_v54, 0.0  ;;  %v3703_v8 = vpack.c.bf16 %v499_v62, %v498_v61  ;;  %v3711_v4 = vpack.c.bf16 %v501_v3, %v500_v1  ;;  %v546_v54 = vld [vmem:[#allocation2 + $0x180] sm:$0xff]  ;;  %v3771_v59 = vpack.c.bf16 %v513_v48, %v512_v7  ;;  %v645_v14 = vld [vmem:[#allocation2 + $0x31] sm:$0xff]  ;;  %v647_v62 = vld [vmem:[#allocation2 + $0x49] sm:$0xff] }
  0x59   : > { %2897 = vmatprep.subr.bf16.mxu1 %v3155_v19  ;;  %v3156_v19 = vld [vmem:[%s4241_s2 + $0x208] sm:$0xff]   ;;  %v716_v61 = vpack.c.bf16 %v646_v40, %v645_v14  ;;  %v613_v56 = vld [vmem:[#allocation2 + $0x30] sm:$0xff]  ;;  %v614_v57 = vld [vmem:[#allocation2 + $0x38] sm:$0xff] }
  0x5a   : > { %419 = vst [vmem:[#allocation2 + $0x189] sm:$0xff] %v347_v60  ;;  %v3705_v0 = vpack.c.bf16 %v347_v60, %v346_v58  ;;  %v514_v60 = vld [vmem:[#allocation2 + $0x16a] sm:$0xff]  ;;  %v715_v3 = vpack.c.bf16 %v614_v57, %v613_v56 }
  0x5b   : > { %v648_v1 = vld [vmem:[#allocation2 + $0x51] sm:$0xff] }
  0x5c   : > { %2898 = vmatpush3.bf16.msra.mxu1 %v3157_v6  ;;  %v503_v6 = vld [vmem:[#allocation2 + $0xe2] sm:$0xff] }
  0x5d   : > { %2899 = vmatprep.subr.bf16.mxu1 %v3158_v23  ;;  %v3724_v17 = vpack.c.bf16 %v503_v6, %v502_v5  ;;  %v3164_v23 = vld [vmem:[%s4241_s2 + $0x220] sm:$0xff]   ;;  %v615_v5 = vld [vmem:[#allocation2 + $0x48] sm:$0xff]  ;;  %v616_v6 = vld [vmem:[#allocation2 + $0x50] sm:$0xff] }
  0x5e   : > { %1518 = vmatmul.mubr.bf16.gmra.mrb[28].mxu0 %v3616_v9  ;;  %1647 = vmatmul.mubr.bf16.gmra.mrb[28].mxu1 %v3618_v10 }
  0x5f   : > { %1525 = vmatprep.mubr.bf16.mxu0 %v3625_v12  ;;  %1654 = vmatprep.mubr.bf16.mxu1 %v3514_v15 }
  0x60   : > { %2900 = vmatpush3.bf16.msra.mxu1 %v3160_v31 }
  0x61   : > { %2901 = vmatprep.subr.bf16.mxu1 %v3161_v24  ;;  %v547_v58 = vld [vmem:[#allocation2 + $0x188] sm:$0xff] }
  0x64   : > { %2902 = vmatpush3.bf16.msra.mxu1 %v3163_v34  ;;  %v509_v34 = vld [vmem:[#allocation2 + $0x12a] sm:$0xff] }
  0x65   : > { %v3759_v36 = vpack.c.bf16 %v509_v34, %v508_v28 }
  0x66   : > { %1526 = vmatmul.mubr.bf16.gmra.mrb[32].mxu0 %v3644_v25  ;;  %1655 = vmatmul.mubr.bf16.gmra.mrb[32].mxu1 %v3646_v29 }
  0x67   : > { %1533 = vmatprep.mubr.bf16.mxu0 %v3652_v30  ;;  %1662 = vmatprep.mubr.bf16.mxu1 %v3567_v43 }
  0x6e   : > { %1534 = vmatmul.mubr.bf16.gmra.mrb[36].mxu0 %v3670_v39  ;;  %1663 = vmatmul.mubr.bf16.gmra.mrb[36].mxu1 %v3672_v42 }
  0x6f   : > { %1541 = vmatprep.mubr.bf16.mxu0 %v3679_v46  ;;  %1670 = vmatprep.mubr.bf16.mxu1 %v3616_v9 }
  0x76   : > { %1542 = vmatmul.mubr.bf16.gmra.mrb[40].mxu0 %v3687_v45  ;;  %1671 = vmatmul.mubr.bf16.gmra.mrb[40].mxu1 %v3689_v21 }
  0x77   : > { %1549 = vmatprep.mubr.bf16.mxu0 %v3695_v16  ;;  %1678 = vmatprep.mubr.bf16.mxu1 %v3644_v25 }
  0x7e   : > { %1550 = vmatmul.mubr.bf16.gmra.mrb[44].mxu0 %v3701_v63  ;;  %1679 = vmatmul.mubr.bf16.gmra.mrb[44].mxu1 %v3703_v8 }
  0x7f   : > { %1686 = vmatprep.mubr.bf16.mxu1 %v3670_v39  ;;  %1783 = vmatprep.mubr.bf16.mxu0 %v3510_v52  ;;  %v3159_v52 = vld [vmem:[%s4241_s2 + $0x210] sm:$0xff]  }
  0x86   : > { %1687 = vmatmul.mubr.bf16.gmra.mrb[48].mxu1 %v3711_v4  ;;  %1784 = vmatmul.mubr.bf16.vlgmr.msra.gmra.mrb[48].mxu0 %v3317_v55  ;;  %v3162_v55 = vld [vmem:[%s4241_s2 + $0x218] sm:$0xff]  }
  0x87   : > { %3024 = vmatpush3.bf16.msra.mxu0 %v3609_v2  ;;  %1694 = vmatprep.mubr.bf16.mxu1 %v3687_v45  ;;  %v505_v2 = vld [vmem:[#allocation2 + $0xfa] sm:$0xff] }
  0x88   : > { %1791 = vmatprep.mubr.bf16.mxu0 %v3569_v44  ;;  %3025 = vmatprep.subr.bf16.mxu0 %v3156_v19  ;;  %v504_v44 = vld [vmem:[#allocation2 + $0xf2] sm:$0xff] }
  0x89   : > { %v3736_v31 = vpack.c.bf16 %v505_v2, %v504_v44  ;;  %v571_v44 = vld [vmem:[#allocation2 + $0x129] sm:$0xff] }
  0x8b   : > { %3026 = vmatpush3.bf16.msra.mxu0 %v3156_v19  ;;  %v725_v19 = vpack.c.bf16 %v648_v1, %v647_v62 }
  0x8c   : > { %3027 = vmatprep.subr.bf16.mxu0 %v3159_v52 }
  0x8e   : > { %1695 = vmatmul.mubr.bf16.gmra.mrb[52].mxu1 %v3724_v17  ;;  %1792 = vmatmul.mubr.bf16.gmra.mrb[52].mxu0 %v3357_v27  ;;  %v3165_v27 = vld [vmem:[%s4241_s2 + $0x228] sm:$0xff]  }
  0x8f   : > { %1702 = vmatprep.mubr.bf16.mxu1 %v3701_v63  ;;  %1799 = vmatprep.mubr.bf16.mxu0 %v3618_v10  ;;  %v506_v10 = vld [vmem:[#allocation2 + $0x10a] sm:$0xff] }
  0x90   : > { %3028 = vmatpush3.bf16.msra.mxu0 %v3159_v52  ;;  %v3750_v24 = vpack.c.bf16 %v507_v33, %v506_v10  ;;  %v724_v52 = vpack.c.bf16 %v616_v6, %v615_v5 }
  0x91   : > { %3029 = vmatprep.subr.bf16.mxu0 %v3162_v55 }
  0x94   : > { %3030 = vmatpush3.bf16.msra.mxu0 %v3162_v55  ;;  %v570_v55 = vld [vmem:[#allocation2 + $0x121] sm:$0xff] }
  0x95   : > { %3031 = vmatprep.subr.bf16.mxu0 %v3164_v23  ;;  %v3793_v2 = vpack.c.bf16 %v571_v44, %v570_v55 }
  0x96   : > { %1703 = vmatmul.mubr.bf16.gmra.mrb[56].mxu1 %v3736_v31  ;;  %1800 = vmatmul.mubr.bf16.gmra.mrb[56].mxu0 %v3386_v51  ;;  %v3167_v51 = vld [vmem:[%s4241_s2 + $0x238] sm:$0xff]  }
  0x97   : > { %1710 = vmatprep.mubr.bf16.mxu1 %v3738_v32  ;;  %1807 = vmatprep.mubr.bf16.mxu0 %v3646_v29 }
  0x98   : > { %3032 = vmatpush3.bf16.msra.mxu0 %v3164_v23 }
  0x99   : > { %3033 = vmatprep.subr.bf16.mxu0 %v3165_v27 }
  0x9c   : > { %3034 = vmatpush3.bf16.msra.mxu0 %v3165_v27  ;;  %v610_v27 = vld [vmem:[#allocation2 + $0x182] sm:$0xff] }
  0x9d   : > { %3035 = vmatprep.subr.bf16.mxu0 %v3166_v35 }
  0x9e   : > { %1711 = vmatmul.mubr.bf16.gmra.mrb[60].mxu1 %v3750_v24  ;;  %1808 = vmatmul.mubr.bf16.gmra.mrb[60].mxu0 %v3424_v13 }
  0x9f   : > { %1718 = vmatprep.mubr.bf16.mxu1 %v3355_v26  ;;  %1815 = vmatprep.mubr.bf16.mxu0 %v3672_v42  ;;  %v3765_v26 = vpack.c.bf16 %v511_v38, %v510_v37 }
  0xa0   : > { %3036 = vmatpush3.bf16.msra.mxu0 %v3166_v35 }
  0xa1   : > { %3037 = vmatprep.subr.bf16.mxu0 %v3167_v51 }
  0xa4   : > { %3038 = vmatpush3.bf16.msra.mxu0 %v3167_v51 }
  0xa6   : > { %1719 = vmatmul.mubr.bf16.gmra.mrb[64].mxu1 %v3759_v36  ;;  %1816 = vmatmul.mubr.bf16.gmra.mrb[64].mxu0 %v3468_v49 }
  0xa7   : > { %1726 = vmatprep.mubr.bf16.mxu1 %v3390_v53  ;;  %1823 = vmatprep.mubr.bf16.mxu0 %v3689_v21  ;;  %v3773_v53 = vpack.c.bf16 %v547_v58, %v546_v54 }
  0xae   : > { %1727 = vmatmul.mubr.bf16.gmra.mrb[68].mxu1 %v3765_v26  ;;  %1824 = vmatmul.mubr.bf16.gmra.mrb[68].mxu0 %v3519_v20 }
  0xaf   : > { %1734 = vmatprep.mubr.bf16.mxu1 %v3419_v11  ;;  %1831 = vmatprep.mubr.bf16.mxu0 %v3703_v8  ;;  %v515_v11 = vld [vmem:[#allocation2 + $0x172] sm:$0xff] }
  0xb0   : > { %v3779_v41 = vpack.c.bf16 %v515_v11, %v514_v60  ;;  %v680_v11 = vld [vmem:[#allocation2 + $0x52] sm:$0xff] }
  0xb6   : > { %1735 = vmatmul.mubr.bf16.gmra.mrb[72].mxu1 %v3771_v59  ;;  %1832 = vmatmul.mubr.bf16.gmra.mrb[72].mxu0 %v3583_v50 }
  0xb7   : > { %1742 = vmatprep.mubr.bf16.mxu1 %v3773_v53  ;;  %1839 = vmatprep.mubr.bf16.mxu0 %v3711_v4 }
  0xbe   : > { %1743 = vmatmul.mubr.bf16.gmra.mrb[76].mxu1 %v3779_v41  ;;  %1840 = vmatmul.mubr.bf16.gmra.mrb[76].mxu0 %v3625_v12 }
  0xbf   : > { %1847 = vmatprep.mubr.bf16.mxu0 %v3724_v17  ;;  %1944 = vmatprep.mubr.bf16.mxu1 %v716_v61 }
  0xc6   : > { %1848 = vmatmul.mubr.bf16.gmra.mrb[80].mxu0 %v3652_v30  ;;  %1945 = vmatmul.mubr.bf16.vlgmr.msra.gmra.mrb[80].mxu1 %v715_v3 }
  0xc7   : > { %1855 = vmatprep.mubr.bf16.mxu0 %v3736_v31  ;;  %1952 = vmatprep.mubr.bf16.mxu1 %v725_v19 }
  0xce   : > { %1856 = vmatmul.mubr.bf16.gmra.mrb[84].mxu0 %v3679_v46  ;;  %1953 = vmatmul.mubr.bf16.gmra.mrb[84].mxu1 %v724_v52 }
  0xcf   : > { %1863 = vmatprep.mubr.bf16.mxu0 %v3750_v24  ;;  %1960 = vmatprep.mubr.bf16.mxu1 %v3424_v13  ;;  %v572_v13 = vld [vmem:[#allocation2 + $0x139] sm:$0xff] }
  0xd0   : > { %v3799_v22 = vpack.c.bf16 %v573_v18, %v572_v13 }
  0xd6   : > { %1864 = vmatmul.mubr.bf16.gmra.mrb[88].mxu0 %v3695_v16  ;;  %1961 = vmatmul.mubr.bf16.gmra.mrb[88].mxu1 %v3463_v47  ;;  %v574_v47 = vld [vmem:[#allocation2 + $0x151] sm:$0xff] }
  0xd7   : > { %1871 = vmatprep.mubr.bf16.mxu0 %v3759_v36  ;;  %1968 = vmatprep.mubr.bf16.mxu1 %v3468_v49  ;;  %v575_v49 = vld [vmem:[#allocation2 + $0x159] sm:$0xff] }
  0xd8   : > { %v3805_v23 = vpack.c.bf16 %v575_v49, %v574_v47 }
  0xde   : > { %1872 = vmatmul.mubr.bf16.gmra.mrb[92].mxu0 %v3793_v2  ;;  %1969 = vmatmul.mubr.bf16.gmra.mrb[92].mxu1 %v3514_v15  ;;  %v576_v15 = vld [vmem:[#allocation2 + $0x169] sm:$0xff] }
  0xdf   : > { %1879 = vmatprep.mubr.bf16.mxu0 %v3765_v26  ;;  %1976 = vmatprep.mubr.bf16.mxu1 %v3519_v20  ;;  %v577_v20 = vld [vmem:[#allocation2 + $0x171] sm:$0xff] }
  0xe0   : > { %v3811_v10 = vpack.c.bf16 %v577_v20, %v576_v15 }
  0xe6   : > { %1880 = vmatmul.mubr.bf16.gmra.mrb[96].mxu0 %v3799_v22  ;;  %1977 = vmatmul.mubr.bf16.gmra.mrb[96].mxu1 %v3567_v43  ;;  %v611_v43 = vld [vmem:[#allocation2 + $0x18a] sm:$0xff] }
  0xe7   : > { %1887 = vmatprep.mubr.bf16.mxu0 %v3771_v59  ;;  %1984 = vmatprep.mubr.bf16.mxu1 %v3583_v50  ;;  %v3813_v33 = vpack.c.bf16 %v611_v43, %v610_v27  ;;  %v677_v50 = vld [vmem:[#allocation2 + $0x32] sm:$0xff] }
  0xee   : > { %1888 = vmatmul.mubr.bf16.gmra.mrb[100].mxu0 %v3805_v23  ;;  %1985 = vmatmul.mubr.bf16.gmra.mrb[100].mxu1 %v3616_v9  ;;  %v678_v9 = vld [vmem:[#allocation2 + $0x3a] sm:$0xff] }
  0xef   : > { %1895 = vmatprep.mubr.bf16.mxu0 %v3779_v41  ;;  %1992 = vmatprep.mubr.bf16.mxu1 %v3625_v12  ;;  %v717_v48 = vpack.c.bf16 %v678_v9, %v677_v50 }
  0xf6   : > { %1896 = vmatmul.mubr.bf16.gmra.mrb[104].mxu0 %v3811_v10  ;;  %1993 = vmatmul.mubr.bf16.gmra.mrb[104].mxu1 %v3644_v25 }
  0xf7   : > { %1903 = vmatprep.mubr.bf16.mxu0 %v3813_v33  ;;  %2000 = vmatprep.mubr.bf16.mxu1 %v3652_v30  ;;  %v679_v30 = vld [vmem:[#allocation2 + $0x4a] sm:$0xff] }
  0xf8   : > { %v726_v57 = vpack.c.bf16 %v680_v11, %v679_v30 }
  0xf9   : > { %v2567_v35 = vpop.f32.mrb[0].mxu0  ;;  %v2639_v12 = vpop.f32.mrb[0].mxu1 }
  0xfa   : > { %v2568_v51 = vpop.f32.mrb[1].mxu0  ;;  %v2640_v28 = vpop.f32.mrb[1].mxu1 }
  0xfb   : > { %v3819_v34 = vadd.f32 %v2568_v51, %v2567_v35  ;;  %v3821_v37 = vadd.f32 %v2640_v28, %v2639_v12  ;;  %v2570_v38 = vpop.f32.mrb[2].mxu0  ;;  %v2642_v7 = vpop.f32.mrb[2].mxu1 }
  0xfc   : > { %v2571_v54 = vpop.f32.mrb[3].mxu0  ;;  %v2643_v58 = vpop.f32.mrb[3].mxu1 }
  0xfd   : > { %v3823_v25 = vadd.f32 %v2571_v54, %v2570_v38  ;;  %v3825_v60 = vadd.f32 %v2643_v58, %v2642_v7 }
  0xfe   : > { %1904 = vmatmul.mubr.bf16.gmra.mrb[108].mxu0 %v3705_v0  ;;  %2001 = vmatmul.mubr.bf16.gmra.mrb[108].mxu1 %v3670_v39 }
  0xff   : > { %2008 = vmatprep.mubr.bf16.mxu1 %v3679_v46  ;;  %3039 = vmatprep.mubr.bf16.mxu0 %v717_v48 }
 0x101   : > { %v2573_v14 = vpop.f32.mrb[4].mxu0  ;;  %v2645_v40 = vpop.f32.mrb[4].mxu1 }
 0x102   : > { %v2574_v61 = vpop.f32.mrb[5].mxu0  ;;  %v2646_v56 = vpop.f32.mrb[5].mxu1 }
 0x103   : > { %v3830_v62 = vadd.f32 %v2574_v61, %v2573_v14  ;;  %v3832_v1 = vadd.f32 %v2646_v56, %v2645_v40  ;;  %v2576_v3 = vpop.f32.mrb[6].mxu0  ;;  %v2648_v19 = vpop.f32.mrb[6].mxu1 }
 0x104   : > { %v2577_v5 = vpop.f32.mrb[7].mxu0  ;;  %v2649_v6 = vpop.f32.mrb[7].mxu1 }
 0x105   : > { %v3834_v52 = vadd.f32 %v2577_v5, %v2576_v3  ;;  %v3836_v39 = vadd.f32 %v2649_v6, %v2648_v19  ;;  %v637_v19 = vld [vmem:[#allocation2 + $0x150] sm:$0xff]  ;;  %v638_v5 = vld [vmem:[#allocation2 + $0x158] sm:$0xff] }
 0x106   : > { %2009 = vmatmul.mubr.bf16.gmra.mrb[112].mxu1 %v3687_v45  ;;  %3040 = vmatmul.mubr.bf16.vlgmr.msra.gmra.mrb[112].mxu0 %v726_v57 }
 0x107   : > { %2016 = vmatprep.mubr.bf16.mxu1 %v3695_v16  ;;  %3043 = vmatprep.mubr.bf16.mxu0 %v3646_v29 }
 0x109   : > { %v2579_v46 = vpop.f32.mrb[8].mxu0  ;;  %v2651_v55 = vpop.f32.mrb[8].mxu1 }
 0x10a   : > { %v2580_v44 = vpop.f32.mrb[9].mxu0  ;;  %v2652_v13 = vpop.f32.mrb[9].mxu1 }
 0x10b   : > { %v3841_v18 = vadd.f32 %v2580_v44, %v2579_v46  ;;  %v3843_v47 = vadd.f32 %v2652_v13, %v2651_v55  ;;  %v2582_v49 = vpop.f32.mrb[10].mxu0  ;;  %v2654_v15 = vpop.f32.mrb[10].mxu1  ;;  %v823_v44 = vpack.c.bf16 %v638_v5, %v637_v19 }
 0x10c   : > { %v2583_v20 = vpop.f32.mrb[11].mxu0  ;;  %v2655_v27 = vpop.f32.mrb[11].mxu1 }
 0x10d   : > { %v3845_v43 = vadd.f32 %v2583_v20, %v2582_v49  ;;  %v3847_v45 = vadd.f32 %v2655_v27, %v2654_v15 }
 0x10e   : > { %2017 = vmatmul.mubr.bf16.gmra.mrb[116].mxu1 %v3701_v63  ;;  %3044 = vmatmul.mubr.bf16.gmra.mrb[116].mxu0 %v3672_v42  ;;  %v635_v42 = vld [vmem:[#allocation2 + $0x138] sm:$0xff] }
 0x10f   : > { %2024 = vmatprep.mubr.bf16.mxu1 %v3793_v2  ;;  %3047 = vmatprep.mubr.bf16.mxu0 %v3689_v21  ;;  %v636_v21 = vld [vmem:[#allocation2 + $0x140] sm:$0xff] }
 0x110   : > { %v814_v11 = vpack.c.bf16 %v636_v21, %v635_v42 }
 0x111   : > { %v2585_v29 = vpop.f32.mrb[12].mxu0  ;;  %v2657_v16 = vpop.f32.mrb[12].mxu1 }
 0x112   : > { %v2586_v50 = vpop.f32.mrb[13].mxu0  ;;  %v2658_v9 = vpop.f32.mrb[13].mxu1 }
 0x113   : > { %v3853_v35 = vadd.f32 %v2586_v50, %v2585_v29  ;;  %v3855_v12 = vadd.f32 %v2658_v9, %v2657_v16  ;;  %v2588_v51 = vpop.f32.mrb[14].mxu0  ;;  %v2660_v28 = vpop.f32.mrb[14].mxu1  ;;  %v639_v16 = vld [vmem:[#allocation2 + $0x168] sm:$0xff]  ;;  %v640_v50 = vld [vmem:[#allocation2 + $0x170] sm:$0xff] }
 0x114   : > { %v2589_v38 = vpop.f32.mrb[15].mxu0  ;;  %v2661_v7 = vpop.f32.mrb[15].mxu1 }
 0x115   : > { %v3857_v48 = vadd.f32 %v2589_v38, %v2588_v51  ;;  %v3859_v63 = vadd.f32 %v2661_v7, %v2660_v28  ;;  %v832_v38 = vpack.c.bf16 %v640_v50, %v639_v16 }
 0x116   : > { %2025 = vmatmul.mubr.bf16.gmra.mrb[120].mxu1 %v3738_v32  ;;  %3048 = vmatmul.mubr.bf16.gmra.mrb[120].mxu0 %v3703_v8 }
 0x117   : > { %2032 = vmatprep.mubr.bf16.mxu1 %v3799_v22  ;;  %3051 = vmatprep.mubr.bf16.mxu0 %v3711_v4 }
 0x119   : > { %v2591_v2 = vpop.f32.mrb[16].mxu0  ;;  %v2679_v54 = vpop.f32.mrb[16].mxu1 }
 0x11a   : > { %v2592_v58 = vpop.f32.mrb[17].mxu0  ;;  %v2680_v30 = vpop.f32.mrb[17].mxu1 }
 0x11b   : > { %v3865_v14 = vadd.f32 %v2592_v58, %v2591_v2  ;;  %v2681_v40 = vadd.f32 %v2680_v30, %v2679_v54  ;;  %v2594_v61 = vpop.f32.mrb[18].mxu0  ;;  %v2682_v56 = vpop.f32.mrb[18].mxu1  ;;  %v675_v30 = vld [vmem:[#allocation2 + $0x199] sm:$0xff] }
 0x11c   : > { %v2595_v57 = vpop.f32.mrb[19].mxu0  ;;  %v2683_v32 = vpop.f32.mrb[19].mxu1 }
 0x11d   : > { %v3868_v8 = vadd.f32 %v2681_v40, %v3819_v34  ;;  %v3870_v22 = vadd.f32 %v2595_v57, %v2594_v61  ;;  %v2684_v4 = vadd.f32 %v2683_v32, %v2682_v56 }
 0x11e   : > { %2033 = vmatmul.mubr.bf16.gmra.mrb[124].mxu1 %v814_v11  ;;  %3052 = vmatmul.mubr.bf16.gmra.mrb[124].mxu0 %v3724_v17  ;;  %v676_v11 = vld [vmem:[#allocation2 + $0x1a1] sm:$0xff] }
 0x11f   : > { %v3874_v3 = vadd.f32 %v2684_v4, %v3823_v25  ;;  %2040 = vmatprep.mubr.bf16.mxu1 %v3805_v23  ;;  %3055 = vmatprep.mubr.bf16.mxu0 %v3736_v31  ;;  %v851_v5 = vpack.c.bf16 %v676_v11, %v675_v30 }
 0x121   : > { %v2597_v6 = vpop.f32.mrb[20].mxu0  ;;  %v2685_v46 = vpop.f32.mrb[20].mxu1 }
 0x122   : > { %v2598_v55 = vpop.f32.mrb[21].mxu0  ;;  %v2686_v34 = vpop.f32.mrb[21].mxu1 }
 0x123   : > { %v3878_v13 = vadd.f32 %v2598_v55, %v2597_v6  ;;  %v2687_v49 = vadd.f32 %v2686_v34, %v2685_v46  ;;  %v2600_v15 = vpop.f32.mrb[22].mxu0  ;;  %v2688_v20 = vpop.f32.mrb[22].mxu1  ;;  %v707_v55 = vld [vmem:[#allocation2 + $0x19a] sm:$0xff]  ;;  %v708_v34 = vld [vmem:[#allocation2 + $0x1a2] sm:$0xff] }
 0x124   : > { %v2601_v17 = vpop.f32.mrb[23].mxu0  ;;  %v2689_v27 = vpop.f32.mrb[23].mxu1 }
 0x125   : > { %v3881_v25 = vadd.f32 %v2687_v49, %v3830_v62  ;;  %v3883_v23 = vadd.f32 %v2601_v17, %v2600_v15  ;;  %v2690_v31 = vadd.f32 %v2689_v27, %v2688_v20  ;;  %v3168_v20 = vld [vmem:[#allocation2] sm:$0xff]  ;;  %v852_v27 = vpack.c.bf16 %v708_v34, %v707_v55 }
 0x126   : > { %2041 = vmatmul.mubr.bf16.gmra.mrb[128].mxu1 %v823_v44  ;;  %3056 = vmatmul.mubr.bf16.gmra.mrb[128].mxu0 %v3750_v24  ;;  %v850_v17 = vpack.c.bf16 %v3168_v20, %v3168_v20 }
 0x127   : > { %v3887_v29 = vadd.f32 %v2690_v31, %v3834_v52  ;;  %2048 = vmatprep.mubr.bf16.mxu1 %v3811_v10  ;;  %3059 = vmatprep.mubr.bf16.mxu0 %v3759_v36 }
 0x129   : > { %v2603_v9 = vpop.f32.mrb[24].mxu0  ;;  %v2691_v51 = vpop.f32.mrb[24].mxu1 }
 0x12a   : > { %v2604_v28 = vpop.f32.mrb[25].mxu0  ;;  %v2692_v62 = vpop.f32.mrb[25].mxu1 }
 0x12b   : > { %v3891_v7 = vadd.f32 %v2604_v28, %v2603_v9  ;;  %v2693_v42 = vadd.f32 %v2692_v62, %v2691_v51  ;;  %v2606_v21 = vpop.f32.mrb[26].mxu0  ;;  %v2694_v2 = vpop.f32.mrb[26].mxu1 }
 0x12c   : > { %v2607_v24 = vpop.f32.mrb[27].mxu0  ;;  %v2695_v54 = vpop.f32.mrb[27].mxu1 }
 0x12d   : > { %v3894_v52 = vadd.f32 %v2693_v42, %v3841_v18  ;;  %v3896_v10 = vadd.f32 %v2607_v24, %v2606_v21  ;;  %v2696_v36 = vadd.f32 %v2695_v54, %v2694_v2 }
 0x12e   : > { %2049 = vmatmul.mubr.bf16.gmra.mrb[132].mxu1 %v832_v38  ;;  %3060 = vmatmul.mubr.bf16.gmra.mrb[132].mxu0 %v3765_v26 }
 0x12f   : > { %v3900_v58 = vadd.f32 %v2696_v36, %v3845_v43  ;;  %2056 = vmatprep.mubr.bf16.mxu1 %v3705_v0  ;;  %3063 = vmatprep.mubr.bf16.mxu0 %v3771_v59 }
 0x131   : > { %v2609_v40 = vpop.f32.mrb[28].mxu0  ;;  %v2697_v61 = vpop.f32.mrb[28].mxu1 }
 0x132   : > { %v2610_v56 = vpop.f32.mrb[29].mxu0  ;;  %v2698_v18 = vpop.f32.mrb[29].mxu1 }
 0x133   : > { %v3904_v57 = vadd.f32 %v2610_v56, %v2609_v40  ;;  %v2699_v32 = vadd.f32 %v2698_v18, %v2697_v61  ;;  %v2612_v4 = vpop.f32.mrb[30].mxu0  ;;  %v2700_v19 = vpop.f32.mrb[30].mxu1 }
 0x134   : > { %v2613_v26 = vpop.f32.mrb[31].mxu0  ;;  %v2701_v6 = vpop.f32.mrb[31].mxu1 }
 0x135   : > { %v3907_v43 = vadd.f32 %v2699_v32, %v3853_v35  ;;  %v3909_v0 = vadd.f32 %v2613_v26, %v2612_v4  ;;  %v2702_v59 = vadd.f32 %v2701_v6, %v2700_v19 }
 0x136   : > { %2057 = vmatmul.mubr.bf16.gmra.mrb[136].mxu1 %v3773_v53  ;;  %3064 = vmatmul.mubr.bf16.gmra.mrb[136].mxu0 %v3779_v41 }
 0x137   : > { %v3914_v46 = vadd.f32 %v2702_v59, %v3857_v48  ;;  %2064 = vmatprep.mubr.bf16.mxu1 %v851_v5  ;;  %3067 = vmatprep.mubr.bf16.mxu0 %v3813_v33 }
 0x139   : > { %v2615_v44 = vpop.f32.mrb[32].mxu0  ;;  %v2703_v49 = vpop.f32.mrb[32].mxu1 }
 0x13a   : > { %v2616_v15 = vpop.f32.mrb[33].mxu0  ;;  %v2704_v35 = vpop.f32.mrb[33].mxu1 }
 0x13b   : > { %v3917_v31 = vadd.f32 %v2616_v15, %v2615_v44  ;;  %v2705_v53 = vadd.f32 %v2704_v35, %v2703_v49  ;;  %v2618_v16 = vpop.f32.mrb[34].mxu0  ;;  %v2706_v41 = vpop.f32.mrb[34].mxu1 }
 0x13c   : > { %v2619_v50 = vpop.f32.mrb[35].mxu0  ;;  %v2707_v48 = vpop.f32.mrb[35].mxu1 }
 0x13d   : > { %v3920_v9 = vadd.f32 %v2705_v53, %v3865_v14  ;;  %v2620_v33 = vadd.f32 %v2619_v50, %v2618_v16  ;;  %v2708_v51 = vadd.f32 %v2707_v48, %v2706_v41 }
 0x13e   : > { %2065 = vmatmul.mubr.bf16.gmra.mrb[140].mxu1 %v850_v17  ;;  %3068 = vmatmul.mubr.bf16.gmra.mrb[140].mxu0 %v852_v27 }
 0x13f   : > { %v3923_v28 = vadd.f32 %v2708_v51, %v3870_v22 }
 0x141   : > { %v2621_v62 = vpop.f32.mrb[36].mxu0  ;;  %v2709_v38 = vpop.f32.mrb[36].mxu1 }
 0x142   : > { %v2622_v42 = vpop.f32.mrb[37].mxu0  ;;  %v2710_v21 = vpop.f32.mrb[37].mxu1 }
 0x143   : > { %v3925_v2 = vadd.f32 %v2622_v42, %v2621_v62  ;;  %v2711_v24 = vadd.f32 %v2710_v21, %v2709_v38  ;;  %v2624_v54 = vpop.f32.mrb[38].mxu0  ;;  %v2712_v36 = vpop.f32.mrb[38].mxu1 }
 0x144   : > { %v2625_v30 = vpop.f32.mrb[39].mxu0  ;;  %v2713_v11 = vpop.f32.mrb[39].mxu1 }
 0x145   : > { %v3928_v14 = vadd.f32 %v2711_v24, %v3878_v13  ;;  %v2626_v40 = vadd.f32 %v2625_v30, %v2624_v54  ;;  %v2714_v61 = vadd.f32 %v2713_v11, %v2712_v36 }
 0x147   : > { %v3931_v56 = vadd.f32 %v2714_v61, %v3883_v23 }
 0x149   : > { %v2627_v22 = vpop.f32.mrb[40].mxu0  ;;  %v2715_v18 = vpop.f32.mrb[40].mxu1 }
 0x14a   : > { %v2628_v32 = vpop.f32.mrb[41].mxu0  ;;  %v2716_v4 = vpop.f32.mrb[41].mxu1 }
 0x14b   : > { %v3933_v19 = vadd.f32 %v2628_v32, %v2627_v22  ;;  %v2717_v5 = vadd.f32 %v2716_v4, %v2715_v18  ;;  %v2630_v26 = vpop.f32.mrb[42].mxu0  ;;  %v2718_v6 = vpop.f32.mrb[42].mxu1 }
 0x14c   : > { %v2631_v59 = vpop.f32.mrb[43].mxu0  ;;  %v2719_v55 = vpop.f32.mrb[43].mxu1 }
 0x14d   : > { %v3936_v34 = vadd.f32 %v2717_v5, %v3891_v7  ;;  %v3938_v13 = vadd.f32 %v2631_v59, %v2630_v26  ;;  %v2720_v44 = vadd.f32 %v2719_v55, %v2718_v6 }
 0x14f   : > { %v3941_v23 = vadd.f32 %v2720_v44, %v3896_v10 }
 0x151   : > { %v2633_v49 = vpop.f32.mrb[44].mxu0  ;;  %v2721_v15 = vpop.f32.mrb[44].mxu1 }
 0x152   : > { %v2634_v35 = vpop.f32.mrb[45].mxu0  ;;  %v2722_v20 = vpop.f32.mrb[45].mxu1 }
 0x153   : > { %v3943_v17 = vadd.f32 %v2634_v35, %v2633_v49  ;;  %v2723_v27 = vadd.f32 %v2722_v20, %v2721_v15  ;;  %v2636_v53 = vpop.f32.mrb[46].mxu0  ;;  %v2724_v16 = vpop.f32.mrb[46].mxu1 }
 0x154   : > { %v2637_v41 = vpop.f32.mrb[47].mxu0  ;;  %v2725_v50 = vpop.f32.mrb[47].mxu1 }
 0x155   : > { %v3946_v7 = vadd.f32 %v2723_v27, %v3904_v57  ;;  %v3948_v48 = vadd.f32 %v2637_v41, %v2636_v53  ;;  %v2726_v51 = vadd.f32 %v2725_v50, %v2724_v16 }
 0x157   : > { %v3951_v10 = vadd.f32 %v2726_v51, %v3909_v0 }
 0x159   : > { %v2727_v62 = vpop.f32.mrb[48].mxu1  ;;  %v2791_v38 = vpop.f32.mrb[48].mxu0 }
 0x15a   : > { %v2728_v42 = vpop.f32.mrb[49].mxu1  ;;  %v2792_v21 = vpop.f32.mrb[49].mxu0 }
 0x15b   : > { %v2729_v24 = vadd.f32 %v2728_v42, %v2727_v62  ;;  %v2793_v54 = vadd.f32 %v2792_v21, %v2791_v38  ;;  %v2730_v36 = vpop.f32.mrb[50].mxu1  ;;  %v2794_v30 = vpop.f32.mrb[50].mxu0 }
 0x15c   : > { %v2731_v11 = vpop.f32.mrb[51].mxu1  ;;  %v2795_v61 = vpop.f32.mrb[51].mxu0 }
 0x15d   : > { %v3954_v22 = vadd.f32 %v2729_v24, %v3917_v31  ;;  %v3957_v57 = vadd.f32 %v2793_v54, %v3868_v8  ;;  %v2732_v18 = vadd.f32 %v2731_v11, %v2730_v36  ;;  %v2796_v32 = vadd.f32 %v2795_v61, %v2794_v30 }
 0x15f   : > { %v3959_v0 = vadd.f32 %v2732_v18, %v2620_v33  ;;  %v3962_v4 = vadd.f32 %v2796_v32, %v3874_v3 }
 0x161   : > { %v2733_v5 = vpop.f32.mrb[52].mxu1  ;;  %v2797_v26 = vpop.f32.mrb[52].mxu0 }
 0x162   : > { %v2734_v6 = vpop.f32.mrb[53].mxu1  ;;  %v2798_v59 = vpop.f32.mrb[53].mxu0 }
 0x163   : > { %v2735_v55 = vadd.f32 %v2734_v6, %v2733_v5  ;;  %v2799_v44 = vadd.f32 %v2798_v59, %v2797_v26  ;;  %v2736_v49 = vpop.f32.mrb[54].mxu1  ;;  %v2800_v15 = vpop.f32.mrb[54].mxu0 }
 0x164   : > { %v2737_v31 = vpop.f32.mrb[55].mxu1  ;;  %v2801_v35 = vpop.f32.mrb[55].mxu0 }
 0x165   : > { %v3965_v8 = vadd.f32 %v2735_v55, %v3925_v2  ;;  %v3968_v20 = vadd.f32 %v2799_v44, %v3881_v25  ;;  %v2738_v33 = vadd.f32 %v2737_v31, %v2736_v49  ;;  %v2802_v27 = vadd.f32 %v2801_v35, %v2800_v15 }
 0x167   : > { %v3970_v3 = vadd.f32 %v2738_v33, %v2626_v40  ;;  %v3973_v53 = vadd.f32 %v2802_v27, %v3887_v29 }
 0x169   : > { %v2739_v16 = vpop.f32.mrb[56].mxu1  ;;  %v2803_v41 = vpop.f32.mrb[56].mxu0 }
 0x16a   : > { %v2740_v50 = vpop.f32.mrb[57].mxu1  ;;  %v2804_v51 = vpop.f32.mrb[57].mxu0 }
 0x16b   : > { %v2741_v62 = vadd.f32 %v2740_v50, %v2739_v16  ;;  %v2805_v38 = vadd.f32 %v2804_v51, %v2803_v41  ;;  %v2742_v42 = vpop.f32.mrb[58].mxu1  ;;  %v2806_v21 = vpop.f32.mrb[58].mxu0 }
 0x16c   : > { %v2743_v2 = vpop.f32.mrb[59].mxu1  ;;  %v2807_v24 = vpop.f32.mrb[59].mxu0 }
 0x16d   : > { %v3976_v25 = vadd.f32 %v2741_v62, %v3933_v19  ;;  %v3979_v54 = vadd.f32 %v2805_v38, %v3894_v52  ;;  %v2744_v40 = vadd.f32 %v2743_v2, %v2742_v42  ;;  %v2808_v36 = vadd.f32 %v2807_v24, %v2806_v21 }
 0x16f   : > { %v3982_v29 = vadd.f32 %v2744_v40, %v3938_v13  ;;  %v3985_v30 = vadd.f32 %v2808_v36, %v3900_v58 }
 0x171   : > { %v2745_v11 = vpop.f32.mrb[60].mxu1  ;;  %v2809_v61 = vpop.f32.mrb[60].mxu0 }
 0x172   : > { %v2746_v18 = vpop.f32.mrb[61].mxu1  ;;  %v2810_v32 = vpop.f32.mrb[61].mxu0 }
 0x173   : > { %v2747_v5 = vadd.f32 %v2746_v18, %v2745_v11  ;;  %v2811_v26 = vadd.f32 %v2810_v32, %v2809_v61  ;;  %v2748_v6 = vpop.f32.mrb[62].mxu1  ;;  %v2812_v19 = vpop.f32.mrb[62].mxu0 }
 0x174   : > { %v2749_v59 = vpop.f32.mrb[63].mxu1  ;;  %v2813_v55 = vpop.f32.mrb[63].mxu0 }
 0x175   : > { %v3988_v52 = vadd.f32 %v2747_v5, %v3943_v17  ;;  %v3991_v44 = vadd.f32 %v2811_v26, %v3907_v43  ;;  %v2750_v13 = vadd.f32 %v2749_v59, %v2748_v6  ;;  %v2814_v49 = vadd.f32 %v2813_v55, %v2812_v19 }
 0x177   : > { %v3994_v58 = vadd.f32 %v2750_v13, %v3948_v48  ;;  %v3997_v15 = vadd.f32 %v2814_v49, %v3914_v46 }
 0x179   : > { %v2751_v31 = vpop.f32.mrb[64].mxu1  ;;  %v2815_v35 = vpop.f32.mrb[64].mxu0 }
 0x17a   : > { %v2752_v33 = vpop.f32.mrb[65].mxu1  ;;  %v2816_v27 = vpop.f32.mrb[65].mxu0 }
 0x17b   : > { %v2753_v16 = vadd.f32 %v2752_v33, %v2751_v31  ;;  %v2817_v41 = vadd.f32 %v2816_v27, %v2815_v35  ;;  %v2754_v50 = vpop.f32.mrb[66].mxu1  ;;  %v2818_v17 = vpop.f32.mrb[66].mxu0 }
 0x17c   : > { %v2755_v51 = vpop.f32.mrb[67].mxu1  ;;  %v2819_v62 = vpop.f32.mrb[67].mxu0 }
 0x17d   : > { %v4000_v43 = vadd.f32 %v2753_v16, %v3821_v37  ;;  %v4003_v38 = vadd.f32 %v2817_v41, %v3920_v9  ;;  %v2756_v48 = vadd.f32 %v2755_v51, %v2754_v50  ;;  %v2820_v42 = vadd.f32 %v2819_v62, %v2818_v17 }
 0x17f   : > { %v4006_v46 = vadd.f32 %v2756_v48, %v3825_v60  ;;  %v4009_v21 = vadd.f32 %v2820_v42, %v3923_v28 }
 0x181   : > { %v2757_v2 = vpop.f32.mrb[68].mxu1  ;;  %v2821_v24 = vpop.f32.mrb[68].mxu0 }
 0x182   : > { %v2758_v40 = vpop.f32.mrb[69].mxu1  ;;  %v2822_v36 = vpop.f32.mrb[69].mxu0 }
 0x183   : > { %v2759_v11 = vadd.f32 %v2758_v40, %v2757_v2  ;;  %v2823_v61 = vadd.f32 %v2822_v36, %v2821_v24  ;;  %v2760_v18 = vpop.f32.mrb[70].mxu1  ;;  %v2824_v37 = vpop.f32.mrb[70].mxu0 }
 0x184   : > { %v2761_v32 = vpop.f32.mrb[71].mxu1  ;;  %v2825_v5 = vpop.f32.mrb[71].mxu0 }
 0x185   : > { %v4012_v9 = vadd.f32 %v2759_v11, %v3832_v1  ;;  %v4015_v26 = vadd.f32 %v2823_v61, %v3928_v14  ;;  %v2762_v60 = vadd.f32 %v2761_v32, %v2760_v18  ;;  %v2826_v6 = vadd.f32 %v2825_v5, %v2824_v37 }
 0x187   : > { %v4018_v28 = vadd.f32 %v2762_v60, %v3836_v39  ;;  %v4021_v19 = vadd.f32 %v2826_v6, %v3931_v56 }
 0x189   : > { %v2763_v59 = vpop.f32.mrb[72].mxu1  ;;  %v2827_v55 = vpop.f32.mrb[72].mxu0 }
 0x18a   : > { %v2764_v13 = vpop.f32.mrb[73].mxu1  ;;  %v2828_v49 = vpop.f32.mrb[73].mxu0 }
 0x18b   : > { %v2765_v31 = vadd.f32 %v2764_v13, %v2763_v59  ;;  %v2829_v35 = vadd.f32 %v2828_v49, %v2827_v55  ;;  %v2766_v33 = vpop.f32.mrb[74].mxu1  ;;  %v2830_v1 = vpop.f32.mrb[74].mxu0 }
 0x18c   : > { %v2767_v27 = vpop.f32.mrb[75].mxu1  ;;  %v2831_v16 = vpop.f32.mrb[75].mxu0 }
 0x18d   : > { %v4024_v14 = vadd.f32 %v2765_v31, %v3843_v47  ;;  %v4027_v41 = vadd.f32 %v2829_v35, %v3936_v34  ;;  %v2768_v39 = vadd.f32 %v2767_v27, %v2766_v33  ;;  %v2832_v50 = vadd.f32 %v2831_v16, %v2830_v1 }
 0x18f   : > { %v4030_v56 = vadd.f32 %v2768_v39, %v3847_v45  ;;  %v4033_v17 = vadd.f32 %v2832_v50, %v3941_v23 }
 0x191   : > { %v2769_v51 = vpop.f32.mrb[76].mxu1  ;;  %v2833_v62 = vpop.f32.mrb[76].mxu0 }
 0x192   : > { %v2770_v48 = vpop.f32.mrb[77].mxu1  ;;  %v2834_v42 = vpop.f32.mrb[77].mxu0 }
 0x193   : > { %v2771_v2 = vadd.f32 %v2770_v48, %v2769_v51  ;;  %v2835_v24 = vadd.f32 %v2834_v42, %v2833_v62  ;;  %v2772_v40 = vpop.f32.mrb[78].mxu1  ;;  %v2836_v47 = vpop.f32.mrb[78].mxu0 }
 0x194   : > { %v2773_v36 = vpop.f32.mrb[79].mxu1  ;;  %v2837_v11 = vpop.f32.mrb[79].mxu0 }
 0x195   : > { %v4036_v34 = vadd.f32 %v2771_v2, %v3855_v12  ;;  %v4039_v61 = vadd.f32 %v2835_v24, %v3946_v7  ;;  %v2774_v45 = vadd.f32 %v2773_v36, %v2772_v40  ;;  %v2838_v18 = vadd.f32 %v2837_v11, %v2836_v47 }
 0x197   : > { %v4042_v23 = vadd.f32 %v2774_v45, %v3859_v63  ;;  %v4045_v37 = vadd.f32 %v2838_v18, %v3951_v10 }
 0x199   : > { %v2839_v32 = vpop.f32.mrb[80].mxu0  ;;  %v2903_v5 = vpop.f32.mrb[80].mxu1 }
 0x19a   : > { %v2840_v60 = vpop.f32.mrb[81].mxu0  ;;  %v2904_v6 = vpop.f32.mrb[81].mxu1 }
 0x19b   : > { %v2841_v59 = vadd.f32 %v2840_v60, %v2839_v32  ;;  %v2905_v55 = vadd.f32 %v2904_v6, %v2903_v5  ;;  %v2842_v13 = vpop.f32.mrb[82].mxu0  ;;  %v2906_v12 = vpop.f32.mrb[82].mxu1 }
 0x19c   : > { %v2843_v49 = vpop.f32.mrb[83].mxu0  ;;  %v2907_v31 = vpop.f32.mrb[83].mxu1 }
 0x19d   : > { %v4048_v7 = vadd.f32 %v2841_v59, %v3954_v22  ;;  %v2844_v35 = vadd.f32 %v2843_v49, %v2842_v13  ;;  %v2908_v33 = vadd.f32 %v2907_v31, %v2906_v12  ;;  %v4051_v63 = vadd.f32 %v2905_v55, %v3957_v57 }
 0x19f   : > { %v4054_v10 = vadd.f32 %v2844_v35, %v3959_v0  ;;  %v4057_v1 = vadd.f32 %v2908_v33, %v3962_v4 }
 0x1a1   : > { %v2845_v27 = vpop.f32.mrb[84].mxu0  ;;  %v2909_v16 = vpop.f32.mrb[84].mxu1 }
 0x1a2   : > { %v2846_v39 = vpop.f32.mrb[85].mxu0  ;;  %v2910_v50 = vpop.f32.mrb[85].mxu1 }
 0x1a3   : > { %v2847_v51 = vadd.f32 %v2846_v39, %v2845_v27  ;;  %v2911_v62 = vadd.f32 %v2910_v50, %v2909_v16  ;;  %v2848_v48 = vpop.f32.mrb[86].mxu0  ;;  %v2912_v22 = vpop.f32.mrb[86].mxu1 }
 0x1a4   : > { %v2849_v42 = vpop.f32.mrb[87].mxu0  ;;  %v2913_v2 = vpop.f32.mrb[87].mxu1 }
 0x1a5   : > { %v4060_v24 = vadd.f32 %v2847_v51, %v3965_v8  ;;  %v2850_v57 = vadd.f32 %v2849_v42, %v2848_v48  ;;  %v2914_v40 = vadd.f32 %v2913_v2, %v2912_v22  ;;  %v4063_v0 = vadd.f32 %v2911_v62, %v3968_v20 }
 0x1a7   : > { %v4066_v4 = vadd.f32 %v2850_v57, %v3970_v3  ;;  %v4069_v47 = vadd.f32 %v2914_v40, %v3973_v53 }
 0x1a9   : > { %v2851_v36 = vpop.f32.mrb[88].mxu0  ;;  %v2915_v11 = vpop.f32.mrb[88].mxu1 }
 0x1aa   : > { %v2852_v45 = vpop.f32.mrb[89].mxu0  ;;  %v2916_v18 = vpop.f32.mrb[89].mxu1 }
 0x1ab   : > { %v2853_v32 = vadd.f32 %v2852_v45, %v2851_v36  ;;  %v2917_v5 = vadd.f32 %v2916_v18, %v2915_v11  ;;  %v2854_v60 = vpop.f32.mrb[90].mxu0  ;;  %v2918_v8 = vpop.f32.mrb[90].mxu1 }
 0x1ac   : > { %v2855_v6 = vpop.f32.mrb[91].mxu0  ;;  %v2919_v59 = vpop.f32.mrb[91].mxu1 }
 0x1ad   : > { %v4072_v55 = vadd.f32 %v2853_v32, %v3976_v25  ;;  %v2856_v20 = vadd.f32 %v2855_v6, %v2854_v60  ;;  %v2920_v13 = vadd.f32 %v2919_v59, %v2918_v8  ;;  %v4075_v3 = vadd.f32 %v2917_v5, %v3979_v54 }
 0x1af   : > { %v4078_v53 = vadd.f32 %v2856_v20, %v3982_v29  ;;  %v4081_v12 = vadd.f32 %v2920_v13, %v3985_v30 }
 0x1b1   : > { %v2857_v49 = vpop.f32.mrb[92].mxu0  ;;  %v2921_v31 = vpop.f32.mrb[92].mxu1 }
 0x1b2   : > { %v2858_v35 = vpop.f32.mrb[93].mxu0  ;;  %v2922_v33 = vpop.f32.mrb[93].mxu1 }
 0x1b3   : > { %v2859_v27 = vadd.f32 %v2858_v35, %v2857_v49  ;;  %v2923_v16 = vadd.f32 %v2922_v33, %v2921_v31  ;;  %v2860_v39 = vpop.f32.mrb[94].mxu0  ;;  %v2924_v25 = vpop.f32.mrb[94].mxu1 }
 0x1b4   : > { %v2861_v50 = vpop.f32.mrb[95].mxu0  ;;  %v2925_v51 = vpop.f32.mrb[95].mxu1 }
 0x1b5   : > { %v4084_v62 = vadd.f32 %v2859_v27, %v3988_v52  ;;  %v2862_v54 = vadd.f32 %v2861_v50, %v2860_v39  ;;  %v2926_v48 = vadd.f32 %v2925_v51, %v2924_v25  ;;  %v4087_v29 = vadd.f32 %v2923_v16, %v3991_v44 }
 0x1b7   : > { %v4090_v30 = vadd.f32 %v2862_v54, %v3994_v58  ;;  %v4093_v22 = vadd.f32 %v2926_v48, %v3997_v15 }
 0x1b9   : > { %v2863_v42 = vpop.f32.mrb[96].mxu0  ;;  %v2927_v2 = vpop.f32.mrb[96].mxu1 }
 0x1ba   : > { %v2864_v57 = vpop.f32.mrb[97].mxu0  ;;  %v2928_v40 = vpop.f32.mrb[97].mxu1 }
 0x1bb   : > { %v2865_v36 = vadd.f32 %v2864_v57, %v2863_v42  ;;  %v2929_v11 = vadd.f32 %v2928_v40, %v2927_v2  ;;  %v2866_v45 = vpop.f32.mrb[98].mxu0  ;;  %v2930_v52 = vpop.f32.mrb[98].mxu1 }
 0x1bc   : > { %v2867_v18 = vpop.f32.mrb[99].mxu0  ;;  %v2931_v32 = vpop.f32.mrb[99].mxu1 }
 0x1bd   : > { %v4096_v5 = vadd.f32 %v2865_v36, %v4000_v43  ;;  %v2868_v44 = vadd.f32 %v2867_v18, %v2866_v45  ;;  %v2932_v60 = vadd.f32 %v2931_v32, %v2930_v52  ;;  %v4099_v58 = vadd.f32 %v2929_v11, %v4003_v38 }
 0x1bf   : > { %v4102_v15 = vadd.f32 %v2868_v44, %v4006_v46  ;;  %v4105_v8 = vadd.f32 %v2932_v60, %v4009_v21 }
 0x1c1   : > { %v2869_v6 = vpop.f32.mrb[100].mxu0  ;;  %v2933_v59 = vpop.f32.mrb[100].mxu1 }
 0x1c2   : > { %v2870_v20 = vpop.f32.mrb[101].mxu0  ;;  %v2934_v13 = vpop.f32.mrb[101].mxu1 }
 0x1c3   : > { %v2871_v49 = vadd.f32 %v2870_v20, %v2869_v6  ;;  %v2935_v31 = vadd.f32 %v2934_v13, %v2933_v59  ;;  %v2872_v35 = vpop.f32.mrb[102].mxu0  ;;  %v2936_v43 = vpop.f32.mrb[102].mxu1 }
 0x1c4   : > { %v2873_v33 = vpop.f32.mrb[103].mxu0  ;;  %v2937_v27 = vpop.f32.mrb[103].mxu1 }
 0x1c5   : > { %v4108_v16 = vadd.f32 %v2871_v49, %v4012_v9  ;;  %v2874_v38 = vadd.f32 %v2873_v33, %v2872_v35  ;;  %v2938_v39 = vadd.f32 %v2937_v27, %v2936_v43  ;;  %v4111_v46 = vadd.f32 %v2935_v31, %v4015_v26 }
 0x1c7   : > { %v4114_v21 = vadd.f32 %v2874_v38, %v4018_v28  ;;  %v4117_v25 = vadd.f32 %v2938_v39, %v4021_v19 }
 0x1c9   : > { %v2875_v50 = vpop.f32.mrb[104].mxu0  ;;  %v2939_v51 = vpop.f32.mrb[104].mxu1 }
 0x1ca   : > { %v2876_v54 = vpop.f32.mrb[105].mxu0  ;;  %v2940_v48 = vpop.f32.mrb[105].mxu1 }
 0x1cb   : > { %v2877_v42 = vadd.f32 %v2876_v54, %v2875_v50  ;;  %v2941_v2 = vadd.f32 %v2940_v48, %v2939_v51  ;;  %v2878_v57 = vpop.f32.mrb[106].mxu0  ;;  %v2942_v9 = vpop.f32.mrb[106].mxu1 }
 0x1cc   : > { %v2879_v40 = vpop.f32.mrb[107].mxu0  ;;  %v2943_v36 = vpop.f32.mrb[107].mxu1 }
 0x1cd   : > { %v4120_v11 = vadd.f32 %v2877_v42, %v4024_v14  ;;  %v2880_v26 = vadd.f32 %v2879_v40, %v2878_v57  ;;  %v2944_v45 = vadd.f32 %v2943_v36, %v2942_v9  ;;  %v4123_v28 = vadd.f32 %v2941_v2, %v4027_v41 }
 0x1cf   : > { %v4126_v19 = vadd.f32 %v2880_v26, %v4030_v56  ;;  %v4129_v52 = vadd.f32 %v2944_v45, %v4033_v17 }
 0x1d1   : > { %v2881_v18 = vpop.f32.mrb[108].mxu0  ;;  %v2945_v32 = vpop.f32.mrb[108].mxu1 }
 0x1d2   : > { %v2882_v44 = vpop.f32.mrb[109].mxu0  ;;  %v2946_v60 = vpop.f32.mrb[109].mxu1 }
 0x1d3   : > { %v2883_v6 = vadd.f32 %v2882_v44, %v2881_v18  ;;  %v2947_v59 = vadd.f32 %v2946_v60, %v2945_v32  ;;  %v2884_v14 = vpop.f32.mrb[110].mxu0  ;;  %v2948_v20 = vpop.f32.mrb[110].mxu1 }
 0x1d4   : > { %v2885_v13 = vpop.f32.mrb[111].mxu0  ;;  %v2949_v49 = vpop.f32.mrb[111].mxu1 }
 0x1d5   : > { %v4132_v41 = vadd.f32 %v2883_v6, %v4036_v34  ;;  %v2886_v31 = vadd.f32 %v2885_v13, %v2884_v14  ;;  %v2950_v56 = vadd.f32 %v2949_v49, %v2948_v20  ;;  %v4135_v35 = vadd.f32 %v2947_v59, %v4039_v61 }
 0x1d7   : > { %v4138_v17 = vadd.f32 %v2886_v31, %v4042_v23  ;;  %v4141_v43 = vadd.f32 %v2950_v56, %v4045_v37 }
 0x1d9   : > { %v2951_v33 = vpop.f32.mrb[112].mxu1  ;;  %v3041_v34 = vpop.f32.mrb[112].mxu0 }
 0x1da   : > { %v2116_v61 = vadd.f32 %v3041_v34, %v4063_v0  ;;  %v2952_v27 = vpop.f32.mrb[113].mxu1  ;;  %v2107_v23 = vpop.f32.mrb[113].mxu0 }
 0x1db   : > { %v2953_v38 = vadd.f32 %v2952_v27, %v2951_v33  ;;  %v2108_v37 = vadd.f32 %v2107_v23, %v4051_v63  ;;  %v2954_v39 = vpop.f32.mrb[114].mxu1  ;;  %v3042_v50 = vpop.f32.mrb[114].mxu0 }
 0x1dc   : > { %2236 = vst [vmem:[%s4148_s11 + $0x10] sm:$0xff] %v2116_v61  ;;  %v2119_v51 = vadd.f32 %v3042_v50, %v4069_v47  ;;  %v2955_v54 = vpop.f32.mrb[115].mxu1  ;;  %v2110_v48 = vpop.f32.mrb[115].mxu0  ;;  %v2305_v36 = vmul.f32 %v2116_v61, %v2116_v61 }
 0x1dd   : > { %2234 = vst [vmem:[%s4148_s11] sm:$0xff] %v2108_v37  ;;  %v2956_v42 = vadd.f32 %v2955_v54, %v2954_v39  ;;  %v2111_v2 = vadd.f32 %v2110_v48, %v4057_v1  ;;  %v4157_v57 = vadd.f32 %v2953_v38, %v4048_v7  ;;  %v2303_v0 = vmul.f32 %v2108_v37, %v2108_v37 }
 0x1de   : > { %2237 = vst [vmem:[%s4148_s11 + $0x18] sm:$0xff] %v2119_v51  ;;  %v2306_v32 = vmul.f32 %v2119_v51, %v2119_v51 }
 0x1df   : > { %2235 = vst [vmem:[%s4148_s11 + $0x8] sm:$0xff] %v2111_v2  ;;  %v2266_v9 = vadd.f32 %v2111_v2, %v2108_v37  ;;  %v2304_v40 = vmul.f32 %v2111_v2, %v2111_v2  ;;  %v4162_v63 = vadd.f32 %v2956_v42, %v4054_v10 }
 0x1e1   : > { %v2267_v47 = vadd.f32 %v2266_v9, %v2116_v61  ;;  %v2335_v26 = vadd.f32 %v2304_v40, %v2303_v0  ;;  %v2957_v45 = vpop.f32.mrb[116].mxu1  ;;  %v3045_v18 = vpop.f32.mrb[116].mxu0 }
 0x1e2   : > { %v2132_v1 = vadd.f32 %v3045_v18, %v4087_v29  ;;  %v2958_v7 = vpop.f32.mrb[117].mxu1  ;;  %v2123_v44 = vpop.f32.mrb[117].mxu0 }
 0x1e3   : > { %v2336_v60 = vadd.f32 %v2335_v26, %v2305_v36  ;;  %v2959_v6 = vadd.f32 %v2958_v7, %v2957_v45  ;;  %v2124_v59 = vadd.f32 %v2123_v44, %v4075_v3  ;;  %v2268_v14 = vadd.f32 %v2267_v47, %v2119_v51  ;;  %v2960_v10 = vpop.f32.mrb[118].mxu1  ;;  %v3046_v20 = vpop.f32.mrb[118].mxu0 }
 0x1e4   : > { %2240 = vst [vmem:[%s4148_s11 + $0x30] sm:$0xff] %v2132_v1  ;;  %v2135_v13 = vadd.f32 %v3046_v20, %v4093_v22  ;;  %v2961_v49 = vpop.f32.mrb[119].mxu1  ;;  %v2126_v31 = vpop.f32.mrb[119].mxu0  ;;  %v2309_v50 = vmul.f32 %v2132_v1, %v2132_v1 }
 0x1e5   : > { %2238 = vst [vmem:[%s4148_s11 + $0x20] sm:$0xff] %v2124_v59  ;;  %v2269_v56 = vadd.f32 %v2268_v14, %v2124_v59  ;;  %v2307_v33 = vmul.f32 %v2124_v59, %v2124_v59  ;;  %v2337_v29 = vadd.f32 %v2336_v60, %v2306_v32  ;;  %v2962_v34 = vadd.f32 %v2961_v49, %v2960_v10 }
 0x1e6   : > { %2241 = vst [vmem:[%s4148_s11 + $0x38] sm:$0xff] %v2135_v13  ;;  %v2127_v61 = vadd.f32 %v2126_v31, %v4081_v12  ;;  %v4172_v27 = vadd.f32 %v2959_v6, %v4060_v24  ;;  %v2310_v9 = vmul.f32 %v2135_v13, %v2135_v13 }
 0x1e7   : > { %v2338_v3 = vadd.f32 %v2337_v29, %v2307_v33  ;;  %v4175_v23 = vadd.f32 %v2962_v34, %v4066_v4 }
 0x1e8   : > { %2239 = vst [vmem:[%s4148_s11 + $0x28] sm:$0xff] %v2127_v61  ;;  %v2270_v38 = vadd.f32 %v2269_v56, %v2127_v61  ;;  %v2308_v22 = vmul.f32 %v2127_v61, %v2127_v61 }
 0x1e9   : > { %v2963_v37 = vpop.f32.mrb[120].mxu1  ;;  %v3049_v39 = vpop.f32.mrb[120].mxu0 }
 0x1ea   : > { %v2271_v51 = vadd.f32 %v2270_v38, %v2132_v1  ;;  %v2339_v54 = vadd.f32 %v2338_v3, %v2308_v22  ;;  %v2148_v48 = vadd.f32 %v3049_v39, %v4111_v46  ;;  %v2964_v12 = vpop.f32.mrb[121].mxu1  ;;  %v2139_v42 = vpop.f32.mrb[121].mxu0 }
 0x1eb   : > { %v2965_v24 = vadd.f32 %v2964_v12, %v2963_v37  ;;  %v2140_v2 = vadd.f32 %v2139_v42, %v4099_v58  ;;  %v2966_v0 = vpop.f32.mrb[122].mxu1  ;;  %v3050_v4 = vpop.f32.mrb[122].mxu0 }
 0x1ec   : > { %v2340_v40 = vadd.f32 %v2339_v54, %v2309_v50  ;;  %2244 = vst [vmem:[%s4148_s11 + $0x50] sm:$0xff] %v2148_v48  ;;  %v2272_v36 = vadd.f32 %v2271_v51, %v2135_v13  ;;  %v2151_v47 = vadd.f32 %v3050_v4, %v4117_v25  ;;  %v2967_v26 = vpop.f32.mrb[123].mxu1  ;;  %v2142_v45 = vpop.f32.mrb[123].mxu0  ;;  %v2313_v10 = vmul.f32 %v2148_v48, %v2148_v48 }
 0x1ed   : > { %2242 = vst [vmem:[%s4148_s11 + $0x40] sm:$0xff] %v2140_v2  ;;  %v2311_v18 = vmul.f32 %v2140_v2, %v2140_v2  ;;  %v2968_v46 = vadd.f32 %v2967_v26, %v2966_v0  ;;  %v2143_v32 = vadd.f32 %v2142_v45, %v4105_v8  ;;  %v4185_v1 = vadd.f32 %v2965_v24, %v4072_v55 }
 0x1ee   : > { %v2273_v58 = vadd.f32 %v2272_v36, %v2140_v2  ;;  %v2341_v7 = vadd.f32 %v2340_v40, %v2310_v9  ;;  %2245 = vst [vmem:[%s4148_s11 + $0x58] sm:$0xff] %v2151_v47  ;;  %v2314_v29 = vmul.f32 %v2151_v47, %v2151_v47 }
 0x1ef   : > { %2243 = vst [vmem:[%s4148_s11 + $0x48] sm:$0xff] %v2143_v32  ;;  %v2312_v44 = vmul.f32 %v2143_v32, %v2143_v32  ;;  %v4190_v60 = vadd.f32 %v2968_v46, %v4078_v53 }
 0x1f0   : > { %v2342_v6 = vadd.f32 %v2341_v7, %v2311_v18  ;;  %v2274_v25 = vadd.f32 %v2273_v58, %v2143_v32 }
 0x1f1   : > { %v2969_v59 = vpop.f32.mrb[124].mxu1  ;;  %v3053_v14 = vpop.f32.mrb[124].mxu0 }
 0x1f2   : > { %v2275_v20 = vadd.f32 %v2274_v25, %v2148_v48  ;;  %v2343_v8 = vadd.f32 %v2342_v6, %v2312_v44  ;;  %v2164_v55 = vadd.f32 %v3053_v14, %v4135_v35  ;;  %v2970_v13 = vpop.f32.mrb[125].mxu1  ;;  %v2155_v49 = vpop.f32.mrb[125].mxu0 }
 0x1f3   : > { %v2971_v31 = vadd.f32 %v2970_v13, %v2969_v59  ;;  %v2156_v56 = vadd.f32 %v2155_v49, %v4123_v28  ;;  %v2972_v33 = vpop.f32.mrb[126].mxu1  ;;  %v3054_v53 = vpop.f32.mrb[126].mxu0 }
 0x1f4   : > { %v2344_v34 = vadd.f32 %v2343_v8, %v2313_v10  ;;  %2248 = vst [vmem:[%s4148_s11 + $0x70] sm:$0xff] %v2164_v55  ;;  %v2276_v61 = vadd.f32 %v2275_v20, %v2151_v47  ;;  %v2167_v3 = vadd.f32 %v3054_v53, %v4141_v43  ;;  %v2973_v38 = vpop.f32.mrb[127].mxu1  ;;  %v2158_v22 = vpop.f32.mrb[127].mxu0  ;;  %v2317_v2 = vmul.f32 %v2164_v55, %v2164_v55 }
 0x1f5   : > { %2246 = vst [vmem:[%s4148_s11 + $0x60] sm:$0xff] %v2156_v56  ;;  %v2315_v37 = vmul.f32 %v2156_v56, %v2156_v56  ;;  %v2974_v35 = vadd.f32 %v2973_v38, %v2972_v33  ;;  %v2159_v39 = vadd.f32 %v2158_v22, %v4129_v52  ;;  %v2035_v50 = vadd.f32 %v2971_v31, %v4084_v62 }
 0x1f6   : > { %v2277_v28 = vadd.f32 %v2276_v61, %v2156_v56  ;;  %v2345_v51 = vadd.f32 %v2344_v34, %v2314_v29  ;;  %2249 = vst [vmem:[%s4148_s11 + $0x78] sm:$0xff] %v2167_v3 }
 0x1f7   : > { %2247 = vst [vmem:[%s4148_s11 + $0x68] sm:$0xff] %v2159_v39  ;;  %v2316_v54 = vmul.f32 %v2159_v39, %v2159_v39  ;;  %v2038_v48 = vadd.f32 %v2974_v35, %v4090_v30  ;;  %v2318_v30 = vmul.f32 %v2167_v3, %v2167_v3 }
 0x1f8   : > { %v2346_v12 = vadd.f32 %v2345_v51, %v2315_v37  ;;  %v2278_v42 = vadd.f32 %v2277_v28, %v2159_v39 }
 0x1f9   : > { %v2975_v43 = vpop.f32.mrb[128].mxu1  ;;  %v3057_v24 = vpop.f32.mrb[128].mxu0 }
 0x1fa   : > { %v2279_v0 = vadd.f32 %v2278_v42, %v2164_v55  ;;  %v2347_v4 = vadd.f32 %v2346_v12, %v2316_v54  ;;  %v2180_v52 = vadd.f32 %v3057_v24, %v4172_v27  ;;  %v2976_v9 = vpop.f32.mrb[129].mxu1  ;;  %v2171_v62 = vpop.f32.mrb[129].mxu0 }
 0x1fb   : > { %v2977_v40 = vadd.f32 %v2976_v9, %v2975_v43  ;;  %v2172_v36 = vadd.f32 %v2171_v62, %v4157_v57  ;;  %v2978_v47 = vpop.f32.mrb[130].mxu1  ;;  %v3058_v26 = vpop.f32.mrb[130].mxu0 }
 0x1fc   : > { %v2348_v45 = vadd.f32 %v2347_v4, %v2317_v2  ;;  %2252 = vst [vmem:[%s4148_s11 + $0x90] sm:$0xff] %v2180_v52  ;;  %v2280_v18 = vadd.f32 %v2279_v0, %v2167_v3  ;;  %v2183_v46 = vadd.f32 %v3058_v26, %v4175_v23  ;;  %v2979_v32 = vpop.f32.mrb[131].mxu1  ;;  %v2174_v58 = vpop.f32.mrb[131].mxu0  ;;  %v2321_v55 = vmul.f32 %v2180_v52, %v2180_v52 }
 0x1fd   : > { %2250 = vst [vmem:[%s4148_s11 + $0x80] sm:$0xff] %v2172_v36  ;;  %v2319_v7 = vmul.f32 %v2172_v36, %v2172_v36  ;;  %v2980_v27 = vadd.f32 %v2979_v32, %v2978_v47  ;;  %v2175_v44 = vadd.f32 %v2174_v58, %v4162_v63  ;;  %v2043_v6 = vadd.f32 %v2977_v40, %v4096_v5 }
 0x1fe   : > { %v2281_v57 = vadd.f32 %v2280_v18, %v2172_v36  ;;  %v2349_v25 = vadd.f32 %v2348_v45, %v2318_v30  ;;  %2253 = vst [vmem:[%s4148_s11 + $0x98] sm:$0xff] %v2183_v46 }
 0x1ff   : > { %2251 = vst [vmem:[%s4148_s11 + $0x88] sm:$0xff] %v2175_v44  ;;  %v2320_v59 = vmul.f32 %v2175_v44, %v2175_v44  ;;  %v2046_v14 = vadd.f32 %v2980_v27, %v4102_v15  ;;  %v2322_v15 = vmul.f32 %v2183_v46, %v2183_v46 }
 0x200   : > { %v2350_v10 = vadd.f32 %v2349_v25, %v2319_v7  ;;  %v2282_v20 = vadd.f32 %v2281_v57, %v2175_v44 }
 0x201   : > { %v2981_v23 = vpop.f32.mrb[132].mxu1  ;;  %v3061_v8 = vpop.f32.mrb[132].mxu0 }
 0x202   : > { %v2283_v13 = vadd.f32 %v2282_v20, %v2180_v52  ;;  %v2351_v49 = vadd.f32 %v2350_v10, %v2320_v59  ;;  %v2196_v31 = vadd.f32 %v3061_v8, %v2035_v50  ;;  %v2982_v63 = vpop.f32.mrb[133].mxu1  ;;  %v2187_v56 = vpop.f32.mrb[133].mxu0 }
 0x203   : > { %v2983_v5 = vadd.f32 %v2982_v63, %v2981_v23  ;;  %v2188_v33 = vadd.f32 %v2187_v56, %v4185_v1  ;;  %v2984_v53 = vpop.f32.mrb[134].mxu1  ;;  %v3062_v29 = vpop.f32.mrb[134].mxu0 }
 0x204   : > { %v2352_v34 = vadd.f32 %v2351_v49, %v2321_v55  ;;  %2256 = vst [vmem:[%s4148_s11 + $0xb0] sm:$0xff] %v2196_v31  ;;  %v2284_v61 = vadd.f32 %v2283_v13, %v2183_v46  ;;  %v2199_v3 = vadd.f32 %v3062_v29, %v2038_v48  ;;  %v2985_v38 = vpop.f32.mrb[135].mxu1  ;;  %v2190_v22 = vpop.f32.mrb[135].mxu0  ;;  %v2325_v24 = vmul.f32 %v2196_v31, %v2196_v31 }
 0x205   : > { %2254 = vst [vmem:[%s4148_s11 + $0xa0] sm:$0xff] %v2188_v33  ;;  %v2323_v37 = vmul.f32 %v2188_v33, %v2188_v33  ;;  %v2986_v35 = vadd.f32 %v2985_v38, %v2984_v53  ;;  %v2191_v39 = vadd.f32 %v2190_v22, %v4190_v60  ;;  %v2051_v50 = vadd.f32 %v2983_v5, %v4108_v16 }
 0x206   : > { %v2285_v28 = vadd.f32 %v2284_v61, %v2188_v33  ;;  %v2353_v1 = vadd.f32 %v2352_v34, %v2322_v15  ;;  %2257 = vst [vmem:[%s4148_s11 + $0xb8] sm:$0xff] %v2199_v3  ;;  %v2326_v36 = vmul.f32 %v2199_v3, %v2199_v3 }
 0x207   : > { %2255 = vst [vmem:[%s4148_s11 + $0xa8] sm:$0xff] %v2191_v39  ;;  %v2324_v51 = vmul.f32 %v2191_v39, %v2191_v39  ;;  %v2054_v54 = vadd.f32 %v2986_v35, %v4114_v21 }
 0x208   : > { %v2354_v12 = vadd.f32 %v2353_v1, %v2323_v37  ;;  %v2286_v42 = vadd.f32 %v2285_v28, %v2191_v39 }
 0x209   : > { %v2987_v48 = vpop.f32.mrb[136].mxu1  ;;  %v3065_v43 = vpop.f32.mrb[136].mxu0 }
 0x20a   : > { %v2287_v2 = vadd.f32 %v2286_v42, %v2196_v31  ;;  %v2355_v0 = vadd.f32 %v2354_v12, %v2324_v51  ;;  %v2212_v4 = vadd.f32 %v3065_v43, %v2051_v50  ;;  %v2988_v60 = vpop.f32.mrb[137].mxu1  ;;  %v2203_v52 = vpop.f32.mrb[137].mxu0 }
 0x20b   : > { %v2989_v16 = vadd.f32 %v2988_v60, %v2987_v48  ;;  %v2204_v9 = vadd.f32 %v2203_v52, %v2043_v6  ;;  %v2990_v62 = vpop.f32.mrb[138].mxu1  ;;  %v3066_v40 = vpop.f32.mrb[138].mxu0 }
 0x20c   : > { %v2356_v21 = vadd.f32 %v2355_v0, %v2325_v24  ;;  %2260 = vst [vmem:[%s4148_s11 + $0xd0] sm:$0xff] %v2212_v4  ;;  %v2288_v47 = vadd.f32 %v2287_v2, %v2199_v3  ;;  %v2215_v26 = vadd.f32 %v3066_v40, %v2054_v54  ;;  %v2991_v30 = vpop.f32.mrb[139].mxu1  ;;  %v2206_v45 = vpop.f32.mrb[139].mxu0  ;;  %v2329_v20 = vmul.f32 %v2212_v4, %v2212_v4 }
 0x20d   : > { %2258 = vst [vmem:[%s4148_s11 + $0xc0] sm:$0xff] %v2204_v9  ;;  %v2327_v18 = vmul.f32 %v2204_v9, %v2204_v9  ;;  %v2992_v46 = vadd.f32 %v2991_v30, %v2990_v62  ;;  %v2207_v32 = vadd.f32 %v2206_v45, %v2046_v14  ;;  %v2059_v58 = vadd.f32 %v2989_v16, %v4120_v11 }
 0x20e   : > { %v2289_v7 = vadd.f32 %v2288_v47, %v2204_v9  ;;  %v2357_v27 = vadd.f32 %v2356_v21, %v2326_v36  ;;  %2261 = vst [vmem:[%s4148_s11 + $0xd8] sm:$0xff] %v2215_v26  ;;  %v2330_v63 = vmul.f32 %v2215_v26, %v2215_v26 }
 0x20f   : > { %2259 = vst [vmem:[%s4148_s11 + $0xc8] sm:$0xff] %v2207_v32  ;;  %v2328_v44 = vmul.f32 %v2207_v32, %v2207_v32  ;;  %v2062_v6 = vadd.f32 %v2992_v46, %v4126_v19 }
 0x210   : > { %v2358_v57 = vadd.f32 %v2357_v27, %v2327_v18  ;;  %v2290_v25 = vadd.f32 %v2289_v7, %v2207_v32 }
 0x211   : > { %v2993_v59 = vpop.f32.mrb[140].mxu1  ;;  %v3069_v10 = vpop.f32.mrb[140].mxu0 }
 0x212   : > { %v2291_v23 = vadd.f32 %v2290_v25, %v2212_v4  ;;  %v2359_v8 = vadd.f32 %v2358_v57, %v2328_v44  ;;  %v2994_v55 = vpop.f32.mrb[141].mxu1  ;;  %v2219_v13 = vpop.f32.mrb[141].mxu0 }
 0x213   : > { %v2995_v14 = vadd.f32 %v2994_v55, %v2993_v59  ;;  %v2220_v49 = vadd.f32 %v2219_v13, %v2059_v58  ;;  %v2996_v11 = vpop.f32.mrb[142].mxu1  ;;  %v3070_v31 = vpop.f32.mrb[142].mxu0 }
 0x214   : > { %v2360_v56 = vadd.f32 %v2359_v8, %v2329_v20  ;;  %v2292_v5 = vadd.f32 %v2291_v23, %v2215_v26  ;;  %v2997_v19 = vpop.f32.mrb[143].mxu1  ;;  %v2222_v33 = vpop.f32.mrb[143].mxu0 }
 0x215   : > { %v2067_v53 = vadd.f32 %v2995_v14, %v4132_v41  ;;  %2262 = vst [vmem:[%s4148_s11 + $0xe0] sm:$0xff] %v2220_v49  ;;  %v2331_v29 = vmul.f32 %v2220_v49, %v2220_v49  ;;  %v2998_v15 = vadd.f32 %v2997_v19, %v2996_v11  ;;  %v2223_v34 = vadd.f32 %v2222_v33, %v2062_v6 }
 0x216   : > { %v2293_v61 = vadd.f32 %v2292_v5, %v2220_v49  ;;  %v2361_v3 = vadd.f32 %v2360_v56, %v2330_v63 }
 0x217   : > { %v2228_v38 = vadd.f32 %v3069_v10, %v2067_v53  ;;  %v2070_v22 = vadd.f32 %v2998_v15, %v4138_v17  ;;  %2263 = vst [vmem:[%s4148_s11 + $0xe8] sm:$0xff] %v2223_v34  ;;  %v2332_v37 = vmul.f32 %v2223_v34, %v2223_v34 }
 0x218   : > { %v2362_v35 = vadd.f32 %v2361_v3, %v2331_v29  ;;  %v2294_v39 = vadd.f32 %v2293_v61, %v2223_v34 }
 0x219   : > { %2264 = vst [vmem:[%s4148_s11 + $0xf0] sm:$0xff] %v2228_v38  ;;  %v2333_v50 = vmul.f32 %v2228_v38, %v2228_v38  ;;  %v2231_v28 = vadd.f32 %v3070_v31, %v2070_v22 }
 0x21a   : > { %v2295_v1 = vadd.f32 %v2294_v39, %v2228_v38  ;;  %v2363_v41 = vadd.f32 %v2362_v35, %v2332_v37 }
 0x21b   : > { %2265 = vst [vmem:[%s4148_s11 + $0xf8] sm:$0xff] %v2231_v28  ;;  %v2334_v51 = vmul.f32 %v2231_v28, %v2231_v28 }
 0x21c   : > { %v2296_v54 = vadd.f32 %v2295_v1, %v2231_v28  ;;  %v2364_v12 = vadd.f32 %v2363_v41, %v2333_v50 }
 0x21e   : > { %v2297_v42 = vrot.slane %v2296_v54, 4  ;;  %v2365_v48 = vadd.f32 %v2364_v12, %v2334_v51 }
 0x220   : > { %v2298_v43 = vadd.f32 %v2297_v42, %v2296_v54  ;;  %v2366_v24 = vrot.slane %v2365_v48, 4 }
 0x222   : > { %v2299_v2 = vrot.slane %v2298_v43, 2  ;;  %v2367_v17 = vadd.f32 %v2366_v24, %v2365_v48 }
 0x224   : > { %v2300_v0 = vadd.f32 %v2299_v2, %v2298_v43  ;;  %v2368_v4 = vrot.slane %v2367_v17, 2 }
 0x226   : > { %v2301_v60 = vrot.slane %v2300_v0, 1  ;;  %v2369_v52 = vadd.f32 %v2368_v4, %v2367_v17 }
 0x228   : > { %v2370_v16 = vrot.slane %v2369_v52, 1  ;;  %v2302_v9 = vadd.f32 %v2301_v60, %v2300_v0 }
 0x22a   : > { %v2371_v62 = vadd.f32 %v2370_v16, %v2369_v52 }
 0x22c   : > { %v2373_v40 = vsel %vm2372_vm0, %v2302_v9, %v2371_v62 }
 0x22d   : > { %v2375_v36 = vsel %vm2374_vm1, %v2373_v40, 0.0 }
 0x22e   : > { %2376 = vst [vmem:[%s208_s17] sm:$0xff] %v2375_v36 }
 0x22f PF: > { %s15_s15 = sadd.s32 1, %s3175_s15  }
 0x230   : > { %p12_p4 = scmp.ge.s32.totalorder %s15_s15, 4  }
 0x232   :  { %14 = sbr.rel (!%p12_p4) target bundleno = 1 (0x1), region = 77 }

</bundles_post_ra>
